<compile_context>
chip_gen: v6e
topology: v6e:2x2x1
jax: 0.10.0
libtpu: 0.0.40
codegen_flags: <defaults>
</compile_context>

<pallas_src>
import functools
import math

import numpy as np
import jax
import jax.numpy as jnp
from jax import lax
from jax.experimental import pallas as pl
from jax.experimental.pallas import tpu as pltpu

NFREQ = 8            # dim_g / 8 frequencies (trignometric_embedding=True -> dim_g = 64)
DIM_G = 8 * NFREQ    # 64
WAVE_LEN = 1000.0
LN_EPS = 1e-5

# Python float scalars (NOT an array), so the kernel captures no array constants.
_FREQS = tuple(float(100.0 * WAVE_LEN ** (-(f / NFREQ))) for f in range(NFREQ))

# The kernel builds the embedding channels freq-major within each sin/cos half
# (c_kernel = half*32 + f*4 + d); PyTorch's order is delta-major (c_pt = half*32 + d*8 + f).
# _WG_PERM maps kernel channel -> PyTorch channel so the wrapper can permute the WG weight
# columns once (exact, O(h*64)), keeping PyTorch weight-loading semantics.
_WG_PERM = np.empty(DIM_G, dtype=np.int32)
for _half in range(2):
    for _f in range(NFREQ):
        for _d in range(4):
            _WG_PERM[_half * 32 + _f * 4 + _d] = _half * 32 + _d * NFREQ + _f


def _layer_norm(y, g, b):
    mu = jnp.mean(y, axis=-1, keepdims=True)
    var = jnp.mean(jnp.square(y - mu), axis=-1, keepdims=True)
    return (y - mu) * lax.rsqrt(var + LN_EPS) * g + b


def _box_mha_kernel(q_in_ref, k_in_ref, v_in_ref, gq_ref, gk_ref,
                    wq_ref, bq_ref, wk_ref, bk_ref, wv_ref, bv_ref,
                    wo_ref, bo_ref, wgw_ref, wgb_ref,
                    g0_ref, b0_ref, g1_ref, b1_ref,
                    o_ref, *, num_heads, d_k):
    f32 = jnp.float32
    bf16 = jnp.bfloat16

    xq = q_in_ref[0]                     # (L, D) f32 -- also the residual
    xk = k_in_ref[0]
    xv = v_in_ref[0]
    L, D = xq.shape

    # -------- BoxRelationalEmbedding deltas, lane-dense flat (1, L*L) rows --------
    # gq rows: [cx, cy, log w, log h, 1/w, 1/h] of the QUERY box i at flat index i*L + j.
    # gk rows: [cx, cy, log w, log h]          of the KEY   box j at flat index i*L + j.
    gq = gq_ref[0]                       # (6, L*L)
    gk = gk_ref[0]                       # (4, L*L)
    dx = jnp.log(jnp.maximum(jnp.abs((gq[0:1] - gk[0:1]) * gq[4:5]), 0.001))
    dy = jnp.log(jnp.maximum(jnp.abs((gq[1:2] - gk[1:2]) * gq[5:6]), 0.001))
    dw = gq[2:3] - gk[2:3]               # log(w_i / w_j)
    dh = gq[3:4] - gk[3:4]
    pos = jnp.concatenate([dx, dy, dw, dh], axis=0)                     # (4, L*L)

    # -------- 64-channel trig embedding, channel-major flat (64, L*L), bf16 --------
    mul = jnp.concatenate([pos * f for f in _FREQS], axis=0)            # (32, L*L)
    emb = jnp.concatenate([jnp.sin(mul), jnp.cos(mul)], axis=0).astype(bf16)   # (64, L*L)

    # -------- per-head WGs (Linear 64 -> 1): ONE un-batched MXU matmul --------
    wg = lax.dot_general(wgw_ref[...].astype(bf16), emb,
                         (((1,), (0,)), ((), ())),
                         preferred_element_type=f32)                    # (h, L*L)
    # ReLU fused with the clamp: log(max(relu(x), 1e-6)) == log(max(x, 1e-6)).
    logw = jnp.log(jnp.maximum(wg + wgb_ref[...], 1e-6))
    logw = logw.reshape(num_heads, L, L)                                # head-major bias

    # -------- q / k / v projections (nn.Linear: x @ W.T + b), bf16 MXU operands --------
    dn = (((1,), (1,)), ((), ()))
    q = lax.dot_general(xq.astype(bf16), wq_ref[...].astype(bf16), dn,
                        preferred_element_type=f32) + bq_ref[...]
    k = lax.dot_general(xk.astype(bf16), wk_ref[...].astype(bf16), dn,
                        preferred_element_type=f32) + bk_ref[...]
    v = lax.dot_general(xv.astype(bf16), wv_ref[...].astype(bf16), dn,
                        preferred_element_type=f32) + bv_ref[...]

    # Head-major (h, L, d_k): reshape + leading transpose (minor dim untouched).
    q_hm = jnp.transpose(q.reshape(L, num_heads, d_k), (1, 0, 2)).astype(bf16)
    k_hm = jnp.transpose(k.reshape(L, num_heads, d_k), (1, 0, 2)).astype(bf16)
    v_hm = jnp.transpose(v.reshape(L, num_heads, d_k), (1, 0, 2)).astype(bf16)

    # -------- box attention, batched over heads --------
    scale = 1.0 / math.sqrt(d_k)
    scores = jnp.einsum('hqd,hkd->hqk', q_hm, k_hm,
                        preferred_element_type=f32) * scale             # (h, L, L)
    logits = logw + scores
    m = jnp.max(logits, axis=-1, keepdims=True)
    e = jnp.exp(logits - m)
    p = e / jnp.sum(e, axis=-1, keepdims=True)        # exact divide (parity concern)
    # TODO(synk): nn.Dropout(p=0.1) on attention probs omitted (eval-mode identity).
    ctx = jnp.einsum('hqk,hkd->qhd', p.astype(bf16), v_hm,
                     preferred_element_type=f32)                        # (L, h, d_k)
    x_attn = ctx.reshape(L, D)

    out0 = _layer_norm(x_attn + xq, g0_ref[...], b0_ref[...])           # layer_norm0
    proj = lax.dot_general(out0.astype(bf16), wo_ref[...].astype(bf16), dn,
                           preferred_element_type=f32) + bo_ref[...]
    # TODO(synk): dropout on the output projection omitted (eval-mode identity).
    o_ref[0] = _layer_norm(proj + out0, g1_ref[...], b1_ref[...])       # layer_norm


def box_multi_headed_attention(q_in, k_in, v_in, boxes, params, *, num_heads):
    B, L, D = q_in.shape
    assert D % num_heads == 0
    d_k = D // num_heads
    LL = L * L

    # Wrapper pre-expansion (O(B*L^2), trivial XLA work): flat, lane-dense geometry rows.
    x_min, y_min = boxes[..., 0], boxes[..., 1]
    x_max, y_max = boxes[..., 2], boxes[..., 3]
    cx = (x_min + x_max) * 0.5
    cy = (y_min + y_max) * 0.5
    w = x_max - x_min + 1.0
    h = y_max - y_min + 1.0
    lw, lh = jnp.log(w), jnp.log(h)
    iw, ih = 1.0 / w, 1.0 / h

    def q_flat(a):      # query-box value at flat index i*L + j  ->  a[i]
        return jnp.repeat(a, L, axis=-1)

    def k_flat(a):      # key-box value at flat index i*L + j    ->  a[j]
        return jnp.tile(a, (1, L))

    geom_q = jnp.stack([q_flat(t) for t in (cx, cy, lw, lh, iw, ih)],
                       axis=1).astype(jnp.float32)                      # (B, 6, L*L)
    geom_k = jnp.stack([k_flat(t) for t in (cx, cy, lw, lh)],
                       axis=1).astype(jnp.float32)                      # (B, 4, L*L)

    # Permute the WG weight columns from PyTorch channel order to the kernel's order.
    wgw_kernel = params["wgw"][:, _WG_PERM]

    kernel = functools.partial(_box_mha_kernel, num_heads=num_heads, d_k=d_k)

    act_spec = lambda: pl.BlockSpec((1, L, D), lambda b: (b, 0, 0))
    full2 = lambda shape: pl.BlockSpec(shape, lambda b: (0, 0))

    in_specs = [
        act_spec(), act_spec(), act_spec(),
        pl.BlockSpec((1, 6, LL), lambda b: (b, 0, 0)),   # query-indexed flat geometry
        pl.BlockSpec((1, 4, LL), lambda b: (b, 0, 0)),   # key-indexed flat geometry
        full2((D, D)), full2((1, D)),       # Wq, bq
        full2((D, D)), full2((1, D)),       # Wk, bk
        full2((D, D)), full2((1, D)),       # Wv, bv
        full2((D, D)), full2((1, D)),       # Wo, bo  (linears[-1])
        full2((num_heads, DIM_G)),          # WG weights (h, 64), kernel channel order
        full2((num_heads, 1)),              # WG biases  (h, 1)
        full2((1, D)), full2((1, D)),       # layer_norm0 gamma/beta
        full2((1, D)), full2((1, D)),       # layer_norm  gamma/beta
    ]

    return pl.pallas_call(
        kernel,
        out_shape=jax.ShapeDtypeStruct((B, L, D), jnp.float32),
        grid_spec=pltpu.PrefetchScalarGridSpec(
            num_scalar_prefetch=0,
            grid=(B,),
            in_specs=in_specs,
            out_specs=pl.BlockSpec((1, L, D), lambda b: (b, 0, 0)),
        ),
        compiler_params=pltpu.CompilerParams(dimension_semantics=("parallel",)),
    )(q_in, k_in, v_in, geom_q, geom_k,
      params["wq"], params["bq"], params["wk"], params["bk"],
      params["wv"], params["bv"], params["wo"], params["bo"],
      wgw_kernel, params["wgb"],
      params["ln0_g"], params["ln0_b"], params["ln1_g"], params["ln1_b"])


def _reference(q_in, k_in, v_in, boxes, params, *, num_heads):
    """Pure-JAX f32 reference of the PyTorch forward (B == 1 semantics)."""
    B, L, D = q_in.shape
    d_k = D // num_heads
    x_min, y_min = boxes[..., 0], boxes[..., 1]
    x_max, y_max = boxes[..., 2], boxes[..., 3]
    cx = (x_min + x_max) * 0.5
    cy = (y_min + y_max) * 0.5
    w = x_max - x_min + 1.0
    h = y_max - y_min + 1.0
    dx = jnp.log(jnp.maximum(jnp.abs((cx[:, :, None] - cx[:, None, :]) / w[:, :, None]), 0.001))
    dy = jnp.log(jnp.maximum(jnp.abs((cy[:, :, None] - cy[:, None, :]) / h[:, :, None]), 0.001))
    dw = jnp.log(w[:, :, None] / w[:, None, :])
    dh = jnp.log(h[:, :, None] / h[:, None, :])
    pos = jnp.stack([dx, dy, dw, dh], axis=-1)                # (B, L, L, 4)
    freqs = jnp.asarray(_FREQS, dtype=jnp.float32)
    mul = (pos[..., None] * freqs).reshape(B, L, L, 4 * NFREQ)
    emb = jnp.concatenate([jnp.sin(mul), jnp.cos(mul)], axis=-1)   # (B, L, L, 64) PyTorch order
    wg = jnp.einsum('bqkc,hc->bhqk', emb, params['wgw']) \
        + params['wgb'][:, 0][None, :, None, None]
    wg = jnp.maximum(wg, 0.0)

    def lin(x, wt, b):
        return x @ wt.T + b

    def heads(x):
        return x.reshape(B, L, num_heads, d_k).transpose(0, 2, 1, 3)

    q = heads(lin(q_in, params['wq'], params['bq']))
    k = heads(lin(k_in, params['wk'], params['bk']))
    v = heads(lin(v_in, params['wv'], params['bv']))
    scores = jnp.einsum('bhqd,bhkd->bhqk', q, k) / math.sqrt(d_k)
    logits = jnp.log(jnp.maximum(wg, 1e-6)) + scores
    p = jax.nn.softmax(logits, axis=-1)
    ctx = jnp.einsum('bhqk,bhkd->bhqd', p, v).transpose(0, 2, 1, 3).reshape(B, L, D)
    out0 = _layer_norm(ctx + q_in, params['ln0_g'], params['ln0_b'])
    proj = lin(out0, params['wo'], params['bo'])
    return _layer_norm(proj + out0, params['ln1_g'], params['ln1_b'])


def init_params(key, d_model, num_heads, dim_g=DIM_G):
    """Deterministic init mimicking PyTorch defaults (uniform(+-1/sqrt(fan_in)), LN = 1/0)."""
    ks = jax.random.split(key, 6)

    def linear(k, out_f, in_f):
        bound = 1.0 / math.sqrt(in_f)
        kw, kb = jax.random.split(k)
        wgt = jax.random.uniform(kw, (out_f, in_f), jnp.float32, -bound, bound)
        b = jax.random.uniform(kb, (1, out_f), jnp.float32, -bound, bound)
        return wgt, b

    wq, bq = linear(ks[0], d_model, d_model)
    wk, bk = linear(ks[1], d_model, d_model)
    wv, bv = linear(ks[2], d_model, d_model)
    wo, bo = linear(ks[3], d_model, d_model)

    wg_bound = 1.0 / math.sqrt(dim_g)
    wgw = jax.random.uniform(ks[4], (num_heads, dim_g), jnp.float32, -wg_bound, wg_bound)
    wgb = jax.random.uniform(ks[5], (num_heads, 1), jnp.float32, -wg_bound, wg_bound)

    ones = jnp.ones((1, d_model), jnp.float32)
    zeros = jnp.zeros((1, d_model), jnp.float32)
    return dict(wq=wq, bq=bq, wk=wk, bk=bk, wv=wv, bv=bv, wo=wo, bo=bo,
                wgw=wgw, wgb=wgb,
                ln0_g=ones, ln0_b=zeros, ln1_g=ones, ln1_b=zeros)


if __name__ == "__main__":
    # B=1 (see note at top), L=16 boxes, d_model=64, h=8 heads -> d_k = d_v = 8.
    B, L, d_model, h = 1, 16, 64, 8
    key = jax.random.PRNGKey(0)
    kq, kk, kv, kmn, ksz, kp = jax.random.split(key, 6)

    input_query = jax.random.normal(kq, (B, L, d_model), jnp.float32)
    input_key = jax.random.normal(kk, (B, L, d_model), jnp.float32)
    input_value = jax.random.normal(kv, (B, L, d_model), jnp.float32)

    # boxes = [x_min, y_min, x_max, y_max] with x_max >= x_min, y_max >= y_min
    mins = jax.random.uniform(kmn, (B, L, 2), jnp.float32, 0.0, 8.0)
    sizes = jax.random.uniform(ksz, (B, L, 2), jnp.float32, 1.0, 8.0)
    input_box = jnp.concatenate([mins, mins + sizes], axis=-1)   # (B, L, 4)

    params = init_params(kp, d_model, h)

    out = box_multi_headed_attention(input_query, input_key, input_value, input_box,
                                     params, num_heads=h)
    out = jax.block_until_ready(out)
    assert out.shape == (B, L, d_model)
    assert bool(jnp.all(jnp.isfinite(out)))

    ref = _reference(input_query, input_key, input_value, input_box, params, num_heads=h)
    err = float(jnp.max(jnp.abs(out - ref)))
    assert err < 2e-1, f"kernel deviates from f32 reference: max abs err {err}"
    print("KERNEL_OK")
</pallas_src>

<mosaic_0001>
module attributes {stable_mosaic.version = 11 : i64} {
  func.func @_box_mha_kernel(%arg0: i32, %arg1: memref<1x16x64xf32, #tpu.memory_space<vmem>>, %arg2: memref<1x16x64xf32, #tpu.memory_space<vmem>>, %arg3: memref<1x16x64xf32, #tpu.memory_space<vmem>>, %arg4: memref<1x6x256xf32, #tpu.memory_space<vmem>>, %arg5: memref<1x4x256xf32, #tpu.memory_space<vmem>>, %arg6: memref<64x64xf32, #tpu.memory_space<vmem>>, %arg7: memref<1x64xf32, #tpu.memory_space<vmem>>, %arg8: memref<64x64xf32, #tpu.memory_space<vmem>>, %arg9: memref<1x64xf32, #tpu.memory_space<vmem>>, %arg10: memref<64x64xf32, #tpu.memory_space<vmem>>, %arg11: memref<1x64xf32, #tpu.memory_space<vmem>>, %arg12: memref<64x64xf32, #tpu.memory_space<vmem>>, %arg13: memref<1x64xf32, #tpu.memory_space<vmem>>, %arg14: memref<8x64xf32, #tpu.memory_space<vmem>>, %arg15: memref<8x1xf32, #tpu.memory_space<vmem>>, %arg16: memref<1x64xf32, #tpu.memory_space<vmem>>, %arg17: memref<1x64xf32, #tpu.memory_space<vmem>>, %arg18: memref<1x64xf32, #tpu.memory_space<vmem>>, %arg19: memref<1x64xf32, #tpu.memory_space<vmem>>, %arg20: memref<1x16x64xf32, #tpu.memory_space<vmem>>) attributes {dimension_semantics = [#tpu.dimension_semantics<parallel>], iteration_bounds = array<i64: 1>, scalar_prefetch = 0 : i64, scratch_operands = 0 : i64, tpu.core_type = #tpu.core_type<tc>, window_params = [{transform_indices = @transform_0, window_bounds = array<i64: 1, 16, 64>}, {transform_indices = @transform_1, window_bounds = array<i64: 1, 16, 64>}, {transform_indices = @transform_2, window_bounds = array<i64: 1, 16, 64>}, {transform_indices = @transform_3, window_bounds = array<i64: 1, 6, 256>}, {transform_indices = @transform_4, window_bounds = array<i64: 1, 4, 256>}, {pipeline_mode = #tpu.pipeline_mode<synchronous>, transform_indices = @transform_5, window_bounds = array<i64: 64, 64>}, {pipeline_mode = #tpu.pipeline_mode<synchronous>, transform_indices = @transform_6, window_bounds = array<i64: 1, 64>}, {pipeline_mode = #tpu.pipeline_mode<synchronous>, transform_indices = @transform_7, window_bounds = array<i64: 64, 64>}, {pipeline_mode = #tpu.pipeline_mode<synchronous>, transform_indices = @transform_8, window_bounds = array<i64: 1, 64>}, {pipeline_mode = #tpu.pipeline_mode<synchronous>, transform_indices = @transform_9, window_bounds = array<i64: 64, 64>}, {pipeline_mode = #tpu.pipeline_mode<synchronous>, transform_indices = @transform_10, window_bounds = array<i64: 1, 64>}, {pipeline_mode = #tpu.pipeline_mode<synchronous>, transform_indices = @transform_11, window_bounds = array<i64: 64, 64>}, {pipeline_mode = #tpu.pipeline_mode<synchronous>, transform_indices = @transform_12, window_bounds = array<i64: 1, 64>}, {pipeline_mode = #tpu.pipeline_mode<synchronous>, transform_indices = @transform_13, window_bounds = array<i64: 8, 64>}, {pipeline_mode = #tpu.pipeline_mode<synchronous>, transform_indices = @transform_14, window_bounds = array<i64: 8, 1>}, {pipeline_mode = #tpu.pipeline_mode<synchronous>, transform_indices = @transform_15, window_bounds = array<i64: 1, 64>}, {pipeline_mode = #tpu.pipeline_mode<synchronous>, transform_indices = @transform_16, window_bounds = array<i64: 1, 64>}, {pipeline_mode = #tpu.pipeline_mode<synchronous>, transform_indices = @transform_17, window_bounds = array<i64: 1, 64>}, {pipeline_mode = #tpu.pipeline_mode<synchronous>, transform_indices = @transform_18, window_bounds = array<i64: 1, 64>}, {transform_indices = @transform_19, window_bounds = array<i64: 1, 16, 64>}]} {
    %c0 = arith.constant 0 : index
    %c0_0 = arith.constant 0 : index
    %c0_1 = arith.constant 0 : index
    %0 = vector.load %arg1[%c0, %c0_0, %c0_1] : memref<1x16x64xf32, #tpu.memory_space<vmem>>, vector<1x16x64xf32>
    %1 = vector.shape_cast %0 : vector<1x16x64xf32> to vector<16x64xf32>
    %c0_2 = arith.constant 0 : index
    %c0_3 = arith.constant 0 : index
    %c0_4 = arith.constant 0 : index
    %2 = vector.load %arg2[%c0_2, %c0_3, %c0_4] : memref<1x16x64xf32, #tpu.memory_space<vmem>>, vector<1x16x64xf32>
    %3 = vector.shape_cast %2 : vector<1x16x64xf32> to vector<16x64xf32>
    %c0_5 = arith.constant 0 : index
    %c0_6 = arith.constant 0 : index
    %c0_7 = arith.constant 0 : index
    %4 = vector.load %arg3[%c0_5, %c0_6, %c0_7] : memref<1x16x64xf32, #tpu.memory_space<vmem>>, vector<1x16x64xf32>
    %5 = vector.shape_cast %4 : vector<1x16x64xf32> to vector<16x64xf32>
    %c0_8 = arith.constant 0 : index
    %c0_9 = arith.constant 0 : index
    %c0_10 = arith.constant 0 : index
    %6 = vector.load %arg4[%c0_8, %c0_9, %c0_10] : memref<1x6x256xf32, #tpu.memory_space<vmem>>, vector<1x6x256xf32>
    %7 = vector.shape_cast %6 : vector<1x6x256xf32> to vector<6x256xf32>
    %c0_11 = arith.constant 0 : index
    %c0_12 = arith.constant 0 : index
    %c0_13 = arith.constant 0 : index
    %8 = vector.load %arg5[%c0_11, %c0_12, %c0_13] : memref<1x4x256xf32, #tpu.memory_space<vmem>>, vector<1x4x256xf32>
    %9 = vector.shape_cast %8 : vector<1x4x256xf32> to vector<4x256xf32>
    %10 = vector.extract_strided_slice %7 {offsets = [0, 0], sizes = [1, 256], strides = [1, 1]} : vector<6x256xf32> to vector<1x256xf32>
    %11 = vector.extract_strided_slice %9 {offsets = [0, 0], sizes = [1, 256], strides = [1, 1]} : vector<4x256xf32> to vector<1x256xf32>
    %12 = arith.subf %10, %11 : vector<1x256xf32>
    %13 = vector.extract_strided_slice %7 {offsets = [4, 0], sizes = [1, 256], strides = [1, 1]} : vector<6x256xf32> to vector<1x256xf32>
    %14 = arith.mulf %12, %13 : vector<1x256xf32>
    %15 = math.absf %14 : vector<1x256xf32>
    %cst = arith.constant 1.000000e-03 : f32
    %16 = vector.broadcast %cst : f32 to vector<1x256xf32>
    %17 = arith.maximumf %15, %16 : vector<1x256xf32>
    %18 = math.log %17 : vector<1x256xf32>
    %19 = vector.extract_strided_slice %7 {offsets = [1, 0], sizes = [1, 256], strides = [1, 1]} : vector<6x256xf32> to vector<1x256xf32>
    %20 = vector.extract_strided_slice %9 {offsets = [1, 0], sizes = [1, 256], strides = [1, 1]} : vector<4x256xf32> to vector<1x256xf32>
    %21 = arith.subf %19, %20 : vector<1x256xf32>
    %22 = vector.extract_strided_slice %7 {offsets = [5, 0], sizes = [1, 256], strides = [1, 1]} : vector<6x256xf32> to vector<1x256xf32>
    %23 = arith.mulf %21, %22 : vector<1x256xf32>
    %24 = math.absf %23 : vector<1x256xf32>
    %cst_14 = arith.constant 1.000000e-03 : f32
    %25 = vector.broadcast %cst_14 : f32 to vector<1x256xf32>
    %26 = arith.maximumf %24, %25 : vector<1x256xf32>
    %27 = math.log %26 : vector<1x256xf32>
    %28 = vector.extract_strided_slice %7 {offsets = [2, 0], sizes = [1, 256], strides = [1, 1]} : vector<6x256xf32> to vector<1x256xf32>
    %29 = vector.extract_strided_slice %9 {offsets = [2, 0], sizes = [1, 256], strides = [1, 1]} : vector<4x256xf32> to vector<1x256xf32>
    %30 = arith.subf %28, %29 : vector<1x256xf32>
    %31 = vector.extract_strided_slice %7 {offsets = [3, 0], sizes = [1, 256], strides = [1, 1]} : vector<6x256xf32> to vector<1x256xf32>
    %32 = vector.extract_strided_slice %9 {offsets = [3, 0], sizes = [1, 256], strides = [1, 1]} : vector<4x256xf32> to vector<1x256xf32>
    %33 = arith.subf %31, %32 : vector<1x256xf32>
    %34 = tpu.concatenate %18, %27, %30, %33 in 0 : vector<1x256xf32>, vector<1x256xf32>, vector<1x256xf32>, vector<1x256xf32> -> vector<4x256xf32>
    %cst_15 = arith.constant 1.000000e+02 : f32
    %35 = vector.broadcast %cst_15 : f32 to vector<4x256xf32>
    %36 = arith.mulf %34, %35 : vector<4x256xf32>
    %cst_16 = arith.constant 42.169651 : f32
    %37 = vector.broadcast %cst_16 : f32 to vector<4x256xf32>
    %38 = arith.mulf %34, %37 : vector<4x256xf32>
    %cst_17 = arith.constant 17.782795 : f32
    %39 = vector.broadcast %cst_17 : f32 to vector<4x256xf32>
    %40 = arith.mulf %34, %39 : vector<4x256xf32>
    %cst_18 = arith.constant 7.4989419 : f32
    %41 = vector.broadcast %cst_18 : f32 to vector<4x256xf32>
    %42 = arith.mulf %34, %41 : vector<4x256xf32>
    %cst_19 = arith.constant 3.1622777 : f32
    %43 = vector.broadcast %cst_19 : f32 to vector<4x256xf32>
    %44 = arith.mulf %34, %43 : vector<4x256xf32>
    %cst_20 = arith.constant 1.33352149 : f32
    %45 = vector.broadcast %cst_20 : f32 to vector<4x256xf32>
    %46 = arith.mulf %34, %45 : vector<4x256xf32>
    %cst_21 = arith.constant 0.562341332 : f32
    %47 = vector.broadcast %cst_21 : f32 to vector<4x256xf32>
    %48 = arith.mulf %34, %47 : vector<4x256xf32>
    %cst_22 = arith.constant 0.237137377 : f32
    %49 = vector.broadcast %cst_22 : f32 to vector<4x256xf32>
    %50 = arith.mulf %34, %49 : vector<4x256xf32>
    %51 = tpu.concatenate %36, %38, %40, %42, %44, %46, %48, %50 in 0 : vector<4x256xf32>, vector<4x256xf32>, vector<4x256xf32>, vector<4x256xf32>, vector<4x256xf32>, vector<4x256xf32>, vector<4x256xf32>, vector<4x256xf32> -> vector<32x256xf32>
    %52 = math.sin %51 : vector<32x256xf32>
    %53 = math.cos %51 : vector<32x256xf32>
    %54 = tpu.concatenate %52, %53 in 0 : vector<32x256xf32>, vector<32x256xf32> -> vector<64x256xf32>
    %55 = arith.truncf %54 : vector<64x256xf32> to vector<64x256xbf16>
    %c0_23 = arith.constant 0 : index
    %c0_24 = arith.constant 0 : index
    %56 = vector.load %arg14[%c0_23, %c0_24] : memref<8x64xf32, #tpu.memory_space<vmem>>, vector<8x64xf32>
    %57 = arith.truncf %56 : vector<8x64xf32> to vector<8x64xbf16>
    %cst_25 = arith.constant dense<0.000000e+00> : vector<8x256xf32>
    %58 = tpu.matmul %57, %55, %cst_25 {dimension_numbers = #tpu.dot_dimension_numbers<[1], [0], [0], [1], [0, 0, 1, 1], [], []>} : vector<8x64xbf16>, vector<64x256xbf16>, vector<8x256xf32> -> vector<8x256xf32>
    %c0_26 = arith.constant 0 : index
    %c0_27 = arith.constant 0 : index
    %59 = vector.load %arg15[%c0_26, %c0_27] : memref<8x1xf32, #tpu.memory_space<vmem>>, vector<8x1xf32>
    %60 = vector.broadcast %59 : vector<8x1xf32> to vector<8x256xf32>
    %61 = arith.addf %58, %60 : vector<8x256xf32>
    %cst_28 = arith.constant 9.99999997E-7 : f32
    %62 = vector.broadcast %cst_28 : f32 to vector<8x256xf32>
    %63 = arith.maximumf %61, %62 : vector<8x256xf32>
    %64 = math.log %63 : vector<8x256xf32>
    %65 = vector.shape_cast %64 : vector<8x256xf32> to vector<8x16x16xf32>
    %66 = arith.truncf %1 : vector<16x64xf32> to vector<16x64xbf16>
    %c0_29 = arith.constant 0 : index
    %c0_30 = arith.constant 0 : index
    %67 = vector.load %arg6[%c0_29, %c0_30] : memref<64x64xf32, #tpu.memory_space<vmem>>, vector<64x64xf32>
    %68 = arith.truncf %67 : vector<64x64xf32> to vector<64x64xbf16>
    %cst_31 = arith.constant dense<0.000000e+00> : vector<16x64xf32>
    %69 = tpu.matmul %66, %68, %cst_31 {dimension_numbers = #tpu.dot_dimension_numbers<[1], [1], [0], [0], [0, 0, 1, 0], [], []>} : vector<16x64xbf16>, vector<64x64xbf16>, vector<16x64xf32> -> vector<16x64xf32>
    %c0_32 = arith.constant 0 : index
    %c0_33 = arith.constant 0 : index
    %70 = vector.load %arg7[%c0_32, %c0_33] : memref<1x64xf32, #tpu.memory_space<vmem>>, vector<1x64xf32>
    %71 = vector.broadcast %70 : vector<1x64xf32> to vector<16x64xf32>
    %72 = arith.addf %69, %71 : vector<16x64xf32>
    %73 = arith.truncf %3 : vector<16x64xf32> to vector<16x64xbf16>
    %c0_34 = arith.constant 0 : index
    %c0_35 = arith.constant 0 : index
    %74 = vector.load %arg8[%c0_34, %c0_35] : memref<64x64xf32, #tpu.memory_space<vmem>>, vector<64x64xf32>
    %75 = arith.truncf %74 : vector<64x64xf32> to vector<64x64xbf16>
    %cst_36 = arith.constant dense<0.000000e+00> : vector<16x64xf32>
    %76 = tpu.matmul %73, %75, %cst_36 {dimension_numbers = #tpu.dot_dimension_numbers<[1], [1], [0], [0], [0, 0, 1, 0], [], []>} : vector<16x64xbf16>, vector<64x64xbf16>, vector<16x64xf32> -> vector<16x64xf32>
    %c0_37 = arith.constant 0 : index
    %c0_38 = arith.constant 0 : index
    %77 = vector.load %arg9[%c0_37, %c0_38] : memref<1x64xf32, #tpu.memory_space<vmem>>, vector<1x64xf32>
    %78 = vector.broadcast %77 : vector<1x64xf32> to vector<16x64xf32>
    %79 = arith.addf %76, %78 : vector<16x64xf32>
    %80 = arith.truncf %5 : vector<16x64xf32> to vector<16x64xbf16>
    %c0_39 = arith.constant 0 : index
    %c0_40 = arith.constant 0 : index
    %81 = vector.load %arg10[%c0_39, %c0_40] : memref<64x64xf32, #tpu.memory_space<vmem>>, vector<64x64xf32>
    %82 = arith.truncf %81 : vector<64x64xf32> to vector<64x64xbf16>
    %cst_41 = arith.constant dense<0.000000e+00> : vector<16x64xf32>
    %83 = tpu.matmul %80, %82, %cst_41 {dimension_numbers = #tpu.dot_dimension_numbers<[1], [1], [0], [0], [0, 0, 1, 0], [], []>} : vector<16x64xbf16>, vector<64x64xbf16>, vector<16x64xf32> -> vector<16x64xf32>
    %c0_42 = arith.constant 0 : index
    %c0_43 = arith.constant 0 : index
    %84 = vector.load %arg11[%c0_42, %c0_43] : memref<1x64xf32, #tpu.memory_space<vmem>>, vector<1x64xf32>
    %85 = vector.broadcast %84 : vector<1x64xf32> to vector<16x64xf32>
    %86 = arith.addf %83, %85 : vector<16x64xf32>
    %87 = vector.shape_cast %72 : vector<16x64xf32> to vector<16x8x8xf32>
    %88 = tpu.transpose %87, [1, 0, 2] : vector<16x8x8xf32> -> vector<8x16x8xf32>
    %89 = arith.truncf %88 : vector<8x16x8xf32> to vector<8x16x8xbf16>
    %90 = vector.shape_cast %79 : vector<16x64xf32> to vector<16x8x8xf32>
    %91 = tpu.transpose %90, [1, 0, 2] : vector<16x8x8xf32> -> vector<8x16x8xf32>
    %92 = arith.truncf %91 : vector<8x16x8xf32> to vector<8x16x8xbf16>
    %93 = vector.shape_cast %86 : vector<16x64xf32> to vector<16x8x8xf32>
    %94 = tpu.transpose %93, [1, 0, 2] : vector<16x8x8xf32> -> vector<8x16x8xf32>
    %95 = arith.truncf %94 : vector<8x16x8xf32> to vector<8x16x8xbf16>
    "tpu.trace_start"() <{level = 10 : i32, message = "hqd,hkd->hqk"}> : () -> ()
    %cst_44 = arith.constant dense<0.000000e+00> : vector<8x16x16xf32>
    %96 = tpu.matmul %89, %92, %cst_44 {dimension_numbers = #tpu.dot_dimension_numbers<[2], [2], [1], [1], [0, 0, 0, 1, 1, 1], [0], [0]>} : vector<8x16x8xbf16>, vector<8x16x8xbf16>, vector<8x16x16xf32> -> vector<8x16x16xf32>
    "tpu.trace_stop"() : () -> ()
    %cst_45 = arith.constant 0.353553385 : f32
    %97 = vector.broadcast %cst_45 : f32 to vector<8x16x16xf32>
    %98 = arith.mulf %96, %97 : vector<8x16x16xf32>
    %99 = arith.addf %65, %98 : vector<8x16x16xf32>
    %cst_46 = arith.constant dense<0xFF800000> : vector<8x16xf32>
    %100 = vector.multi_reduction <maximumf>, %99, %cst_46 [2] : vector<8x16x16xf32> to vector<8x16xf32>
    %101 = vector.shape_cast %100 : vector<8x16xf32> to vector<8x16x1xf32>
    %102 = vector.broadcast %101 : vector<8x16x1xf32> to vector<8x16x16xf32>
    %103 = arith.subf %99, %102 : vector<8x16x16xf32>
    %104 = math.exp %103 : vector<8x16x16xf32>
    %cst_47 = arith.constant dense<0.000000e+00> : vector<8x16xf32>
    %105 = vector.multi_reduction <add>, %104, %cst_47 [2] : vector<8x16x16xf32> to vector<8x16xf32>
    %106 = vector.shape_cast %105 : vector<8x16xf32> to vector<8x16x1xf32>
    %107 = vector.broadcast %106 : vector<8x16x1xf32> to vector<8x16x16xf32>
    %108 = arith.divf %104, %107 : vector<8x16x16xf32>
    %109 = arith.truncf %108 : vector<8x16x16xf32> to vector<8x16x16xbf16>
    "tpu.trace_start"() <{level = 10 : i32, message = "hqk,hkd->qhd"}> : () -> ()
    %cst_48 = arith.constant dense<0.000000e+00> : vector<8x8x16xf32>
    %110 = tpu.matmul %95, %109, %cst_48 {dimension_numbers = #tpu.dot_dimension_numbers<[1], [2], [2], [1], [0, 0, 0, 2, 1, 1], [0], [0]>} : vector<8x16x8xbf16>, vector<8x16x16xbf16>, vector<8x8x16xf32> -> vector<8x8x16xf32>
    %111 = tpu.transpose %110, [2, 0, 1] : vector<8x8x16xf32> -> vector<16x8x8xf32>
    "tpu.trace_stop"() : () -> ()
    %112 = vector.shape_cast %111 : vector<16x8x8xf32> to vector<16x64xf32>
    %113 = arith.addf %112, %1 : vector<16x64xf32>
    %c0_49 = arith.constant 0 : index
    %c0_50 = arith.constant 0 : index
    %114 = vector.load %arg16[%c0_49, %c0_50] : memref<1x64xf32, #tpu.memory_space<vmem>>, vector<1x64xf32>
    %c0_51 = arith.constant 0 : index
    %c0_52 = arith.constant 0 : index
    %115 = vector.load %arg17[%c0_51, %c0_52] : memref<1x64xf32, #tpu.memory_space<vmem>>, vector<1x64xf32>
    %cst_53 = arith.constant dense<0.000000e+00> : vector<16xf32>
    %116 = vector.multi_reduction <add>, %113, %cst_53 [1] : vector<16x64xf32> to vector<16xf32>
    %117 = vector.shape_cast %116 : vector<16xf32> to vector<16x1xf32>
    %cst_54 = arith.constant 6.400000e+01 : f32
    %118 = vector.broadcast %cst_54 : f32 to vector<16x1xf32>
    %119 = arith.divf %117, %118 : vector<16x1xf32>
    %120 = vector.broadcast %119 : vector<16x1xf32> to vector<16x64xf32>
    %121 = arith.subf %113, %120 : vector<16x64xf32>
    %122 = arith.mulf %121, %121 : vector<16x64xf32>
    %cst_55 = arith.constant dense<0.000000e+00> : vector<16xf32>
    %123 = vector.multi_reduction <add>, %122, %cst_55 [1] : vector<16x64xf32> to vector<16xf32>
    %124 = vector.shape_cast %123 : vector<16xf32> to vector<16x1xf32>
    %cst_56 = arith.constant 6.400000e+01 : f32
    %125 = vector.broadcast %cst_56 : f32 to vector<16x1xf32>
    %126 = arith.divf %124, %125 : vector<16x1xf32>
    %127 = vector.broadcast %119 : vector<16x1xf32> to vector<16x64xf32>
    %128 = arith.subf %113, %127 : vector<16x64xf32>
    %cst_57 = arith.constant 9.99999974E-6 : f32
    %129 = vector.broadcast %cst_57 : f32 to vector<16x1xf32>
    %130 = arith.addf %126, %129 : vector<16x1xf32>
    %131 = math.rsqrt %130 : vector<16x1xf32>
    %132 = vector.broadcast %131 : vector<16x1xf32> to vector<16x64xf32>
    %133 = arith.mulf %128, %132 : vector<16x64xf32>
    %134 = vector.broadcast %114 : vector<1x64xf32> to vector<16x64xf32>
    %135 = arith.mulf %133, %134 : vector<16x64xf32>
    %136 = vector.broadcast %115 : vector<1x64xf32> to vector<16x64xf32>
    %137 = arith.addf %135, %136 : vector<16x64xf32>
    %138 = arith.truncf %137 : vector<16x64xf32> to vector<16x64xbf16>
    %c0_58 = arith.constant 0 : index
    %c0_59 = arith.constant 0 : index
    %139 = vector.load %arg12[%c0_58, %c0_59] : memref<64x64xf32, #tpu.memory_space<vmem>>, vector<64x64xf32>
    %140 = arith.truncf %139 : vector<64x64xf32> to vector<64x64xbf16>
    %cst_60 = arith.constant dense<0.000000e+00> : vector<16x64xf32>
    %141 = tpu.matmul %138, %140, %cst_60 {dimension_numbers = #tpu.dot_dimension_numbers<[1], [1], [0], [0], [0, 0, 1, 0], [], []>} : vector<16x64xbf16>, vector<64x64xbf16>, vector<16x64xf32> -> vector<16x64xf32>
    %c0_61 = arith.constant 0 : index
    %c0_62 = arith.constant 0 : index
    %142 = vector.load %arg13[%c0_61, %c0_62] : memref<1x64xf32, #tpu.memory_space<vmem>>, vector<1x64xf32>
    %143 = vector.broadcast %142 : vector<1x64xf32> to vector<16x64xf32>
    %144 = arith.addf %141, %143 : vector<16x64xf32>
    %145 = arith.addf %144, %137 : vector<16x64xf32>
    %c0_63 = arith.constant 0 : index
    %c0_64 = arith.constant 0 : index
    %146 = vector.load %arg18[%c0_63, %c0_64] : memref<1x64xf32, #tpu.memory_space<vmem>>, vector<1x64xf32>
    %c0_65 = arith.constant 0 : index
    %c0_66 = arith.constant 0 : index
    %147 = vector.load %arg19[%c0_65, %c0_66] : memref<1x64xf32, #tpu.memory_space<vmem>>, vector<1x64xf32>
    %cst_67 = arith.constant dense<0.000000e+00> : vector<16xf32>
    %148 = vector.multi_reduction <add>, %145, %cst_67 [1] : vector<16x64xf32> to vector<16xf32>
    %149 = vector.shape_cast %148 : vector<16xf32> to vector<16x1xf32>
    %cst_68 = arith.constant 6.400000e+01 : f32
    %150 = vector.broadcast %cst_68 : f32 to vector<16x1xf32>
    %151 = arith.divf %149, %150 : vector<16x1xf32>
    %152 = vector.broadcast %151 : vector<16x1xf32> to vector<16x64xf32>
    %153 = arith.subf %145, %152 : vector<16x64xf32>
    %154 = arith.mulf %153, %153 : vector<16x64xf32>
    %cst_69 = arith.constant dense<0.000000e+00> : vector<16xf32>
    %155 = vector.multi_reduction <add>, %154, %cst_69 [1] : vector<16x64xf32> to vector<16xf32>
    %156 = vector.shape_cast %155 : vector<16xf32> to vector<16x1xf32>
    %cst_70 = arith.constant 6.400000e+01 : f32
    %157 = vector.broadcast %cst_70 : f32 to vector<16x1xf32>
    %158 = arith.divf %156, %157 : vector<16x1xf32>
    %159 = vector.broadcast %151 : vector<16x1xf32> to vector<16x64xf32>
    %160 = arith.subf %145, %159 : vector<16x64xf32>
    %cst_71 = arith.constant 9.99999974E-6 : f32
    %161 = vector.broadcast %cst_71 : f32 to vector<16x1xf32>
    %162 = arith.addf %158, %161 : vector<16x1xf32>
    %163 = math.rsqrt %162 : vector<16x1xf32>
    %164 = vector.broadcast %163 : vector<16x1xf32> to vector<16x64xf32>
    %165 = arith.mulf %160, %164 : vector<16x64xf32>
    %166 = vector.broadcast %146 : vector<1x64xf32> to vector<16x64xf32>
    %167 = arith.mulf %165, %166 : vector<16x64xf32>
    %168 = vector.broadcast %147 : vector<1x64xf32> to vector<16x64xf32>
    %169 = arith.addf %167, %168 : vector<16x64xf32>
    %c0_72 = arith.constant 0 : index
    %c0_73 = arith.constant 0 : index
    %c0_74 = arith.constant 0 : index
    %170 = vector.load %arg20[%c0_72, %c0_73, %c0_74] : memref<1x16x64xf32, #tpu.memory_space<vmem>>, vector<1x16x64xf32>
    %171 = vector.shape_cast %170 : vector<1x16x64xf32> to vector<16x64xf32>
    %172 = vector.shape_cast %169 : vector<16x64xf32> to vector<1x16x64xf32>
    tpu.vector_store %arg20[%c0_72, %c0_73, %c0_74], %172 {strides = array<i32>} : memref<1x16x64xf32, #tpu.memory_space<vmem>>, vector<1x16x64xf32>,
    return
  }
  func.func @transform_0(%arg0: i32) -> (i32, i32, i32) {
    %c0_i32 = arith.constant 0 : i32
    %c0_i32_0 = arith.constant 0 : i32
    %c0_i32_1 = arith.constant 0 : i32
    return %arg0, %c0_i32, %c0_i32_0 : i32, i32, i32
  }
  func.func @transform_1(%arg0: i32) -> (i32, i32, i32) {
    %c0_i32 = arith.constant 0 : i32
    %c0_i32_0 = arith.constant 0 : i32
    %c0_i32_1 = arith.constant 0 : i32
    return %arg0, %c0_i32, %c0_i32_0 : i32, i32, i32
  }
  func.func @transform_2(%arg0: i32) -> (i32, i32, i32) {
    %c0_i32 = arith.constant 0 : i32
    %c0_i32_0 = arith.constant 0 : i32
    %c0_i32_1 = arith.constant 0 : i32
    return %arg0, %c0_i32, %c0_i32_0 : i32, i32, i32
  }
  func.func @transform_3(%arg0: i32) -> (i32, i32, i32) {
    %c0_i32 = arith.constant 0 : i32
    %c0_i32_0 = arith.constant 0 : i32
    %c0_i32_1 = arith.constant 0 : i32
    return %arg0, %c0_i32, %c0_i32_0 : i32, i32, i32
  }
  func.func @transform_4(%arg0: i32) -> (i32, i32, i32) {
    %c0_i32 = arith.constant 0 : i32
    %c0_i32_0 = arith.constant 0 : i32
    %c0_i32_1 = arith.constant 0 : i32
    return %arg0, %c0_i32, %c0_i32_0 : i32, i32, i32
  }
  func.func @transform_5(%arg0: i32) -> (i32, i32) {
    %c0_i32 = arith.constant 0 : i32
    %c0_i32_0 = arith.constant 0 : i32
    %c0_i32_1 = arith.constant 0 : i32
    return %c0_i32, %c0_i32_0 : i32, i32
  }
  func.func @transform_6(%arg0: i32) -> (i32, i32) {
    %c0_i32 = arith.constant 0 : i32
    %c0_i32_0 = arith.constant 0 : i32
    %c0_i32_1 = arith.constant 0 : i32
    return %c0_i32, %c0_i32_0 : i32, i32
  }
  func.func @transform_7(%arg0: i32) -> (i32, i32) {
    %c0_i32 = arith.constant 0 : i32
    %c0_i32_0 = arith.constant 0 : i32
    %c0_i32_1 = arith.constant 0 : i32
    return %c0_i32, %c0_i32_0 : i32, i32
  }
  func.func @transform_8(%arg0: i32) -> (i32, i32) {
    %c0_i32 = arith.constant 0 : i32
    %c0_i32_0 = arith.constant 0 : i32
    %c0_i32_1 = arith.constant 0 : i32
    return %c0_i32, %c0_i32_0 : i32, i32
  }
  func.func @transform_9(%arg0: i32) -> (i32, i32) {
    %c0_i32 = arith.constant 0 : i32
    %c0_i32_0 = arith.constant 0 : i32
    %c0_i32_1 = arith.constant 0 : i32
    return %c0_i32, %c0_i32_0 : i32, i32
  }
  func.func @transform_10(%arg0: i32) -> (i32, i32) {
    %c0_i32 = arith.constant 0 : i32
    %c0_i32_0 = arith.constant 0 : i32
    %c0_i32_1 = arith.constant 0 : i32
    return %c0_i32, %c0_i32_0 : i32, i32
  }
  func.func @transform_11(%arg0: i32) -> (i32, i32) {
    %c0_i32 = arith.constant 0 : i32
    %c0_i32_0 = arith.constant 0 : i32
    %c0_i32_1 = arith.constant 0 : i32
    return %c0_i32, %c0_i32_0 : i32, i32
  }
  func.func @transform_12(%arg0: i32) -> (i32, i32) {
    %c0_i32 = arith.constant 0 : i32
    %c0_i32_0 = arith.constant 0 : i32
    %c0_i32_1 = arith.constant 0 : i32
    return %c0_i32, %c0_i32_0 : i32, i32
  }
  func.func @transform_13(%arg0: i32) -> (i32, i32) {
    %c0_i32 = arith.constant 0 : i32
    %c0_i32_0 = arith.constant 0 : i32
    %c0_i32_1 = arith.constant 0 : i32
    return %c0_i32, %c0_i32_0 : i32, i32
  }
  func.func @transform_14(%arg0: i32) -> (i32, i32) {
    %c0_i32 = arith.constant 0 : i32
    %c0_i32_0 = arith.constant 0 : i32
    %c0_i32_1 = arith.constant 0 : i32
    return %c0_i32, %c0_i32_0 : i32, i32
  }
  func.func @transform_15(%arg0: i32) -> (i32, i32) {
    %c0_i32 = arith.constant 0 : i32
    %c0_i32_0 = arith.constant 0 : i32
    %c0_i32_1 = arith.constant 0 : i32
    return %c0_i32, %c0_i32_0 : i32, i32
  }
  func.func @transform_16(%arg0: i32) -> (i32, i32) {
    %c0_i32 = arith.constant 0 : i32
    %c0_i32_0 = arith.constant 0 : i32
    %c0_i32_1 = arith.constant 0 : i32
    return %c0_i32, %c0_i32_0 : i32, i32
  }
  func.func @transform_17(%arg0: i32) -> (i32, i32) {
    %c0_i32 = arith.constant 0 : i32
    %c0_i32_0 = arith.constant 0 : i32
    %c0_i32_1 = arith.constant 0 : i32
    return %c0_i32, %c0_i32_0 : i32, i32
  }
  func.func @transform_18(%arg0: i32) -> (i32, i32) {
    %c0_i32 = arith.constant 0 : i32
    %c0_i32_0 = arith.constant 0 : i32
    %c0_i32_1 = arith.constant 0 : i32
    return %c0_i32, %c0_i32_0 : i32, i32
  }
  func.func @transform_19(%arg0: i32) -> (i32, i32, i32) {
    %c0_i32 = arith.constant 0 : i32
    %c0_i32_0 = arith.constant 0 : i32
    %c0_i32_1 = arith.constant 0 : i32
    return %arg0, %c0_i32, %c0_i32_0 : i32, i32, i32
  }
}

</mosaic_0001>

<bundles_post_ra>
// kernel: tpu_custom_call.1
= control target key start
LH: loop header
LB: loop body
LE: loop exit
PB: predicated region body
PF: predicated region fallthrough
CT: control target
= control target key end

     0   :  { %s9350_s0 = inlined_call_operand.vmem [shape: f32[1,16,64], index: 0, kind: input, shape index: {}]   ;;  %s9351_s1 = inlined_call_operand.vmem [shape: f32[1,16,64], index: 1, kind: input, shape index: {}]   ;;  %s9352_s2 = inlined_call_operand.hbm [shape: f32[1,16,64], index: 2, kind: input, shape index: {}]   ;;  %s9353_s3 = inlined_call_operand.vmem [shape: f32[1,6,256], index: 3, kind: input, shape index: {}]   ;;  %s9354_s4 = inlined_call_operand.vmem [shape: f32[1,4,256], index: 4, kind: input, shape index: {}]   ;;  %s9355_s5 = inlined_call_operand.hbm [shape: f32[64,64], index: 5, kind: input, shape index: {}]   ;;  %s9356_s6 = inlined_call_operand.hbm [shape: f32[1,64], index: 6, kind: input, shape index: {}]   ;;  %s9357_s7 = inlined_call_operand.hbm [shape: f32[64,64], index: 7, kind: input, shape index: {}]   ;;  %s9358_s8 = inlined_call_operand.vmem [shape: f32[1,64], index: 8, kind: input, shape index: {}]   ;;  %s9359_s9 = inlined_call_operand.hbm [shape: f32[64,64], index: 9, kind: input, shape index: {}]   ;;  %s9360_s10 = inlined_call_operand.vmem [shape: f32[1,64], index: 10, kind: input, shape index: {}]   ;;  %s9361_s11 = inlined_call_operand.hbm [shape: f32[64,64], index: 11, kind: input, shape index: {}]   ;;  %s9362_s12 = inlined_call_operand.vmem [shape: f32[1,64], index: 12, kind: input, shape index: {}]   ;;  %s9363_s13 = inlined_call_operand.vmem [shape: f32[8,64], index: 13, kind: input, shape index: {}]   ;;  %s9364_s14 = inlined_call_operand.vmem [shape: f32[8,1], index: 14, kind: input, shape index: {}]   ;;  %s9365_s15 = inlined_call_operand.vmem [shape: f32[1,64], index: 15, kind: input, shape index: {}]   ;;  %s9366_s16 = inlined_call_operand.vmem [shape: f32[1,64], index: 16, kind: input, shape index: {}]   ;;  %s9367_s17 = inlined_call_operand.vmem [shape: f32[1,64], index: 17, kind: input, shape index: {}]   ;;  %s9368_s18 = inlined_call_operand.vmem [shape: f32[1,64], index: 18, kind: input, shape index: {}]   ;;  %s9369_s19 = inlined_call_operand.hbm [shape: f32[1,16,64], index: 19, kind: output, shape index: {}]  }
   0x1   :  { %9377 = sst [smem:[#allocation19_spill]] %s9350_s0 }
   0x2   :  { %9378 = sst [smem:[#allocation20_spill]] %s9351_s1 }
   0x3   :  { %9379 = sst [smem:[#allocation21_spill]] %s9352_s2 }
   0x4   :  { %9380 = sst [smem:[#allocation22_spill]] %s9353_s3 }
   0x5   :  { %24 = vsyncpa [#allocation3], 0 }
   0x6   :  { %25 = vsyncpa [#allocation6], 0 }
   0x7   :  { %26 = vsyncpa [#allocation9], 0 }
   0x8   :  { %27 = vsyncpa [#allocation12], 0 }
   0x9   :  { %28 = vsyncpa [#allocation4], 0  ;;  %s7185_s0 = smov [#allocation5]   ;;  %s7186_s20 = smov [#allocation8]  }
   0xa   :  { %s54_s30 = sshll.u32 %s7185_s0, 4  ;;  %s76_s21 = sshll.u32 %s7186_s20, 4  ;;  %s55_s30 = int_to_ptr.vmem [resolvable:$true] %s54_s30  ;;  %s77_s21 = int_to_ptr.vmem [resolvable:$true] %s76_s21 }
   0xb   :  { %s7043_s1 = scalar_lea.vmem %s55_s30, 1024  ;;  %p7048_p1 = scmp.lt.s32.totalorder %s55_s30, %s55_s30 }
   0xc   :  { %p7044_p0 = scmp.ne.s32.totalorder %s55_s30, %s7043_s1  ;;  %p7049_p2 = scmp.lt.s32.totalorder %s7043_s1, %s7043_s1 }
   0xe   :  { %p7050_p3 = por %p7049_p2, %p7048_p1 }
  0x10   :  { %p7051_p4 = pnand %p7050_p3, %p7044_p0 }
  0x12   :  { %7054 = shalt.err (!%p7051_p4)
}
  0x13   :  { %s7187_s22 = smov 128   ;;  %s7188_s2 = smov 8  }
  0x14   :  { %60 = dma.hbm_to_vmem [thread:$0]  %s9355_s5, 1024, %s55_s30, [#allocation6], %s7187_s22, %s7187_s22, %s7188_s2  }
  0x15   :  { %s7063_s25 = scalar_lea.vmem %s77_s21, 1024  ;;  %p7068_p6 = scmp.lt.s32.totalorder %s77_s21, %s77_s21 }
  0x16   :  { %p7064_p5 = scmp.ne.s32.totalorder %s77_s21, %s7063_s25  ;;  %p7069_p7 = scmp.lt.s32.totalorder %s7063_s25, %s7063_s25 }
  0x18   :  { %p7070_p8 = por %p7069_p7, %p7068_p6 }
  0x1a   :  { %p7071_p9 = pnand %p7070_p8, %p7064_p5 }
  0x1c   :  { %7074 = shalt.err (!%p7071_p9)
}
  0x1d   :  { %82 = dma.hbm_to_vmem [thread:$0]  %s9357_s7, 1024, %s77_s21, [#allocation9], %s7187_s22, %s7187_s22, %s7188_s2  }
  0x1e   :  { %s7189_s27 = smov [#allocation2]   ;;  %s7190_s29 = smov [#allocation7]  }
  0x1f   :  { %s38_s28 = sshll.u32 %s7189_s27, 4  ;;  %s67_s0 = sshll.u32 %s7190_s29, 4  ;;  %s39_s28 = int_to_ptr.vmem [resolvable:$true] %s38_s28  ;;  %s68_s0 = int_to_ptr.vmem [resolvable:$true] %s67_s0 }
  0x20   :  { %s7083_s5 = scalar_lea.vmem %s39_s28, 256  ;;  %p7088_p11 = scmp.lt.s32.totalorder %s39_s28, %s39_s28 }
  0x21   :  { %p7084_p10 = scmp.ne.s32.totalorder %s39_s28, %s7083_s5  ;;  %p7089_p12 = scmp.lt.s32.totalorder %s7083_s5, %s7083_s5 }
  0x23   :  { %p7090_p13 = por %p7089_p12, %p7088_p11 }
  0x25   :  { %p7091_p0 = pnand %p7090_p13, %p7084_p10 }
  0x27   :  { %7094 = shalt.err (!%p7091_p0)
}
  0x28   :  { %s9381_s1 = sld [smem:[#allocation21_spill]]  ;;  %s7103_s7 = scalar_lea.vmem %s68_s0, 16 }
  0x29   :  { %p7104_p1 = scmp.ne.s32.totalorder %s68_s0, %s7103_s7  ;;  %s7107_s21 = scalar_lea.vmem %s68_s0, 32 }
  0x2a   :  { %p7108_p2 = scmp.lt.s32.totalorder %s68_s0, %s68_s0  ;;  %p7109_p3 = scmp.lt.s32.totalorder %s7107_s21, %s7103_s7 }
  0x2c   :  { %p7110_p4 = por %p7109_p3, %p7108_p2 }
  0x2e   :  { %44 = dma.hbm_to_vmem [thread:$0]  %s9381_s1, 256, %s39_s28, [#allocation3], %s7187_s22, %s7187_s22, %s7188_s2  }
  0x2f   :  { %p7111_p5 = pnand %p7110_p4, %p7104_p1 }
  0x31   :  { %7114 = shalt.err (!%p7111_p5)
}
  0x32   :  { %70 = dma.hbm_to_vmem [thread:$0]  %s9356_s6, 16, %s68_s0, [#allocation6]  }
  0x33   :  { %s7191_s25 = smov [#allocation10]   ;;  %s7192_s26 = smov [#allocation11]  }
  0x34   :  { %s90_s3 = sshll.u32 %s7191_s25, 4  ;;  %s104_s27 = sshll.u32 %s7192_s26, 4  ;;  %s91_s3 = int_to_ptr.vmem [resolvable:$true] %s90_s3  ;;  %s105_s27 = int_to_ptr.vmem [resolvable:$true] %s104_s27 }
  0x35   :  { %s7123_s29 = scalar_lea.vmem %s91_s3, 1024  ;;  %p7128_p7 = scmp.lt.s32.totalorder %s91_s3, %s91_s3 }
  0x36   :  { %p7124_p6 = scmp.ne.s32.totalorder %s91_s3, %s7123_s29  ;;  %p7129_p8 = scmp.lt.s32.totalorder %s7123_s29, %s7123_s29 }
  0x38   :  { %p7130_p9 = por %p7129_p8, %p7128_p7 }
  0x3a   :  { %p7131_p10 = pnand %p7130_p9, %p7124_p6 }
  0x3c   :  { %7134 = shalt.err (!%p7131_p10)
}
  0x3d   :  { %96 = dma.hbm_to_vmem [thread:$0]  %s9359_s9, 1024, %s91_s3, [#allocation9], %s7187_s22, %s7187_s22, %s7188_s2  }
  0x3e   :  { %s7143_s6 = scalar_lea.vmem %s105_s27, 1024  ;;  %p7148_p12 = scmp.lt.s32.totalorder %s105_s27, %s105_s27 }
  0x3f   :  { %p7144_p11 = scmp.ne.s32.totalorder %s105_s27, %s7143_s6  ;;  %p7149_p13 = scmp.lt.s32.totalorder %s7143_s6, %s7143_s6 }
  0x41   :  { %p7150_p0 = por %p7149_p13, %p7148_p12 }
  0x43   :  { %p7151_p1 = pnand %p7150_p0, %p7144_p11 }
  0x45   :  { %7154 = shalt.err (!%p7151_p1)
}
  0x46   :  { %110 = dma.hbm_to_vmem [thread:$0]  %s9361_s11, 1024, %s105_s27, [#allocation12], %s7187_s22, %s7187_s22, %s7188_s2  }
  0x47   :  { %7175 = dma.done.wait [#allocation3], 256  }
  0x48   :  { %7176 = vsyncadd [#allocation3], 4294967040 }
  0x49   :  { %7177 = dma.done.wait [#allocation6], 1040  }
  0x4a   :  { %7178 = vsyncadd [#allocation6], 4294966256 }
  0x4b   :  { %7179 = dma.done.wait [#allocation9], 2048  }
  0x4c   :  { %7180 = vsyncadd [#allocation9], 4294965248 }
  0x4d   :  { %7181 = dma.done.wait [#allocation12], 1024  }
  0x4e   :  { %7182 = vsyncadd [#allocation12], 4294966272  ;;  %v154_v0 = vlaneseq  ;;  %v7193_v1 = vmov 0.0   ;;  %vm9373_vm0 = vmmov 0   ;;  %vm9375_vm1 = vcmask 523264   ;;  %v2408_v3 = vld [vmem:[#allocation8 + $0x30] sm:$0xff] }
  0x4f   :  { %6718 = vmatprep.subr.bf16.mxu0 %v7193_v1  ;;  %6726 = vmatprep.mubr.msk.bf16.mxu0 %vm9373_vm0, %v7193_v1  ;;  %v2409_v4 = vld [vmem:[#allocation8 + $0x38] sm:$0xff]  ;;  %v2406_v7 = vld [vmem:[#allocation8 + $0x20] sm:$0xff]  ;;  %v2407_v8 = vld [vmem:[#allocation8 + $0x28] sm:$0xff]  ;;  %s9382_s20 = sld [smem:[#allocation22_spill]]  ;;  %vm228_vm2 = vcmask 1040384   ;;  %vm231_vm3 = vcmask 1041408  }
  0x50   :  { %v7355_v2 = vshrl.u32 %v154_v0, 7  ;;  %v2413_v6 = vpack.c.bf16 %v2409_v4, %v2408_v3  ;;  %v152_v13 = vld [vmem:[%s9354_s4] sm:$0xff]  ;;  %v2412_v14 = vpack.c.bf16 %v2407_v8, %v2406_v7  ;;  %v2405_v33 = vld [vmem:[#allocation8 + $0x18] sm:$0xff]  ;;  %v2402_v48 = vld [vmem:[#allocation8] sm:$0xff]  ;;  %s9383_s25 = sld [smem:[#allocation20_spill]]  ;;  %vm234_vm4 = vcmask 1042432  }
  0x51   :  { %v2404_v32 = vld [vmem:[#allocation8 + $0x10] sm:$0xff]  ;;  %v2403_v49 = vld [vmem:[#allocation8 + $0x8] sm:$0xff]  ;;  %vm9376_vm5 = vcmask 1043456   ;;  %s7202_s28 = smov 112   ;;  %s7203_s5 = smov 120  }
  0x52   :  { %v160_v5 = vsub.s32 4, %v7355_v2  ;;  %v188_v9 = vsub.s32 5, %v7355_v2  ;;  %v156_v10 = vsub.s32 0, %v7355_v2  ;;  %v2434_v11 = vsel %vm9375_vm1, %v2413_v6, 0  ;;  %s7205_s6 = smov 96   ;;  %s7206_s0 = smov 88  }
  0x53   :  { %6719 = vmatpush3.bf16.xpose.msra.mxu0 %v2434_v11  ;;  %v184_v19 = vsub.s32 1, %v7355_v2  ;;  %v206_v20 = vsub.s32 2, %v7355_v2  ;;  %v218_v23 = vsub.s32 3, %v7355_v2  ;;  %v2431_v26 = vsel %vm9375_vm1, %v2412_v14, 0  ;;  %s7209_s21 = smov 80   ;;  %s7210_s23 = smov 72  }
  0x54   :  { %v161_v15 = vrot.slane %v152_v13, %v160_v5  ;;  %6720 = vmatprep.subr.bf16.mxu0 %v7193_v1  ;;  %v189_v18 = vrot.slane %v152_v13, %v188_v9  ;;  %v157_v22 = vrot.slane %v152_v13, %v156_v10  ;;  %v2411_v40 = vpack.c.bf16 %v2405_v33, %v2404_v32  ;;  %s7213_s3 = smov 64   ;;  %s7214_s26 = smov 32  }
  0x55   :  { %v7364_v12 = vld [vmem:[%s9382_s20 + $0x8] sm:$0x3f]  ;;  %v7372_v16 = vld [vmem:[%s9382_s20] sm:$0x3f]  ;;  %v185_v30 = vrot.slane %v152_v13, %v184_v19  ;;  %v7384_v31 = vrot.slane %v152_v13, %v206_v20  ;;  %v7386_v35 = vrot.slane %v152_v13, %v218_v23  ;;  %v210_v50 = vsub.s32 6, %v7355_v2  ;;  %s9407_s20 = sld [smem:[#allocation19_spill]] }
  0x56   :  { %v169_v17 = vrot.slane %v7364_v12, 4  ;;  %v165_v21 = vsub.f32 %v7364_v12, %v161_v15  ;;  %v193_v24 = vsub.f32 %v7364_v12, %v189_v18  ;;  %v168_v25 = vrot.slane %v7372_v16, 4  ;;  %v146_v58 = vld [vmem:[%s9383_s25] sm:$0xff]  ;;  %v147_v59 = vld [vmem:[%s9383_s25 + $0x8] sm:$0xff]  ;;  %s7212_s25 = smov 16  }
  0x57   :  { %v164_v29 = vsub.f32 %v7372_v16, %v157_v22  ;;  %v192_v38 = vsub.f32 %v7372_v16, %v185_v30  ;;  %v2428_v46 = vsel %vm9375_vm1, %v2411_v40, 0  ;;  %v2410_v51 = vpack.c.bf16 %v2403_v49, %v2402_v48 }
  0x58   :  { %v173_v27 = vmul.f32 %v169_v17, %v165_v21  ;;  %v195_v28 = vmul.f32 %v193_v24, %v169_v17  ;;  %v222_v52 = vsub.s32 7, %v7355_v2  ;;  %v211_v53 = vrot.slane %v152_v13, %v210_v50 }
  0x59   :  { %v172_v37 = vmul.f32 %v168_v25, %v164_v29  ;;  %v194_v43 = vmul.f32 %v192_v38, %v168_v25  ;;  %v2425_v54 = vsel %vm9375_vm1, %v2410_v51, 0  ;;  %v2401_v3 = vpack.c.bf16 %v147_v59, %v146_v58 }
  0x5a   :  { %v175_v34 = vand.u32 2147483647, %v173_v27  ;;  %v197_v36 = vand.u32 2147483647, %v195_v28  ;;  %v223_v55 = vrot.slane %v152_v13, %v222_v52  ;;  %v215_v61 = vsub.f32 %v7364_v12, %v211_v53 }
  0x5b   :  { %6721 = vmatpush3.bf16.xpose.msra.mxu0 %v2431_v26  ;;  %v174_v42 = vand.u32 2147483647, %v172_v37  ;;  %v196_v45 = vand.u32 2147483647, %v194_v43  ;;  %v214_v8 = vsub.f32 %v7372_v16, %v7384_v31  ;;  %v226_v11 = vsub.f32 %v7372_v16, %v7386_v35 }
  0x5c   :  { %v177_v39 = vmax.f32 %v175_v34, 0.001  ;;  %6722 = vmatprep.subr.bf16.mxu0 %v7193_v1  ;;  %v199_v41 = vmax.f32 %v197_v36, 0.001  ;;  %v227_v63 = vsub.f32 %v7364_v12, %v223_v55  ;;  %v7195_v53 = vmov 683565275  }
  0x5d   :  { %v176_v44 = vmax.f32 %v174_v42, 0.001  ;;  %v198_v47 = vmax.f32 %v196_v45, 0.001  ;;  %v7196_v55 = vmov 2475754826  }
  0x5e   :  { %6917 = vlog2.f32 %v177_v39  ;;  %v7198_v59 = vmov 2102212464  }
  0x5f   :  { %6919 = vlog2.f32 %v199_v41 }
  0x60   :  { %6921 = vlog2.f32 %v176_v44 }
  0x61   :  { %6923 = vlog2.f32 %v198_v47 }
  0x63   :  { %6723 = vmatpush3.bf16.xpose.msra.mxu0 %v2428_v46 }
  0x64   :  { %6724 = vmatprep.subr.bf16.mxu0 %v7193_v1 }
  0x6b   :  { %v6918_v56 = vpop.eup %6917  ;;  %6725 = vmatpush3.bf16.xpose.msra.mxu0 %v2425_v54 }
  0x6c   :  { %v6920_v57 = vpop.eup %6919  ;;  %v181_v60 = vmul.f32 0.6931472, %v6918_v56  ;;  %6742 = vmatprep.subr.bf16.mxu0 %v7193_v1 }
  0x6d   :  { %v203_v62 = vmul.f32 0.6931472, %v6920_v57  ;;  %v6922_v0 = vpop.eup %6921  ;;  %v7197_v57 = vmov 2131351028  }
  0x6e   :  { %v179_v5 = vmul.f32 0.6931472, %v6922_v0  ;;  %v6924_v6 = vpop.eup %6923 }
  0x6f   :  { %v230_v4 = vsel %vm228_vm2, %v181_v60, %v203_v62  ;;  %v201_v10 = vmul.f32 0.6931472, %v6924_v6 }
  0x70   :  { %v233_v7 = vsel %vm231_vm3, %v230_v4, %v215_v61  ;;  %v7199_v61 = vmov 920167782  }
  0x71   :  { %v7409_v9 = vsel %vm234_vm4, %v233_v7, %v227_v63  ;;  %v229_v17 = vsel %vm228_vm2, %v179_v5, %v201_v10  ;;  %v7200_v7 = vmov 1326507024  }
  0x72   :  { %v246_v12 = vmul.f32 3.1622777, %v7409_v9  ;;  %v248_v13 = vmul.f32 1.3335215, %v7409_v9  ;;  %6727 = vmatmul.mubr.msk.bf16.vlgmr.msra.gmra.mxu0 %vm9375_vm1, %v2401_v3  ;;  %v250_v14 = vmul.f32 0.56234133, %v7409_v9  ;;  %v232_v19 = vsel %vm231_vm3, %v229_v17, %v214_v8 }
  0x73   :  { %v252_v15 = vmul.f32 0.23713738, %v7409_v9  ;;  %6744 = vmatprep.mubr.msk.bf16.mxu0 %vm9373_vm0, %v7193_v1  ;;  %v7423_v20 = vsel %vm234_vm4, %v232_v19, %v226_v11 }
  0x74   :  { %v268_v18 = vrot.slane %v248_v13, 4  ;;  %v247_v22 = vmul.f32 1.3335215, %v7423_v20  ;;  %v245_v28 = vmul.f32 3.1622777, %v7423_v20 }
  0x75   :  { %v274_v16 = vrot.slane %v252_v15, 4 }
  0x76   :  { %v7426_v21 = vsel %vm9376_vm5, %v246_v12, %v268_v18  ;;  %v267_v33 = vrot.slane %v247_v22, 4 }
  0x77   :  { %v7430_v23 = vsel %vm9376_vm5, %v250_v14, %v274_v16  ;;  %v806_v24 = vand.u32 2147483647, %v7426_v21  ;;  %v809_v25 = vand.u32 2139095040, %v7426_v21 }
  0x78   :  { %v1014_v26 = vand.u32 2147483647, %v7430_v23  ;;  %v1017_v27 = vand.u32 2139095040, %v7430_v23  ;;  %v7442_v36 = vsel %vm9376_vm5, %v245_v28, %v267_v33 }
  0x79   :  { %v810_v29 = vshrl.u32 %v809_v25, 23  ;;  %v813_v30 = vand.u32 8388607, %v806_v24  ;;  %v705_v41 = vand.u32 2139095040, %v7442_v36  ;;  %v702_v51 = vand.u32 2147483647, %v7442_v36 }
  0x7a   :  { %v1018_v31 = vshrl.u32 %v1017_v27, 23  ;;  %v1021_v32 = vand.u32 8388607, %v1014_v26 }
  0x7b   :  { %v6517_v34 = vadd.s32 4294967169, %v810_v29  ;;  %v814_v37 = vor.u32 8388608, %v813_v30  ;;  %v706_v43 = vshrl.u32 %v705_v41, 23 }
  0x7c   :  { %v6525_v35 = vadd.s32 4294967169, %v1018_v31  ;;  %v1022_v39 = vor.u32 8388608, %v1021_v32 }
  0x7d   :  { %v816_v38 = vadd.s32 1, %v6517_v34  ;;  %v7445_v46 = vshll.u32 %v814_v37, 8  ;;  %v7457_v63 = vadd.s32 4294967169, %v706_v43 }
  0x7e   :  { %v1024_v40 = vadd.s32 1, %v6525_v35  ;;  %v7449_v50 = vshll.u32 %v1022_v39, 8 }
  0x7f   :  { %vm817_vm6 = vcmp.gt.s32.totalorder %v816_v38, 0 }
  0x80   :  { %v818_v42 = vsel %vm817_vm6, %v816_v38, 0  ;;  %vm1025_vm7 = vcmp.gt.s32.totalorder %v1024_v40, 0  ;;  %vm808_vm6 = vcmp.lt.s32.totalorder %v7426_v21, 0 }
  0x81   :  { %v819_v44 = vshrl.u32 %v818_v42, 5  ;;  %v820_v45 = vand.u32 31, %v818_v42  ;;  %v1026_v47 = vsel %vm1025_vm7, %v1024_v40, 0 }
  0x82   :  { %v7447_v48 = vshrl.u32 %v1026_v47, 5  ;;  %v1028_v49 = vand.u32 31, %v1026_v47 }
  0x83   :  { %v821_v52 = vsub.s32 32, %v820_v45  ;;  %v823_v54 = vshll.u32 %v7195_v53, %v820_v45  ;;  %v826_v56 = vshll.u32 %v7196_v55, %v820_v45  ;;  %v829_v58 = vshll.u32 %v7197_v57, %v820_v45 }
  0x84   :  { %v832_v60 = vshll.u32 %v7198_v59, %v820_v45  ;;  %v835_v62 = vshll.u32 %v7199_v61, %v820_v45  ;;  %vm838_vm8 = vcmp.lt.s32.totalorder %v819_v44, 1  ;;  %vm839_vm9 = vcmp.lt.s32.totalorder %v819_v44, 2 }
  0x85   :  { %v822_v0 = vshrl.u32 %v7195_v53, %v821_v52  ;;  %v824_v3 = vshrl.u32 %v7196_v55, %v821_v52  ;;  %v827_v4 = vshrl.u32 %v7197_v57, %v821_v52  ;;  %v830_v5 = vshrl.u32 %v7198_v59, %v821_v52 }
  0x86   :  { %v833_v6 = vshrl.u32 %v7199_v61, %v821_v52  ;;  %v836_v8 = vshrl.u32 %v7200_v7, %v821_v52  ;;  %vm841_vm10 = vcmp.lt.s32.totalorder %v819_v44, 4  ;;  %v1029_v13 = vsub.s32 32, %v1028_v49 }
  0x87   :  { %v825_v10 = vor.u32 %v824_v3, %v823_v54  ;;  %v828_v11 = vor.u32 %v827_v4, %v826_v56  ;;  %v831_v12 = vor.u32 %v830_v5, %v829_v58  ;;  %vm840_vm11 = vcmp.lt.s32.totalorder %v819_v44, 3 }
  0x88   :  { %v834_v14 = vor.u32 %v833_v6, %v832_v60  ;;  %v837_v15 = vor.u32 %v836_v8, %v835_v62  ;;  %v1031_v17 = vshll.u32 %v7195_v53, %v1028_v49  ;;  %v1034_v29 = vshll.u32 %v7196_v55, %v1028_v49 }
  0x89   :  { %v842_v18 = vsel %vm838_vm8, %v822_v0, %v825_v10  ;;  %v843_v19 = vsel %vm841_vm10, %v831_v12, 2102212464  ;;  %v846_v16 = vsel %vm838_vm8, %v825_v10, %v828_v11  ;;  %v850_v22 = vsel %vm838_vm8, %v828_v11, %v831_v12 }
  0x8a   :  { %v844_v25 = vsel %vm840_vm11, %v828_v11, %v843_v19  ;;  %v847_v27 = vsel %vm841_vm10, %v834_v14, 920167782  ;;  %v851_v28 = vsel %vm841_vm10, %v837_v15, 1326507024  ;;  %v1030_v32 = vshrl.u32 %v7195_v53, %v1029_v13 }
  0x8b   :  { %v848_v30 = vsel %vm840_vm11, %v831_v12, %v847_v27  ;;  %v852_v31 = vsel %vm840_vm11, %v834_v14, %v851_v28  ;;  %v1032_v33 = vshrl.u32 %v7196_v55, %v1029_v13  ;;  %v845_v34 = vsel %vm839_vm9, %v842_v18, %v844_v25 }
  0x8c   :  { %v849_v35 = vsel %vm839_vm9, %v846_v16, %v848_v30  ;;  %v853_v37 = vsel %vm839_vm9, %v850_v22, %v852_v31  ;;  %v1035_v38 = vshrl.u32 %v7197_v57, %v1029_v13  ;;  %v1037_v47 = vshll.u32 %v7197_v57, %v1028_v49 }
  0x8d   :  { %v7477_v39 = vmul.u32.u64.low %v7445_v46, %v853_v37  ;;  %v7478_v40 = vmul.u32.u64.high %v7445_v46, %v853_v37, %v7477_v39  ;;  %v7481_v41 = vmul.u32.u64.low %v7445_v46, %v849_v35  ;;  %v7482_v42 = vmul.u32.u64.high %v7445_v46, %v849_v35, %v7481_v41 }
  0x8e   :  { %v1033_v43 = vor.u32 %v1032_v33, %v1031_v17  ;;  %v1036_v45 = vor.u32 %v1035_v38, %v1034_v29  ;;  %v1038_v52 = vshrl.u32 %v7198_v59, %v1029_v13  ;;  %v1040_v44 = vshll.u32 %v7198_v59, %v1028_v49 }
  0x8f   :  { %v1041_v54 = vshrl.u32 %v7199_v61, %v1029_v13  ;;  %v1043_v56 = vshll.u32 %v7199_v61, %v1028_v49  ;;  %v1044_v58 = vshrl.u32 %v7200_v7, %v1029_v13  ;;  %v861_v60 = vmul.u32 %v7445_v46, %v845_v34 }
  0x90   :  { %v1039_v62 = vor.u32 %v1038_v52, %v1037_v47  ;;  %vm1046_vm12 = vcmp.lt.s32.totalorder %v7447_v48, 1  ;;  %vm1047_vm13 = vcmp.lt.s32.totalorder %v7447_v48, 2  ;;  %vm863_vm14 = vc.u32 %v7478_v40, %v7481_v41 }
  0x91   :  { %v864_v0 = vadd.s32 1, %v7482_v42  ;;  %v1042_v3 = vor.u32 %v1041_v54, %v1040_v44  ;;  %vm1048_vm15 = vcmp.lt.s32.totalorder %v7447_v48, 3  ;;  %v1045_v4 = vor.u32 %v1044_v58, %v1043_v56 }
  0x92   :  { %vm1049_vm2 = vcmp.lt.s32.totalorder %v7447_v48, 4  ;;  %v1050_v49 = vsel %vm1046_vm12, %v1030_v32, %v1033_v43  ;;  %v1054_v5 = vsel %vm1046_vm12, %v1033_v43, %v1036_v45  ;;  %v1058_v10 = vsel %vm1046_vm12, %v1036_v45, %v1039_v62 }
  0x93   :  { %v865_v46 = vsel %vm863_vm14, %v864_v0, %v7482_v42  ;;  %v1051_v6 = vsel %vm1049_vm2, %v1039_v62, 2102212464  ;;  %v1055_v8 = vsel %vm1049_vm2, %v1042_v3, 920167782  ;;  %v1059_v14 = vsel %vm1049_vm2, %v1045_v4, 1326507024 }
  0x94   :  { %v866_v11 = vadd.s32 %v865_v46, %v861_v60  ;;  %v1052_v12 = vsel %vm1048_vm15, %v1036_v45, %v1051_v6  ;;  %v1056_v13 = vsel %vm1048_vm15, %v1039_v62, %v1055_v8  ;;  %v1060_v18 = vsel %vm1048_vm15, %v1042_v3, %v1059_v14 }
  0x95   :  { %v1053_v15 = vsel %vm1047_vm13, %v1050_v49, %v1052_v12  ;;  %v1057_v17 = vsel %vm1047_vm13, %v1054_v5, %v1056_v13  ;;  %v712_v19 = vadd.s32 1, %v7457_v63  ;;  %v1061_v22 = vsel %vm1047_vm13, %v1058_v10, %v1060_v18 }
  0x96   :  { %v867_v16 = vadd.s32 536870912, %v866_v11  ;;  %v7508_v25 = vmul.u32.u64.low %v7449_v50, %v1057_v17  ;;  %v7509_v27 = vmul.u32.u64.high %v7449_v50, %v1057_v17, %v7508_v25  ;;  %v251_v31 = vmul.f32 0.23713738, %v7423_v20 }
  0x97   :  { %v7512_v28 = vmul.u32.u64.low %v7449_v50, %v1061_v22  ;;  %v7513_v29 = vmul.u32.u64.high %v7449_v50, %v1061_v22, %v7512_v28  ;;  %vm713_vm3 = vcmp.gt.s32.totalorder %v712_v19, 0  ;;  %v1069_v33 = vmul.u32 %v7449_v50, %v1053_v15 }
  0x98   :  { %v868_v30 = vshrl.u32 %v867_v16, 30  ;;  %v714_v32 = vsel %vm713_vm3, %v712_v19, 0  ;;  %v709_v63 = vand.u32 8388607, %v702_v51  ;;  %v1072_v34 = vadd.s32 1, %v7509_v27 }
  0x99   :  { %v716_v35 = vand.u32 31, %v714_v32  ;;  %vm1071_vm4 = vc.u32 %v7513_v29, %v7508_v25  ;;  %v7522_v37 = vmul.f32 42.16965, %v7409_v9  ;;  %v249_v42 = vmul.f32 0.56234133, %v7423_v20 }
  0x9a   :  { %v869_v48 = vshll.u32 %v868_v30, 30  ;;  %v1073_v39 = vsel %vm1071_vm4, %v1072_v34, %v7509_v27  ;;  %v273_v43 = vrot.slane %v251_v31, 4  ;;  %v710_v50 = vor.u32 8388608, %v709_v63 }
  0x9b   :  { %v1074_v45 = vadd.s32 %v1073_v39, %v1069_v33  ;;  %v717_v52 = vsub.s32 32, %v716_v35  ;;  %v7527_v54 = vmul.f32 100.0, %v7409_v9  ;;  %v7530_v56 = vmul.f32 17.782795, %v7409_v9 }
  0x9c   :  { %v870_v38 = vsub.s32 %v866_v11, %v869_v48  ;;  %v7533_v60 = vsel %vm9376_vm5, %v249_v42, %v273_v43  ;;  %v7536_v62 = vmul.f32 7.498942, %v7409_v9  ;;  %v256_v0 = vrot.slane %v7522_v37, 4 }
  0x9d   :  { %v1075_v44 = vadd.s32 536870912, %v1074_v45  ;;  %v862_v3 = vadd.s32 %v7481_v41, %v7478_v40  ;;  %v7544_v49 = vshll.u32 %v710_v50, 8  ;;  %v892_v46 = vsub.s32 4, %v868_v30 }
  0x9e   :  { %v872_v47 = vsub.s32 0, %v870_v38  ;;  %v719_v6 = vshll.u32 %v7195_v53, %v716_v35  ;;  %v720_v8 = vshrl.u32 %v7196_v55, %v717_v52  ;;  %v7549_v9 = vadd.s32 %v7508_v25, %v7513_v29 }
  0x9f   :  { %v7542_v4 = vshrl.u32 %v1075_v44, 30  ;;  %v715_v11 = vshrl.u32 %v714_v32, 5  ;;  %v913_v12 = vand.u32 2139095040, %v7533_v60  ;;  %v722_v40 = vshll.u32 %v7196_v55, %v716_v35 }
  0xa0   :  { %v6518_v58 = vmin.u32 %v872_v47, %v870_v38  ;;  %v723_v41 = vshrl.u32 %v7197_v57, %v717_v52  ;;  %v725_v14 = vshll.u32 %v7197_v57, %v716_v35  ;;  %v726_v17 = vshrl.u32 %v7198_v59, %v717_v52 }
  0xa1   :  { %v1077_v10 = vshll.u32 %v7542_v4, 30  ;;  %v728_v18 = vshll.u32 %v7198_v59, %v716_v35  ;;  %v729_v19 = vshrl.u32 %v7199_v61, %v717_v52  ;;  %v893_v16 = vsel %vm808_vm6, %v892_v46, %v868_v30 }
  0xa2   :  { %v874_v5 = vclz %v6518_v58  ;;  %v718_v22 = vshrl.u32 %v7195_v53, %v717_v52  ;;  %v721_v25 = vor.u32 %v720_v8, %v719_v6  ;;  %v731_v29 = vshll.u32 %v7199_v61, %v716_v35 }
  0xa3   :  { %v7556_v15 = vsub.s32 %v1074_v45, %v1077_v10  ;;  %v732_v31 = vshrl.u32 %v7200_v7, %v717_v52  ;;  %v724_v48 = vor.u32 %v723_v41, %v722_v40  ;;  %v727_v39 = vor.u32 %v726_v17, %v725_v14 }
  0xa4   :  { %v6519_v13 = vadd.s32 4294967294, %v874_v5  ;;  %v730_v42 = vor.u32 %v729_v19, %v728_v18  ;;  %vm734_vm8 = vcmp.lt.s32.totalorder %v715_v11, 1  ;;  %vm735_vm9 = vcmp.lt.s32.totalorder %v715_v11, 2 }
  0xa5   :  { %v1080_v28 = vsub.s32 0, %v7556_v15  ;;  %vm737_vm10 = vcmp.lt.s32.totalorder %v715_v11, 4  ;;  %vm7570_vm11 = vcmp.le.f32.partialorder %v806_v24, 0.7853982  ;;  %v733_v50 = vor.u32 %v732_v31, %v731_v29 }
  0xa6   :  { %vm6520_vm7 = vcmp.lt.s32.totalorder %v6519_v13, 0  ;;  %vm736_vm12 = vcmp.lt.s32.totalorder %v715_v11, 3  ;;  %vm1016_vm13 = vcmp.lt.s32.totalorder %v7430_v23, 0  ;;  %v739_v44 = vsel %vm737_vm10, %v727_v39, 2102212464 }
  0xa7   :  { %v877_v27 = vsel %vm6520_vm7, 0, %v6519_v13  ;;  %v6526_v34 = vmin.u32 %v1080_v28, %v7556_v15  ;;  %v742_v58 = vsel %vm734_vm8, %v721_v25, %v724_v48  ;;  %v1100_v5 = vsub.s32 4, %v7542_v4 }
  0xa8   :  { %v878_v32 = vsub.s32 32, %v877_v27  ;;  %v879_v33 = vshll.u32 %v870_v38, %v877_v27  ;;  %v882_v63 = vsub.s32 4294967266, %v877_v27  ;;  %v738_v38 = vsel %vm734_vm8, %v718_v22, %v721_v25 }
  0xa9   :  { %v1082_v35 = vclz %v6526_v34  ;;  %v740_v24 = vsel %vm736_vm12, %v724_v48, %v739_v44  ;;  %v743_v46 = vsel %vm737_vm10, %v730_v42, 920167782  ;;  %v746_v13 = vsel %vm734_vm8, %v724_v48, %v727_v39 }
  0xaa   :  { %v880_v30 = vshrl.u32 %v862_v3, %v878_v32  ;;  %v883_v43 = vadd.s32 127, %v882_v63  ;;  %v744_v10 = vsel %vm736_vm12, %v727_v39, %v743_v46  ;;  %v741_v40 = vsel %vm735_vm9, %v738_v38, %v740_v24 }
  0xab   :  { %v6527_v3 = vadd.s32 4294967294, %v1082_v35  ;;  %v745_v41 = vsel %vm735_vm9, %v742_v58, %v744_v10  ;;  %v747_v14 = vsel %vm737_vm10, %v733_v50, 1326507024  ;;  %v914_v22 = vshrl.u32 %v913_v12, 23 }
  0xac   :  { %v881_v47 = vor.u32 %v880_v30, %v879_v33  ;;  %v884_v52 = vshll.u32 %v883_v43, 23  ;;  %v748_v19 = vsel %vm736_vm12, %v730_v42, %v747_v14  ;;  %v910_v11 = vand.u32 2147483647, %v7533_v60 }
  0xad   :  { %vm6528_vm14 = vcmp.lt.s32.totalorder %v6527_v3, 0  ;;  %v749_v29 = vsel %vm735_vm9, %v746_v13, %v748_v19  ;;  %v6521_v63 = vadd.s32 4294967169, %v914_v22  ;;  %vm7616_vm3 = vcmp.le.f32.partialorder %v1014_v26, 0.7853982 }
  0xae   :  { %v885_v6 = vor.u32 4788187, %v884_v52  ;;  %v888_v8 = vcvt.s32.f32 %v881_v47  ;;  %v1085_v18 = vsel %vm6528_vm14, 0, %v6527_v3  ;;  %v757_v47 = vmul.u32 %v7544_v49, %v741_v40 }
  0xaf   :  { %v1086_v25 = vsub.s32 32, %v1085_v18  ;;  %v1087_v27 = vshll.u32 %v7556_v15, %v1085_v18  ;;  %v1090_v28 = vsub.s32 4294967266, %v1085_v18  ;;  %v895_v15 = vsel %vm7570_vm11, 0, %v893_v16 }
  0xb0   :  { %v886_v17 = vand.u32 2147483647, %v885_v6  ;;  %v7590_v32 = vmul.u32.u64.low %v7544_v49, %v749_v29  ;;  %v7591_v33 = vmul.u32.u64.high %v7544_v49, %v749_v29, %v7590_v32  ;;  %v920_v42 = vadd.s32 1, %v6521_v63 }
  0xb1   :  { %v1088_v48 = vshrl.u32 %v7549_v9, %v1086_v25  ;;  %v1091_v34 = vadd.s32 127, %v1090_v28  ;;  %v7595_v39 = vmul.u32.u64.low %v7544_v49, %v745_v41  ;;  %v7596_v30 = vmul.u32.u64.high %v7544_v49, %v745_v41, %v7595_v39 }
  0xb2   :  { %v889_v31 = vmul.f32 %v888_v8, %v886_v17  ;;  %v899_v43 = vadd.s32 3, %v895_v15  ;;  %v1101_v9 = vsel %vm1016_vm13, %v1100_v5, %v7542_v4  ;;  %vm921_vm2 = vcmp.gt.s32.totalorder %v920_v42, 0 }
  0xb3   :  { %v1089_v35 = vor.u32 %v1088_v48, %v1087_v27  ;;  %v1092_v50 = vshll.u32 %v1091_v34, 23  ;;  %vm759_vm15 = vc.u32 %v7591_v33, %v7595_v39  ;;  %v760_v58 = vadd.s32 1, %v7596_v30 }
  0xb4   :  { %v890_v12 = vxor.u32 2147483648, %v889_v31  ;;  %v922_v49 = vsel %vm921_vm2, %v920_v42, 0  ;;  %v262_v3 = vrot.slane %v7536_v62, 4  ;;  %v7626_v45 = vsel %vm9376_vm5, %v7527_v54, %v256_v0 }
  0xb5   :  { %v1093_v52 = vor.u32 4788187, %v1092_v50  ;;  %v1096_v44 = vcvt.s32.f32 %v1089_v35  ;;  %v761_v24 = vsel %vm759_vm15, %v760_v58, %v7596_v30  ;;  %v1103_v46 = vsel %vm7616_vm3, 0, %v1101_v9 }
  0xb6   :  { %v891_v38 = vsel %vm808_vm6, %v890_v12, %v889_v31  ;;  %v762_v26 = vadd.s32 %v761_v24, %v757_v47  ;;  %v7632_v6 = vand.u32 8388607, %v910_v11  ;;  %v924_v8 = vand.u32 31, %v922_v49 }
  0xb7   :  { %v894_v16 = vsel %vm7570_vm11, %v7426_v21, %v891_v38  ;;  %v1094_v5 = vand.u32 2147483647, %v1093_v52  ;;  %v7634_v10 = vand.u32 3, %v899_v43  ;;  %v1107_v40 = vadd.s32 3, %v1103_v46 }
  0xb8   :  { %6925 = vcosq.f32 %v894_v16  ;;  %v7636_v41 = vand.u32 3, %v895_v15  ;;  %v763_v37 = vadd.s32 536870912, %v762_v26  ;;  %v7638_v14 = vshrl.u32 %v922_v49, 5 }
  0xb9   :  { %6927 = vsinq.f32 %v894_v16  ;;  %v1097_v13 = vmul.f32 %v1096_v44, %v1094_v5  ;;  %v925_v54 = vsub.s32 32, %v924_v8  ;;  %v927_v0 = vshll.u32 %v7195_v53, %v924_v8 }
  0xba   :  { %v930_v18 = vshll.u32 %v7196_v55, %v924_v8  ;;  %v933_v19 = vshll.u32 %v7197_v57, %v924_v8  ;;  %v936_v22 = vshll.u32 %v7198_v59, %v924_v8  ;;  %v7644_v25 = vshrl.u32 %v763_v37, 30 }
  0xbb   :  { %v1098_v17 = vxor.u32 2147483648, %v1097_v13  ;;  %v928_v27 = vshrl.u32 %v7196_v55, %v925_v54  ;;  %v931_v28 = vshrl.u32 %v7197_v57, %v925_v54  ;;  %v939_v29 = vshll.u32 %v7199_v61, %v924_v8 }
  0xbc   :  { %vm901_vm4 = vcmp.lt.s32.totalorder %v7634_v10, 2  ;;  %vm1731_vm6 = vcmp.eq.s32.totalorder %v7636_v41, 2  ;;  %v934_v32 = vshrl.u32 %v7198_v59, %v925_v54  ;;  %v937_v63 = vshrl.u32 %v7199_v61, %v925_v54 }
  0xbd   :  { %v1099_v31 = vsel %vm1016_vm13, %v1098_v17, %v1097_v13  ;;  %v940_v48 = vshrl.u32 %v7200_v7, %v925_v54  ;;  %vm1728_vm7 = vcmp.eq.s32.totalorder %v7636_v41, 0  ;;  %v7660_v30 = vand.u32 3, %v1103_v46 }
  0xbe   :  { %v1102_v34 = vsel %vm7616_vm3, %v7430_v23, %v1099_v31  ;;  %v765_v12 = vshll.u32 %v7644_v25, 30  ;;  %vm942_vm8 = vcmp.lt.s32.totalorder %v7638_v14, 1  ;;  %v929_v15 = vor.u32 %v928_v27, %v927_v0 }
  0xbf   :  { %6929 = vcosq.f32 %v1102_v34  ;;  %v932_v42 = vor.u32 %v931_v28, %v930_v18  ;;  %v938_v43 = vor.u32 %v937_v63, %v936_v22  ;;  %vm898_vm9 = vweird.f32 %v7426_v21 }
  0xc0   :  { %6931 = vsinq.f32 %v1102_v34  ;;  %v7665_v35 = vsub.s32 %v762_v26, %v765_v12  ;;  %v935_v50 = vor.u32 %v934_v32, %v933_v19  ;;  %v941_v9 = vor.u32 %v940_v48, %v939_v29 }
  0xc1   :  { %v7667_v38 = vand.u32 3, %v1107_v40  ;;  %vm1727_vm10 = vcmp.lt.s32.totalorder %v7636_v41, 2  ;;  %v918_v47 = vor.u32 8388608, %v7632_v6  ;;  %vm944_vm11 = vcmp.lt.s32.totalorder %v7638_v14, 3 }
  0xc2   :  { %vm945_vm12 = vcmp.lt.s32.totalorder %v7638_v14, 4  ;;  %vm902_vm13 = vcmp.eq.s32.totalorder %v7634_v10, 0  ;;  %vm905_vm14 = vcmp.eq.s32.totalorder %v7634_v10, 2  ;;  %v768_v16 = vsub.s32 0, %v7665_v35 }
  0xc3   :  { %v951_v52 = vsel %vm945_vm12, %v938_v43, 920167782  ;;  %v926_v58 = vshrl.u32 %v7195_v53, %v925_v54  ;;  %vm943_vm15 = vcmp.lt.s32.totalorder %v7638_v14, 2  ;;  %v950_v4 = vsel %vm942_vm8, %v929_v15, %v932_v42 }
  0xc4   :  { %v955_v49 = vsel %vm945_vm12, %v941_v9, 1326507024  ;;  %vm1937_vm2 = vcmp.eq.s32.totalorder %v7660_v30, 2  ;;  %v6514_v46 = vmin.u32 %v768_v16, %v7665_v35  ;;  %v947_v26 = vsel %vm945_vm12, %v935_v50, 2102212464 }
  0xc5   :  { %v6926_v44 = vpop.eup %6925  ;;  %v952_v6 = vsel %vm944_vm11, %v935_v50, %v951_v52  ;;  %vm1110_vm3 = vcmp.eq.s32.totalorder %v7667_v38, 0  ;;  %vm1934_vm0 = vcmp.eq.s32.totalorder %v7660_v30, 0  ;;  %v954_v13 = vsel %vm942_vm8, %v932_v42, %v935_v50 }
  0xc6   :  { %v6928_v5 = vpop.eup %6927  ;;  %v906_v24 = vxor.u32 2147483648, %v6926_v44  ;;  %v956_v40 = vsel %vm944_vm11, %v938_v43, %v955_v49  ;;  %v958_v37 = vshll.u32 %v918_v47, 8  ;;  %vm1109_vm12 = vcmp.lt.s32.totalorder %v7667_v38, 2 }
  0xc7   :  { %v903_v8 = vxor.u32 2147483648, %v6928_v5  ;;  %vm1933_vm1 = vcmp.lt.s32.totalorder %v7660_v30, 2  ;;  %v758_v0 = vadd.s32 %v7595_v39, %v7591_v33  ;;  %v770_v17 = vclz %v6514_v46 }
  0xc8   :  { %v907_v54 = vsel %vm905_vm14, %v906_v24, %v6928_v5  ;;  %v393_v18 = vand.u32 2139095040, %v7626_v45  ;;  %vm1106_vm5 = vweird.f32 %v7430_v23  ;;  %v946_v22 = vsel %vm942_vm8, %v926_v58, %v929_v15 }
  0xc9   :  { %v904_v19 = vsel %vm902_vm13, %v6926_v44, %v903_v8  ;;  %v948_v27 = vsel %vm944_vm11, %v932_v42, %v947_v26  ;;  %v953_v28 = vsel %vm943_vm15, %v950_v4, %v952_v6  ;;  %v1733_v39 = vsel %vm1731_vm6, %v906_v24, %v6928_v5 }
  0xca   :  { %v908_v33 = vsel %vm901_vm4, %v904_v19, %v907_v54  ;;  %vm704_vm14 = vcmp.lt.s32.totalorder %v7442_v36, 0  ;;  %v6515_v29 = vadd.s32 4294967294, %v770_v17  ;;  %v957_v31 = vsel %vm943_vm15, %v954_v13, %v956_v40 }
  0xcb   :  { %v7715_v32 = vsel %vm898_vm9, nan, %v908_v33  ;;  %v1730_v63 = vsel %vm1728_vm7, %v6926_v44, %v903_v8  ;;  %v7719_v48 = vmul.u32.u64.low %v958_v37, %v957_v31  ;;  %v7720_v34 = vmul.u32.u64.high %v958_v37, %v957_v31, %v7719_v48 }
  0xcc   :  { %vm6516_vm4 = vcmp.lt.s32.totalorder %v6515_v29, 0  ;;  %v949_v10 = vsel %vm943_vm15, %v946_v22, %v948_v27  ;;  %v7724_v12 = vmul.u32.u64.low %v958_v37, %v953_v28  ;;  %v7725_v15 = vmul.u32.u64.high %v958_v37, %v953_v28, %v7724_v12  ;;  %v6930_v9 = vpop.eup %6929 }
  0xcd   :  { %vm1113_vm6 = vcmp.eq.s32.totalorder %v7667_v38, 2  ;;  %v773_v42 = vsel %vm6516_vm4, 0, %v6515_v29  ;;  %v390_v43 = vand.u32 2147483647, %v7626_v45  ;;  %v394_v50 = vshrl.u32 %v393_v18, 23  ;;  %v6932_v14 = vpop.eup %6931 }
  0xce   :  { %v1734_v47 = vsel %vm1727_vm10, %v1730_v63, %v1733_v39  ;;  %v774_v16 = vsub.s32 32, %v773_v42  ;;  %v775_v52 = vshll.u32 %v7665_v35, %v773_v42  ;;  %v778_v44 = vsub.s32 4294967266, %v773_v42 }
  0xcf   :  { %v1114_v58 = vxor.u32 2147483648, %v6930_v9  ;;  %v788_v4 = vsub.s32 4, %v7644_v25  ;;  %v965_v49 = vmul.u32 %v958_v37, %v949_v10  ;;  %vm967_vm7 = vc.u32 %v7720_v34, %v7724_v12 }
  0xd0   :  { %v1111_v5 = vxor.u32 2147483648, %v6932_v14  ;;  %v776_v24 = vshrl.u32 %v758_v0, %v774_v16  ;;  %v779_v46 = vadd.s32 127, %v778_v44  ;;  %v968_v26 = vadd.s32 1, %v7725_v15 }
  0xd1   :  { %v1115_v41 = vsel %vm1113_vm6, %v1114_v58, %v6932_v14  ;;  %v1735_v35 = vsel %vm898_vm9, nan, %v1734_v47  ;;  %v1939_v6 = vsel %vm1937_vm2, %v1114_v58, %v6932_v14  ;;  %v6501_v8 = vadd.s32 4294967169, %v394_v50 }
  0xd2   :  { %v1112_v13 = vsel %vm1110_vm3, %v6930_v9, %v1111_v5  ;;  %v1936_v40 = vsel %vm1934_vm0, %v6930_v9, %v1111_v5  ;;  %v777_v37 = vor.u32 %v776_v24, %v775_v52  ;;  %v780_v54 = vshll.u32 %v779_v46, 23 }
  0xd3   :  { %v1116_v0 = vsel %vm1109_vm12, %v1112_v13, %v1115_v41  ;;  %v1940_v17 = vsel %vm1933_vm1, %v1936_v40, %v1939_v6  ;;  %v789_v21 = vsel %vm704_vm14, %v788_v4, %v7644_v25  ;;  %v969_v18 = vsel %vm967_vm7, %v968_v26, %v7725_v15 }
  0xd4   :  { %v7760_v19 = vsel %vm1106_vm5, nan, %v1116_v0  ;;  %v1941_v38 = vsel %vm1106_vm5, nan, %v1940_v17  ;;  %v781_v22 = vor.u32 4788187, %v780_v54  ;;  %v784_v27 = vcvt.s32.f32 %v777_v37 }
  0xd5   :  { %v1949_v30 = vpack.c.bf16 %v1941_v38, %v1735_v35  ;;  %v970_v28 = vadd.s32 %v969_v18, %v965_v49  ;;  %v400_v33 = vadd.s32 1, %v6501_v8  ;;  %vm7766_vm0 = vcmp.le.f32.partialorder %v702_v51, 0.7853982 }
  0xd6   :  { %v782_v39 = vand.u32 2147483647, %v781_v22  ;;  %v791_v29 = vsel %vm7766_vm0, 0, %v789_v21  ;;  %vm9390_vm1 = vcmask 1043456   ;;  %v397_v51 = vand.u32 8388607, %v390_v43 }
  0xd7   :  { %1970 = vmatprep.subr.bf16.mxu1 %v1949_v30  ;;  %v971_v31 = vadd.s32 536870912, %v970_v28  ;;  %v7776_v23 = vsel %vm9390_vm1, %v7530_v56, %v262_v3  ;;  %vm401_vm5 = vcmp.gt.s32.totalorder %v400_v33, 0  ;;  %v795_v48 = vadd.s32 3, %v791_v29 }
  0xd8   :  { %v785_v63 = vmul.f32 %v784_v27, %v782_v39  ;;  %v402_v10 = vsel %vm401_vm5, %v400_v33, 0  ;;  %v601_v16 = vand.u32 2139095040, %v7776_v23  ;;  %v398_v56 = vor.u32 8388608, %v397_v51 }
  0xd9   :  { %v972_v15 = vshrl.u32 %v971_v31, 30  ;;  %v404_v42 = vand.u32 31, %v402_v10  ;;  %v7783_v52 = vand.u32 3, %v795_v48  ;;  %vm912_vm8 = vcmp.lt.s32.totalorder %v7533_v60, 0 }
  0xda   :  { %v786_v50 = vxor.u32 2147483648, %v785_v63  ;;  %v602_v26 = vshrl.u32 %v601_v16, 23  ;;  %v7798_v41 = vand.u32 3, %v791_v29  ;;  %v403_v35 = vshrl.u32 %v402_v10, 5 }
  0xdb   :  { %v973_v9 = vshll.u32 %v972_v15, 30  ;;  %v405_v47 = vsub.s32 32, %v404_v42  ;;  %v407_v14 = vshll.u32 %v7195_v53, %v404_v42  ;;  %v410_v58 = vshll.u32 %v7196_v55, %v404_v42 }
  0xdc   :  { %v787_v62 = vsel %vm704_vm14, %v786_v50, %v785_v63  ;;  %v416_v5 = vshll.u32 %v7198_v59, %v404_v42  ;;  %v413_v46 = vshll.u32 %v7197_v57, %v404_v42  ;;  %v966_v13 = vadd.s32 %v7724_v12, %v7720_v34 }
  0xdd   :  { %v790_v3 = vsel %vm7766_vm0, %v7442_v36, %v787_v62  ;;  %v7788_v44 = vsub.s32 %v970_v28, %v973_v9  ;;  %v408_v4 = vshrl.u32 %v7196_v55, %v405_v47  ;;  %v411_v49 = vshrl.u32 %v7197_v57, %v405_v47 }
  0xde   :  { %6933 = vcosq.f32 %v790_v3  ;;  %v414_v6 = vshrl.u32 %v7198_v59, %v405_v47  ;;  %v417_v8 = vshrl.u32 %v7199_v61, %v405_v47  ;;  %v406_v0 = vshrl.u32 %v7195_v53, %v405_v47 }
  0xdf   :  { %6935 = vsinq.f32 %v790_v3  ;;  %v976_v24 = vsub.s32 0, %v7788_v44  ;;  %v409_v37 = vor.u32 %v408_v4, %v407_v14  ;;  %v412_v54 = vor.u32 %v411_v49, %v410_v58 }
  0xe0   :  { %v418_v17 = vor.u32 %v417_v8, %v416_v5  ;;  %v419_v21 = vshll.u32 %v7199_v61, %v404_v42  ;;  %v7807_v18 = vshll.u32 %v398_v56, 8  ;;  %vm801_vm9 = vcmp.eq.s32.totalorder %v7783_v52, 2 }
  0xe1   :  { %v6522_v40 = vmin.u32 %v976_v24, %v7788_v44  ;;  %v415_v22 = vor.u32 %v414_v6, %v413_v46  ;;  %v598_v27 = vand.u32 2147483647, %v7776_v23  ;;  %v6509_v30 = vadd.s32 4294967169, %v602_v26 }
  0xe2   :  { %vm798_vm10 = vcmp.eq.s32.totalorder %v7783_v52, 0  ;;  %vm7814_vm11 = vcmp.le.f32.partialorder %v910_v11, 0.7853982  ;;  %v996_v12 = vsub.s32 4, %v972_v15  ;;  %v420_v28 = vshrl.u32 %v7200_v7, %v405_v47 }
  0xe3   :  { %v978_v38 = vclz %v6522_v40  ;;  %vm422_vm13 = vcmp.lt.s32.totalorder %v403_v35, 1  ;;  %vm424_vm15 = vcmp.lt.s32.totalorder %v403_v35, 3  ;;  %vm797_vm2 = vcmp.lt.s32.totalorder %v7783_v52, 2 }
  0xe4   :  { %vm423_vm3 = vcmp.lt.s32.totalorder %v403_v35, 2  ;;  %vm425_vm12 = vcmp.lt.s32.totalorder %v403_v35, 4  ;;  %v430_v25 = vsel %vm422_vm13, %v409_v37, %v412_v54  ;;  %v421_v39 = vor.u32 %v420_v28, %v419_v21 }
  0xe5   :  { %v6523_v33 = vadd.s32 4294967294, %v978_v38  ;;  %v426_v29 = vsel %vm422_vm13, %v406_v0, %v409_v37  ;;  %v427_v31 = vsel %vm425_vm12, %v415_v22, 2102212464  ;;  %v431_v63 = vsel %vm425_vm12, %v418_v17, 920167782 }
  0xe6   :  { %v428_v11 = vsel %vm424_vm15, %v412_v54, %v427_v31  ;;  %v432_v48 = vsel %vm424_vm15, %v415_v22, %v431_v63  ;;  %v434_v51 = vsel %vm422_vm13, %v412_v54, %v415_v22  ;;  %vm794_vm4 = vweird.f32 %v7442_v36 }
  0xe7   :  { %vm6524_vm14 = vcmp.lt.s32.totalorder %v6523_v33, 0  ;;  %v997_v42 = vsel %vm912_vm8, %v996_v12, %v972_v15  ;;  %v433_v50 = vsel %vm423_vm3, %v430_v25, %v432_v48  ;;  %v435_v9 = vsel %vm425_vm12, %v421_v39, 1326507024 }
  0xe8   :  { %v981_v10 = vsel %vm6524_vm14, 0, %v6523_v33  ;;  %v436_v56 = vsel %vm424_vm15, %v418_v17, %v435_v9  ;;  %v429_v3 = vsel %vm423_vm3, %v426_v29, %v428_v11  ;;  %vm1625_vm6 = vcmp.eq.s32.totalorder %v7798_v41, 0 }
  0xe9   :  { %v982_v47 = vsub.s32 32, %v981_v10  ;;  %v983_v16 = vshll.u32 %v7788_v44, %v981_v10  ;;  %v986_v62 = vsub.s32 4294967266, %v981_v10  ;;  %v437_v14 = vsel %vm423_vm3, %v434_v51, %v436_v56 }
  0xea   :  { %v7831_v58 = vmul.u32.u64.low %v7807_v18, %v433_v50  ;;  %v7832_v4 = vmul.u32.u64.high %v7807_v18, %v433_v50, %v7831_v58  ;;  %v7836_v24 = vmul.u32.u64.low %v7807_v18, %v437_v14  ;;  %v7837_v46 = vmul.u32.u64.high %v7807_v18, %v437_v14, %v7836_v24 }
  0xeb   :  { %v6934_v49 = vpop.eup %6933  ;;  %v984_v15 = vshrl.u32 %v966_v13, %v982_v47  ;;  %v987_v5 = vadd.s32 127, %v986_v62  ;;  %v605_v35 = vand.u32 8388607, %v598_v27  ;;  %v608_v6 = vadd.s32 1, %v6509_v30 }
  0xec   :  { %v6936_v44 = vpop.eup %6935  ;;  %v802_v26 = vxor.u32 2147483648, %v6934_v49  ;;  %v999_v54 = vsel %vm7814_vm11, 0, %v997_v42  ;;  %v445_v17 = vmul.u32 %v7807_v18, %v429_v3  ;;  %v448_v21 = vadd.s32 1, %v7832_v4 }
  0xed   :  { %v799_v8 = vxor.u32 2147483648, %v6936_v44  ;;  %v985_v40 = vor.u32 %v984_v15, %v983_v16  ;;  %v988_v37 = vshll.u32 %v987_v5, 23  ;;  %v1003_v0 = vadd.s32 3, %v999_v54 }
  0xee   :  { %v803_v13 = vsel %vm801_vm9, %v802_v26, %v6936_v44  ;;  %vm609_vm7 = vcmp.gt.s32.totalorder %v608_v6, 0  ;;  %vm447_vm0 = vc.u32 %v7837_v46, %v7831_v58  ;;  %v606_v28 = vor.u32 8388608, %v605_v35 }
  0xef   :  { %v800_v38 = vsel %vm798_vm10, %v6934_v49, %v799_v8  ;;  %v989_v22 = vor.u32 4788187, %v988_v37  ;;  %v992_v12 = vcvt.s32.f32 %v985_v40  ;;  %v239_v33 = vmul.f32 42.16965, %v7423_v20 }
  0xf0   :  { %v804_v30 = vsel %vm797_vm2, %v800_v38, %v803_v13  ;;  %vm1628_vm1 = vcmp.eq.s32.totalorder %v7798_v41, 2  ;;  %v449_v39 = vsel %vm447_vm0, %v448_v21, %v7832_v4  ;;  %v610_v31 = vsel %vm609_vm7, %v608_v6, 0 }
  0xf1   :  { %v7857_v18 = vsel %vm794_vm4, nan, %v804_v30  ;;  %v990_v25 = vand.u32 2147483647, %v989_v22  ;;  %v450_v29 = vadd.s32 %v449_v39, %v445_v17  ;;  %v237_v52 = vmul.f32 100.0, %v7423_v20 }
  0xf2   :  { %v7863_v63 = vmul.f32 17.782795, %v7423_v20  ;;  %v7865_v48 = vand.u32 3, %v1003_v0  ;;  %v7867_v51 = vand.u32 3, %v999_v54  ;;  %v612_v10 = vand.u32 31, %v610_v31 }
  0xf3   :  { %v993_v11 = vmul.f32 %v992_v12, %v990_v25  ;;  %v1630_v42 = vsel %vm1628_vm1, %v802_v26, %v6936_v44  ;;  %v451_v50 = vadd.s32 536870912, %v450_v29  ;;  %v7869_v9 = vshll.u32 %v606_v28, 8 }
  0xf4   :  { %v255_v47 = vrot.slane %v239_v33, 4  ;;  %v613_v62 = vsub.s32 32, %v612_v10  ;;  %v615_v56 = vshll.u32 %v7195_v53, %v612_v10  ;;  %v618_v3 = vshll.u32 %v7196_v55, %v612_v10 }
  0xf5   :  { %v994_v16 = vxor.u32 2147483648, %v993_v11  ;;  %vm1624_vm5 = vcmp.lt.s32.totalorder %v7798_v41, 2  ;;  %v1627_v14 = vsel %vm1625_vm6, %v6934_v49, %v799_v8  ;;  %v7876_v4 = vshrl.u32 %v451_v50, 30 }
  0xf6   :  { %v611_v15 = vshrl.u32 %v610_v31, 5  ;;  %v621_v5 = vshll.u32 %v7197_v57, %v612_v10  ;;  %v616_v44 = vshrl.u32 %v7196_v55, %v613_v62  ;;  %v619_v26 = vshrl.u32 %v7197_v57, %v613_v62 }
  0xf7   :  { %v995_v24 = vsel %vm912_vm8, %v994_v16, %v993_v11  ;;  %v624_v35 = vshll.u32 %v7198_v59, %v612_v10  ;;  %v453_v49 = vshll.u32 %v7876_v4, 30  ;;  %v622_v8 = vshrl.u32 %v7198_v59, %v613_v62 }
  0xf8   :  { %v998_v6 = vsel %vm7814_vm11, %v7533_v60, %v995_v24  ;;  %v627_v40 = vshll.u32 %v7199_v61, %v612_v10  ;;  %v617_v37 = vor.u32 %v616_v44, %v615_v56  ;;  %v620_v54 = vor.u32 %v619_v26, %v618_v3 }
  0xf9   :  { %6937 = vcosq.f32 %v998_v6  ;;  %v625_v13 = vshrl.u32 %v7199_v61, %v613_v62  ;;  %v7891_v0 = vsub.s32 %v450_v29, %v453_v49  ;;  %v623_v17 = vor.u32 %v622_v8, %v621_v5 }
  0xfa   :  { %6939 = vsinq.f32 %v998_v6  ;;  %vm9393_vm8 = vcmask 1043456   ;;  %v614_v34 = vshrl.u32 %v7195_v53, %v613_v62  ;;  %v628_v22 = vshrl.u32 %v7200_v7, %v613_v62 }
  0xfb   :  { %v7894_v21 = vsel %vm9393_vm8, %v237_v52, %v255_v47  ;;  %v626_v38 = vor.u32 %v625_v13, %v624_v35  ;;  %vm630_vm9 = vcmp.lt.s32.totalorder %v611_v15, 1  ;;  %v456_v12 = vsub.s32 0, %v7891_v0 }
  0xfc   :  { %vm632_vm10 = vcmp.lt.s32.totalorder %v611_v15, 3  ;;  %vm633_vm11 = vcmp.lt.s32.totalorder %v611_v15, 4  ;;  %v286_v30 = vand.u32 2147483647, %v7894_v21  ;;  %v629_v28 = vor.u32 %v628_v22, %v627_v40 }
  0xfd   :  { %vm631_vm13 = vcmp.lt.s32.totalorder %v611_v15, 2  ;;  %v635_v33 = vsel %vm633_vm11, %v623_v17, 2102212464  ;;  %v638_v25 = vsel %vm630_vm9, %v617_v37, %v620_v54  ;;  %vm1834_vm15 = vcmp.eq.s32.totalorder %v7867_v51, 2 }
  0xfe   :  { %v6502_v39 = vmin.u32 %v456_v12, %v7891_v0  ;;  %v639_v29 = vsel %vm633_vm11, %v626_v38, 920167782  ;;  %v642_v31 = vsel %vm630_vm9, %v620_v54, %v623_v17  ;;  %v289_v52 = vand.u32 2139095040, %v7894_v21 }
  0xff   :  { %vm1831_vm2 = vcmp.eq.s32.totalorder %v7867_v51, 0  ;;  %v634_v11 = vsel %vm630_vm9, %v614_v34, %v617_v37  ;;  %v636_v10 = vsel %vm632_vm10, %v620_v54, %v635_v33  ;;  %v640_v50 = vsel %vm632_vm10, %v623_v17, %v639_v29 }
 0x100   :  { %v643_v47 = vsel %vm633_vm11, %v629_v28, 1326507024  ;;  %vm1005_vm3 = vcmp.lt.s32.totalorder %v7865_v48, 2  ;;  %vm1830_vm12 = vcmp.lt.s32.totalorder %v7867_v51, 2  ;;  %v458_v16 = vclz %v6502_v39 }
 0x101   :  { %v641_v62 = vsel %vm631_vm13, %v638_v25, %v640_v50  ;;  %v644_v56 = vsel %vm632_vm10, %v626_v38, %v643_v47  ;;  %v7911_v3 = vmul.f32 7.498942, %v7423_v20  ;;  %vm1002_vm14 = vweird.f32 %v7533_v60 }
 0x102   :  { %v1631_v5 = vsel %vm1624_vm5, %v1627_v14, %v1630_v42  ;;  %v645_v24 = vsel %vm631_vm13, %v642_v31, %v644_v56  ;;  %v7918_v44 = vmul.u32.u64.low %v7869_v9, %v641_v62  ;;  %v7919_v26 = vmul.u32.u64.high %v7869_v9, %v641_v62, %v7918_v44 }
 0x103   :  { %v6503_v35 = vadd.s32 4294967294, %v458_v16  ;;  %v637_v6 = vsel %vm631_vm13, %v634_v11, %v636_v10  ;;  %v7924_v49 = vmul.u32.u64.low %v7869_v9, %v645_v24  ;;  %v7925_v8 = vmul.u32.u64.high %v7869_v9, %v645_v24, %v7924_v49 }
 0x104   :  { %vm1006_vm6 = vcmp.eq.s32.totalorder %v7865_v48, 0  ;;  %vm1009_vm7 = vcmp.eq.s32.totalorder %v7865_v48, 2  ;;  %v290_v20 = vshrl.u32 %v289_v52, 23  ;;  %v293_v41 = vand.u32 8388607, %v286_v30 }
 0x105   :  { %v1632_v42 = vsel %vm794_vm4, nan, %v1631_v5  ;;  %v446_v14 = vadd.s32 %v7831_v58, %v7837_v46  ;;  %vm6504_vm0 = vcmp.lt.s32.totalorder %v6503_v35, 0  ;;  %v261_v15 = vrot.slane %v7911_v3, 4 }
 0x106   :  { %v461_v40 = vsel %vm6504_vm0, 0, %v6503_v35  ;;  %v653_v37 = vmul.u32 %v7869_v9, %v637_v6  ;;  %v656_v54 = vadd.s32 1, %v7919_v26  ;;  %v6497_v13 = vadd.s32 4294967169, %v290_v20  ;;  %v6938_v17 = vpop.eup %6937 }
 0x107   :  { %v462_v34 = vsub.s32 32, %v461_v40  ;;  %v463_v38 = vshll.u32 %v7891_v0, %v461_v40  ;;  %v466_v22 = vsub.s32 4294967266, %v461_v40  ;;  %v476_v36 = vsub.s32 4, %v7876_v4  ;;  %v6940_v12 = vpop.eup %6939 }
 0x108   :  { %v1010_v28 = vxor.u32 2147483648, %v6938_v17  ;;  %vm655_vm4 = vc.u32 %v7925_v8, %v7918_v44  ;;  %v294_v58 = vor.u32 8388608, %v293_v41  ;;  %v296_v46 = vadd.s32 1, %v6497_v13 }
 0x109   :  { %v1007_v33 = vxor.u32 2147483648, %v6940_v12  ;;  %v464_v25 = vshrl.u32 %v446_v14, %v462_v34  ;;  %v467_v9 = vadd.s32 127, %v466_v22  ;;  %v657_v39 = vsel %vm655_vm4, %v656_v54, %v7919_v26 }
 0x10a   :  { %v1011_v29 = vsel %vm1009_vm7, %v1010_v28, %v6940_v12  ;;  %v1836_v0 = vsel %vm1834_vm15, %v1010_v28, %v6940_v12  ;;  %v658_v31 = vadd.s32 %v657_v39, %v653_v37  ;;  %vm297_vm1 = vcmp.gt.s32.totalorder %v296_v46, 0 }
 0x10b   :  { %v1008_v52 = vsel %vm1006_vm6, %v6938_v17, %v1007_v33  ;;  %v1833_v11 = vsel %vm1831_vm2, %v6938_v17, %v1007_v33  ;;  %v465_v10 = vor.u32 %v464_v25, %v463_v38  ;;  %v468_v50 = vshll.u32 %v467_v9, 23 }
 0x10c   :  { %v1012_v47 = vsel %vm1005_vm3, %v1008_v52, %v1011_v29  ;;  %v1837_v16 = vsel %vm1830_vm12, %v1833_v11, %v1836_v0  ;;  %v659_v62 = vadd.s32 536870912, %v658_v31  ;;  %v298_v56 = vsel %vm297_vm1, %v296_v46, 0 }
 0x10d   :  { %v7957_v3 = vsel %vm1002_vm14, nan, %v1012_v47  ;;  %v1838_v5 = vsel %vm1002_vm14, nan, %v1837_v16  ;;  %v469_v24 = vor.u32 4788187, %v468_v50  ;;  %v472_v26 = vcvt.s32.f32 %v465_v10 }
 0x10e   :  { %v1948_v35 = vpack.c.bf16 %v1838_v5, %v1632_v42  ;;  %v7961_v6 = vshrl.u32 %v659_v62, 30  ;;  %v300_v49 = vand.u32 31, %v298_v56  ;;  %vm7965_vm5 = vcmp.le.f32.partialorder %v390_v43, 0.7853982 }
 0x10f   :  { %vm392_vm8 = vcmp.lt.s32.totalorder %v7626_v45, 0  ;;  %v470_v51 = vand.u32 2147483647, %v469_v24  ;;  %vm9396_vm9 = vcmask 1043456   ;;  %v7981_v40 = vshll.u32 %v294_v58, 8 }
 0x110   :  { %1971 = vmatpush1.bf16.msra.mxu1 %v1948_v35  ;;  %v7973_v60 = vsel %vm392_vm8, %v476_v36, %v7876_v4  ;;  %v661_v20 = vshll.u32 %v7961_v6, 30  ;;  %v7978_v41 = vsel %vm9396_vm9, %v7863_v63, %v261_v15  ;;  %v301_v42 = vsub.s32 32, %v300_v49 }
 0x111   :  { %v473_v43 = vmul.f32 %v472_v26, %v470_v51  ;;  %v303_v14 = vshll.u32 %v7195_v53, %v300_v49  ;;  %v494_v37 = vand.u32 2147483647, %v7978_v41  ;;  %v306_v4 = vshll.u32 %v7196_v55, %v300_v49 }
 0x112   :  { %v7984_v54 = vsub.s32 %v658_v31, %v661_v20  ;;  %v304_v13 = vshrl.u32 %v7196_v55, %v301_v42  ;;  %v309_v17 = vshll.u32 %v7197_v57, %v300_v49  ;;  %v307_v63 = vshrl.u32 %v7197_v57, %v301_v42 }
 0x113   :  { %v474_v34 = vxor.u32 2147483648, %v473_v43  ;;  %v310_v15 = vshrl.u32 %v7198_v59, %v301_v42  ;;  %v312_v38 = vshll.u32 %v7198_v59, %v300_v49  ;;  %v299_v36 = vshrl.u32 %v298_v56, 5 }
 0x114   :  { %v664_v22 = vsub.s32 0, %v7984_v54  ;;  %v313_v12 = vshrl.u32 %v7199_v61, %v301_v42  ;;  %v497_v28 = vand.u32 2139095040, %v7978_v41  ;;  %v684_v46 = vsub.s32 4, %v7961_v6 }
 0x115   :  { %v475_v58 = vsel %vm392_vm8, %v474_v34, %v473_v43  ;;  %v302_v33 = vshrl.u32 %v7195_v53, %v301_v42  ;;  %v315_v25 = vshll.u32 %v7199_v61, %v300_v49  ;;  %vm600_vm10 = vcmp.lt.s32.totalorder %v7776_v23, 0 }
 0x116   :  { %v478_v9 = vsel %vm7965_vm5, %v7626_v45, %v475_v58  ;;  %v6510_v39 = vmin.u32 %v664_v22, %v7984_v54  ;;  %v305_v29 = vor.u32 %v304_v13, %v303_v14  ;;  %v308_v0 = vor.u32 %v307_v63, %v306_v4 }
 0x117   :  { %6941 = vcosq.f32 %v478_v9  ;;  %v311_v31 = vor.u32 %v310_v15, %v309_v17  ;;  %v314_v52 = vor.u32 %v313_v12, %v312_v38  ;;  %v316_v11 = vshrl.u32 %v7200_v7, %v301_v42 }
 0x118   :  { %6943 = vsinq.f32 %v478_v9  ;;  %v666_v10 = vclz %v6510_v39  ;;  %vm318_vm11 = vcmp.lt.s32.totalorder %v299_v36, 1  ;;  %vm319_vm13 = vcmp.lt.s32.totalorder %v299_v36, 2 }
 0x119   :  { %v317_v50 = vor.u32 %v316_v11, %v315_v25  ;;  %vm320_vm15 = vcmp.lt.s32.totalorder %v299_v36, 3  ;;  %vm321_vm2 = vcmp.lt.s32.totalorder %v299_v36, 4  ;;  %v322_v47 = vsel %vm318_vm11, %v302_v33, %v305_v29 }
 0x11a   :  { %v6511_v16 = vadd.s32 4294967294, %v666_v10  ;;  %v323_v62 = vsel %vm321_vm2, %v311_v31, 2102212464  ;;  %v326_v56 = vsel %vm318_vm11, %v305_v29, %v308_v0  ;;  %v327_v5 = vsel %vm321_vm2, %v314_v52, 920167782 }
 0x11b   :  { %v324_v24 = vsel %vm320_vm15, %v308_v0, %v323_v62  ;;  %v328_v26 = vsel %vm320_vm15, %v311_v31, %v327_v5  ;;  %v330_v35 = vsel %vm318_vm11, %v308_v0, %v311_v31  ;;  %v331_v49 = vsel %vm321_vm2, %v317_v50, 1326507024 }
 0x11c   :  { %v654_v51 = vadd.s32 %v7918_v44, %v7925_v8  ;;  %vm6512_vm3 = vcmp.lt.s32.totalorder %v6511_v16, 0  ;;  %v329_v20 = vsel %vm319_vm13, %v326_v56, %v328_v26  ;;  %v332_v42 = vsel %vm320_vm15, %v314_v52, %v331_v49 }
 0x11d   :  { %v669_v43 = vsel %vm6512_vm3, 0, %v6511_v16  ;;  %v333_v14 = vsel %vm319_vm13, %v330_v35, %v332_v42  ;;  %v8011_v13 = vmul.u32.u64.low %v7981_v40, %v329_v20  ;;  %v8012_v4 = vmul.u32.u64.high %v7981_v40, %v329_v20, %v8011_v13 }
 0x11e   :  { %v670_v17 = vsub.s32 32, %v669_v43  ;;  %v671_v34 = vshll.u32 %v7984_v54, %v669_v43  ;;  %v674_v63 = vsub.s32 4294967266, %v669_v43  ;;  %v325_v15 = vsel %vm319_vm13, %v322_v47, %v324_v24 }
 0x11f   :  { %v685_v44 = vsel %vm600_vm10, %v684_v46, %v7961_v6  ;;  %v8020_v8 = vmul.u32.u64.low %v7981_v40, %v333_v14  ;;  %v8021_v38 = vmul.u32.u64.high %v7981_v40, %v333_v14, %v8020_v8  ;;  %v498_v22 = vshrl.u32 %v497_v28, 23 }
 0x120   :  { %v672_v12 = vshrl.u32 %v654_v51, %v670_v17  ;;  %v675_v58 = vadd.s32 127, %v674_v63  ;;  %v1945_v33 = vpack.c.bf16 %v7760_v19, %v7715_v32  ;;  %v1944_v54 = vpack.c.bf16 %v7957_v3, %v7857_v18 }
 0x121   :  { %v341_v36 = vmul.u32 %v7981_v40, %v325_v15  ;;  %v344_v25 = vadd.s32 1, %v8012_v4  ;;  %v6505_v9 = vadd.s32 4294967169, %v498_v22  ;;  %v501_v6 = vand.u32 8388607, %v494_v37 }
 0x122   :  { %v673_v46 = vor.u32 %v672_v12, %v671_v34  ;;  %v676_v39 = vshll.u32 %v675_v58, 23  ;;  %v479_v28 = vsel %vm7965_vm5, 0, %v7973_v60  ;;  %vm8036_vm12 = vcmp.le.f32.partialorder %v598_v27, 0.7853982 }
 0x123   :  { %vm343_vm14 = vc.u32 %v8021_v38, %v8011_v13  ;;  %v504_v40 = vadd.s32 1, %v6505_v9  ;;  %v7201_v0 = vmov 0   ;;  %v687_v48 = vsel %vm8036_vm12, 0, %v685_v44 }
 0x124   :  { %1994 = vmatprep.mubr.bf16.mxu1 %v7201_v0  ;;  %6916 = vset.pattern.permute.xlu0 %v7201_v0  ;;  %v8041_v31 = vpop.eup %6941  ;;  %v677_v52 = vor.u32 4788187, %v676_v39  ;;  %v680_v11 = vcvt.s32.f32 %v673_v46  ;;  %v345_v60 = vsel %vm343_vm14, %v344_v25, %v8012_v4  ;;  %v502_v50 = vor.u32 8388608, %v501_v6 }
 0x125   :  { %v8046_v10 = vpop.eup %6943  ;;  %v346_v27 = vadd.s32 %v345_v60, %v341_v36  ;;  %vm505_vm6 = vcmp.gt.s32.totalorder %v504_v40, 0  ;;  %v483_v47 = vadd.s32 3, %v479_v28  ;;  %v8048_v56 = vand.u32 3, %v479_v28 }
 0x126   :  { %v678_v16 = vand.u32 2147483647, %v677_v52  ;;  %v506_v62 = vsel %vm505_vm6, %v504_v40, 0  ;;  %v8050_v35 = vand.u32 3, %v687_v48  ;;  %v8053_v49 = vadd.s32 %v8011_v13, %v8021_v38 }
 0x127   :  { %v347_v5 = vadd.s32 536870912, %v346_v27  ;;  %v508_v24 = vand.u32 31, %v506_v62  ;;  %v8055_v51 = vadd.s32 3, %v687_v48  ;;  %v8059_v43 = vshll.u32 %v502_v50, 8 }
 0x128   :  { %v681_v26 = vmul.f32 %v680_v11, %v678_v16  ;;  %v8061_v14 = vand.u32 3, %v483_v47  ;;  %v487_v15 = vxor.u32 2147483648, %v8046_v10  ;;  %v490_v13 = vxor.u32 2147483648, %v8041_v31 }
 0x129   :  { %v8057_v20 = vshrl.u32 %v347_v5, 30  ;;  %v509_v42 = vsub.s32 32, %v508_v24  ;;  %v511_v17 = vshll.u32 %v7195_v53, %v508_v24  ;;  %v514_v34 = vshll.u32 %v7196_v55, %v508_v24 }
 0x12a   :  { %v682_v4 = vxor.u32 2147483648, %v681_v26  ;;  %v517_v63 = vshll.u32 %v7197_v57, %v508_v24  ;;  %v507_v22 = vshrl.u32 %v506_v62, 5  ;;  %vm1316_vm7 = vcmp.eq.s32.totalorder %v8048_v56, 0 }
 0x12b   :  { %v349_v44 = vshll.u32 %v8057_v20, 30  ;;  %v512_v8 = vshrl.u32 %v7196_v55, %v509_v42  ;;  %v515_v12 = vshrl.u32 %v7197_v57, %v509_v42  ;;  %v518_v58 = vshrl.u32 %v7198_v59, %v509_v42 }
 0x12c   :  { %v683_v38 = vsel %vm600_vm10, %v682_v4, %v681_v26  ;;  %vm1319_vm0 = vcmp.eq.s32.totalorder %v8048_v56, 2  ;;  %v510_v55 = vshrl.u32 %v7195_v53, %v509_v42  ;;  %v520_v9 = vshll.u32 %v7198_v59, %v508_v24 }
 0x12d   :  { %v686_v36 = vsel %vm8036_vm12, %v7776_v23, %v683_v38  ;;  %v8079_v25 = vsub.s32 %v346_v27, %v349_v44  ;;  %v513_v6 = vor.u32 %v512_v8, %v511_v17  ;;  %v516_v46 = vor.u32 %v515_v12, %v514_v34 }
 0x12e   :  { %6945 = vcosq.f32 %v686_v36  ;;  %v519_v57 = vor.u32 %v518_v58, %v517_v63  ;;  %v521_v28 = vshrl.u32 %v7199_v61, %v509_v42  ;;  %v523_v29 = vshll.u32 %v7199_v61, %v508_v24 }
 0x12f   :  { %6947 = vsinq.f32 %v686_v36  ;;  %v352_v39 = vsub.s32 0, %v8079_v25  ;;  %vm1315_vm4 = vcmp.lt.s32.totalorder %v8048_v56, 2  ;;  %v524_v40 = vshrl.u32 %v7200_v7, %v509_v42 }
 0x130   :  { %vm526_vm1 = vcmp.lt.s32.totalorder %v507_v22, 1  ;;  %vm527_vm5 = vcmp.lt.s32.totalorder %v507_v22, 2  ;;  %vm486_vm8 = vcmp.eq.s32.totalorder %v8061_v14, 0  ;;  %v522_v59 = vor.u32 %v521_v28, %v520_v9 }
 0x131   :  { %v6498_v53 = vmin.u32 %v352_v39, %v8079_v25  ;;  %vm528_vm9 = vcmp.lt.s32.totalorder %v507_v22, 3  ;;  %vm529_vm10 = vcmp.lt.s32.totalorder %v507_v22, 4  ;;  %v525_v0 = vor.u32 %v524_v40, %v523_v29 }
 0x132   :  { %v530_v52 = vsel %vm526_vm1, %v510_v55, %v513_v6  ;;  %v531_v11 = vsel %vm529_vm10, %v519_v57, 2102212464  ;;  %v534_v48 = vsel %vm526_vm1, %v513_v6, %v516_v46  ;;  %v535_v27 = vsel %vm529_vm10, %v522_v59, 920167782  ;;  %v8095_v16 = vpop.f32.mrf.mxu0 }
 0x133   :  { %v354_v60 = vclz %v6498_v53  ;;  %v532_v61 = vsel %vm528_vm9, %v516_v46, %v531_v11  ;;  %v538_v50 = vsel %vm526_vm1, %v516_v46, %v519_v57  ;;  %vm482_vm11 = vweird.f32 %v7626_v45 }
 0x134   :  { %v536_v7 = vsel %vm528_vm9, %v519_v57, %v535_v27  ;;  %v539_v47 = vsel %vm529_vm10, %v525_v0, 1326507024  ;;  %vm485_vm13 = vcmp.lt.s32.totalorder %v8061_v14, 2  ;;  %vm489_vm15 = vcmp.eq.s32.totalorder %v8061_v14, 2  ;;  %v6728_v63 = vpop.f32.mrf.mxu0 }
 0x135   :  { %v6499_v62 = vadd.s32 4294967294, %v354_v60  ;;  %v533_v5 = vsel %vm527_vm5, %v530_v52, %v532_v61  ;;  %v537_v24 = vsel %vm527_vm5, %v534_v48, %v536_v7  ;;  %v540_v26 = vsel %vm528_vm9, %v522_v59, %v539_v47 }
 0x136   :  { %v541_v42 = vsel %vm527_vm5, %v538_v50, %v540_v26  ;;  %v8102_v4 = vmul.u32.u64.low %v8059_v43, %v537_v24  ;;  %v8103_v17 = vmul.u32.u64.high %v8059_v43, %v537_v24, %v8102_v4  ;;  %v488_v34 = vsel %vm486_vm8, %v8041_v31, %v487_v15  ;;  %v2473_v55 = vpop.f32.mrf.mxu0 }
 0x137   :  { %vm6500_vm2 = vcmp.lt.s32.totalorder %v6499_v62, 0  ;;  %v8110_v44 = vmul.u32.u64.low %v8059_v43, %v541_v42  ;;  %v8111_v8 = vmul.u32.u64.high %v8059_v43, %v541_v42, %v8110_v44  ;;  %v692_v38 = vand.u32 3, %v8055_v51 }
 0x138   :  { %v1318_v22 = vsel %vm1316_vm7, %v8041_v31, %v487_v15  ;;  %v1321_v12 = vsel %vm1319_vm0, %v490_v13, %v8046_v10  ;;  %v357_v58 = vsel %vm6500_vm2, 0, %v6499_v62  ;;  %v491_v36 = vsel %vm489_vm15, %v490_v13, %v8046_v10  ;;  %v6729_v15 = vpop.f32.mrf.mxu0 }
 0x139   :  { %v358_v9 = vsub.s32 32, %v357_v58  ;;  %v362_v6 = vsub.s32 4294967266, %v357_v58  ;;  %v549_v46 = vmul.u32 %v8059_v43, %v533_v5  ;;  %v492_v51 = vsel %vm485_vm13, %v488_v34, %v491_v36 }
 0x13a   :  { %vm1521_vm3 = vcmp.lt.s32.totalorder %v8050_v35, 2  ;;  %vm1522_vm12 = vcmp.eq.s32.totalorder %v8050_v35, 0  ;;  %vm1525_vm14 = vcmp.eq.s32.totalorder %v8050_v35, 2  ;;  %v552_v31 = vadd.s32 1, %v8103_v17  ;;  %v6564_v35 = vld [vmem:[%s9358_s8] ss:$0 sm:$0xff] }
 0x13b   :  { %v6946_v57 = vpop.eup %6945  ;;  %v1322_v10 = vsel %vm1315_vm4, %v1318_v22, %v1321_v12  ;;  %v363_v13 = vadd.s32 127, %v362_v6  ;;  %vm551_vm6 = vc.u32 %v8111_v8, %v8102_v4  ;;  %vm697_vm7 = vcmp.eq.s32.totalorder %v692_v38, 2  ;;  %s7204_s8 = smov 104  }
 0x13c   :  { %v6948_v43 = vpop.eup %6947  ;;  %v698_v14 = vxor.u32 2147483648, %v6946_v57  ;;  %v359_v39 = vshll.u32 %v8079_v25, %v357_v58  ;;  %v360_v28 = vshrl.u32 %v8053_v49, %v358_v9  ;;  %v553_v29 = vsel %vm551_vm6, %v552_v31, %v8103_v17 }
 0x13d   :  { %v695_v40 = vxor.u32 2147483648, %v6948_v43  ;;  %v364_v53 = vshll.u32 %v363_v13, 23  ;;  %v554_v59 = vadd.s32 %v553_v29, %v549_v46  ;;  %vm694_vm0 = vcmp.eq.s32.totalorder %v692_v38, 0 }
 0x13e   :  { %vm690_vm1 = vweird.f32 %v7776_v23  ;;  %v1527_v56 = vsel %vm1525_vm14, %v698_v14, %v6948_v43  ;;  %vm693_vm4 = vcmp.lt.s32.totalorder %v692_v38, 2  ;;  %v699_v0 = vsel %vm697_vm7, %v698_v14, %v6948_v43 }
 0x13f   :  { %v1323_v52 = vsel %vm482_vm11, nan, %v1322_v10  ;;  %v1524_v25 = vsel %vm1522_vm12, %v6946_v57, %v695_v40  ;;  %v555_v49 = vadd.s32 536870912, %v554_v59  ;;  %v361_v48 = vor.u32 %v360_v28, %v359_v39 }
 0x140   :  { %v1528_v11 = vsel %vm1521_vm3, %v1524_v25, %v1527_v56  ;;  %v8148_v60 = vsel %vm482_vm11, nan, %v492_v51  ;;  %v696_v61 = vsel %vm694_vm0, %v6946_v57, %v695_v40  ;;  %v365_v50 = vor.u32 4788187, %v364_v53 }
 0x141   :  { %v1529_v27 = vsel %vm690_vm1, nan, %v1528_v11  ;;  %v8152_v7 = vshrl.u32 %v555_v49, 30  ;;  %v700_v47 = vsel %vm693_vm4, %v696_v61, %v699_v0  ;;  %v368_v42 = vcvt.s32.f32 %v361_v48 }
 0x142   :  { %v1947_v62 = vpack.c.bf16 %v1529_v27, %v1323_v52  ;;  %v8156_v5 = vsel %vm690_vm1, nan, %v700_v47  ;;  %v366_v26 = vand.u32 2147483647, %v365_v50  ;;  %v8165_v34 = vadd.f32 %v6564_v35, %v8095_v16 }
 0x143   :  { %v557_v45 = vshll.u32 %v8152_v7, 30  ;;  %v1943_v24 = vpack.c.bf16 %v8156_v5, %v8148_v60  ;;  %v8171_v23 = vadd.f32 %v6564_v35, %v2473_v55  ;;  %vm288_vm5 = vcmp.lt.s32.totalorder %v7894_v21, 0  ;;  %v2329_v60 = vld [vmem:[#allocation5 + $0x18] sm:$0xff] }
 0x144   :  { %1972 = vmatprep.subr.bf16.mxu1 %v1947_v62  ;;  %3157 = vrot.lane.b32.xlu1 %v8165_v34, %s7202_s28  ;;  %v369_v44 = vmul.f32 %v368_v42, %v366_v26  ;;  %v550_v58 = vadd.s32 %v8102_v4, %v8111_v8  ;;  %vm8186_vm9 = vcmp.le.f32.partialorder %v286_v30, 0.7853982  ;;  %v372_v43 = vsub.s32 4, %v8057_v20 }
 0x145   :  { %v558_v17 = vsub.s32 %v554_v59, %v557_v45  ;;  %3151 = vrot.lane.b32.xlu0 %v8165_v34, %s7203_s5  ;;  %vm496_vm10 = vcmp.lt.s32.totalorder %v7978_v41, 0  ;;  %vm495_vm11 = vcmp.le.f32.partialorder %v494_v37, 0.7853982  ;;  %v580_v40 = vsub.s32 4, %v8152_v7 }
 0x146   :  { %v370_v16 = vxor.u32 2147483648, %v369_v44  ;;  %v373_v28 = vsel %vm288_vm5, %v372_v43, %v8057_v20  ;;  %vm378_vm3 = vweird.f32 %v7894_v21  ;;  %vm586_vm4 = vweird.f32 %v7978_v41  ;;  %v144_v43 = vld [vmem:[%s9407_s20] sm:$0xff] }
 0x147   :  { %v560_v63 = vsub.s32 0, %v558_v17  ;;  %v375_v59 = vsel %vm8186_vm9, 0, %v373_v28  ;;  %v581_v56 = vsel %vm496_vm10, %v580_v40, %v8152_v7  ;;  %v2485_v40 = vld [vmem:[#allocation10 + $0x38] sm:$0xff] }
 0x148   :  { %3159 = vrot.lane.b32.xlu1 %v8171_v23, %s7202_s28  ;;  %v371_v9 = vsel %vm288_vm5, %v370_v16, %v369_v44  ;;  %v1211_v37 = vand.u32 3, %v375_v59  ;;  %v583_v25 = vsel %vm495_vm11, 0, %v581_v56  ;;  %v379_v49 = vadd.s32 3, %v375_v59  ;;  %v2482_v59 = vld [vmem:[#allocation10 + $0x20] sm:$0xff]  ;;  %v2483_v56 = vld [vmem:[#allocation10 + $0x28] sm:$0xff] }
 0x149   :  { %v6506_v38 = vmin.u32 %v560_v63, %v558_v17  ;;  %3163 = vrot.lane.b32.xlu0 %v8165_v34, %s7204_s8  ;;  %v374_v30 = vsel %vm8186_vm9, %v7894_v21, %v371_v9  ;;  %v587_v11 = vadd.s32 3, %v583_v25  ;;  %v1417_v61 = vand.u32 3, %v583_v25 }
 0x14a   :  { %6949 = vcosq.f32 %v374_v30  ;;  %vm1213_vm13 = vcmp.eq.s32.totalorder %v1211_v37, 0  ;;  %vm1216_vm15 = vcmp.eq.s32.totalorder %v1211_v37, 2  ;;  %v380_v27 = vand.u32 3, %v379_v49 }
 0x14b   :  { %v562_v22 = vclz %v6506_v38  ;;  %6951 = vsinq.f32 %v374_v30  ;;  %v588_v50 = vand.u32 3, %v587_v11  ;;  %vm1212_vm2 = vcmp.lt.s32.totalorder %v1211_v37, 2 }
 0x14c   :  { %3165 = vrot.lane.b32.xlu1 %v8171_v23, %s7204_s8  ;;  %vm1419_vm12 = vcmp.eq.s32.totalorder %v1417_v61, 0  ;;  %vm1422_vm14 = vcmp.eq.s32.totalorder %v1417_v61, 2  ;;  %vm382_vm6 = vcmp.eq.s32.totalorder %v380_v27, 0  ;;  %vm385_vm7 = vcmp.eq.s32.totalorder %v380_v27, 2 }
 0x14d   :  { %v6507_v12 = vadd.s32 4294967294, %v562_v22  ;;  %3169 = vrot.lane.b32.xlu0 %v8165_v34, %s7205_s6  ;;  %vm590_vm0 = vcmp.eq.s32.totalorder %v588_v50, 0  ;;  %vm593_vm1 = vcmp.eq.s32.totalorder %v588_v50, 2  ;;  %vm1418_vm5 = vcmp.lt.s32.totalorder %v1417_v61, 2 }
 0x14e   :  { %vm589_vm9 = vcmp.lt.s32.totalorder %v588_v50, 2  ;;  %v2488_v11 = vpack.c.bf16 %v2483_v56, %v2482_v59 }
 0x14f   :  { %vm6508_vm8 = vcmp.lt.s32.totalorder %v6507_v12, 0 }
 0x150   :  { %v565_v55 = vsel %vm6508_vm8, 0, %v6507_v12  ;;  %3171 = vrot.lane.b32.xlu1 %v8171_v23, %s7205_s6  ;;  %vm381_vm8 = vcmp.lt.s32.totalorder %v380_v27, 2 }
 0x151   :  { %v566_v6 = vsub.s32 32, %v565_v55  ;;  %v567_v4 = vshll.u32 %v558_v17, %v565_v55  ;;  %v570_v8 = vsub.s32 4294967266, %v565_v55  ;;  %3175 = vrot.lane.b32.xlu0 %v8165_v34, %s7206_s0 }
 0x153   :  { %v568_v46 = vshrl.u32 %v550_v58, %v566_v6  ;;  %v571_v51 = vadd.s32 127, %v570_v8 }
 0x154   :  { %3177 = vrot.lane.b32.xlu1 %v8171_v23, %s7206_s0 }
 0x155   :  { %v569_v31 = vor.u32 %v568_v46, %v567_v4  ;;  %v572_v15 = vshll.u32 %v571_v51, 23  ;;  %3153 = vrot.lane.b32.xlu0 %v8171_v23, %s7203_s5  ;;  %v2332_v46 = vld [vmem:[#allocation5 + $0x30] sm:$0xff]  ;;  %v2333_v51 = vld [vmem:[#allocation5 + $0x38] sm:$0xff] }
 0x156   :  { %v2337_v32 = vpack.c.bf16 %v2333_v51, %v2332_v46 }
 0x157   :  { %v573_v57 = vor.u32 4788187, %v572_v15  ;;  %v576_v10 = vcvt.s32.f32 %v569_v31  ;;  %v6950_v0 = vpop.eup %6949  ;;  %v1950_v31 = vld [vmem:[%s9363_s13] sm:$0xff]  ;;  %v2326_v15 = vld [vmem:[#allocation5] sm:$0xff] }
 0x158   :  { %v6952_v52 = vpop.eup %6951  ;;  %v386_v20 = vxor.u32 2147483648, %v6950_v0  ;;  %v1951_v19 = vpack.c.bf16 %v1950_v31, %v1950_v31 }
 0x159   :  { %v574_v13 = vand.u32 2147483647, %v573_v57  ;;  %v383_v48 = vxor.u32 2147483648, %v6952_v52  ;;  %v2327_v57 = vld [vmem:[#allocation5 + $0x8] sm:$0xff] }
 0x15a   :  { %v1218_v62 = vsel %vm1216_vm15, %v386_v20, %v6952_v52  ;;  %v387_v44 = vsel %vm385_vm7, %v386_v20, %v6952_v52  ;;  %v7208_v20 = vmov 1934713408  }
 0x15b   :  { %v577_v14 = vmul.f32 %v576_v10, %v574_v13  ;;  %v1215_v47 = vsel %vm1213_vm13, %v6950_v0, %v383_v48  ;;  %v384_v63 = vsel %vm382_vm6, %v6950_v0, %v383_v48  ;;  %vm9403_vm13 = vmmov 0  }
 0x15c   :  { %v1219_v26 = vsel %vm1212_vm2, %v1215_v47, %v1218_v62  ;;  %v388_v9 = vsel %vm381_vm8, %v384_v63, %v387_v44  ;;  %v2334_v10 = vpack.c.bf16 %v2327_v57, %v2326_v15  ;;  %v7207_v0 = vmov 1983009808  }
 0x15d   :  { %v578_v39 = vxor.u32 2147483648, %v577_v14  ;;  %v1220_v38 = vsel %vm378_vm3, nan, %v1219_v26  ;;  %v389_v4 = vsel %vm378_vm3, nan, %v388_v9  ;;  %v2056_v52 = vunpack.c.l.s4 %v7207_v0 }
 0x15e   :  { %v2120_v61 = vunpack.c.l.s4 %v7208_v20  ;;  %vm6291_vm8 = vcmask 195584  }
 0x15f   :  { %v579_v29 = vsel %vm496_vm10, %v578_v39, %v577_v14  ;;  %vm9401_vm10 = vcmask 523264   ;;  %v145_v14 = vld [vmem:[%s9407_s20 + $0x8] sm:$0xff]  ;;  %v2057_v48 = vunpack.c.0.s8 %v2056_v52 }
 0x160   :  { %v582_v53 = vsel %vm495_vm11, %v7978_v41, %v579_v29  ;;  %v2358_v21 = vsel %vm9401_vm10, %v2337_v32, 0  ;;  %v2330_v41 = vld [vmem:[#allocation5 + $0x20] sm:$0xff]  ;;  %vm9402_vm11 = vmmov %vm9401_vm10  ;;  %v2325_v39 = vpack.c.bf16 %v145_v14, %v144_v43  ;;  %v2484_v29 = vld [vmem:[#allocation10 + $0x30] sm:$0xff]  ;;  %v2121_v26 = vunpack.c.0.s8 %v2120_v61 }
 0x161   :  { %6953 = vcosq.f32 %v582_v53  ;;  %vm9404_vm15 = vmmov %vm9401_vm10 }
 0x162   :  { %6955 = vsinq.f32 %v582_v53  ;;  %vm9405_vm2 = vmmov %vm9401_vm10  ;;  %v2489_v53 = vpack.c.bf16 %v2485_v40, %v2484_v29  ;;  %vm6297_vm10 = vcmask 326656  }
 0x163   :  { %vm9406_vm3 = vmmov %vm9405_vm2 }
 0x164   :  { %v2349_v13 = vsel %vm9406_vm3, %v2334_v10, 0  ;;  %vm9410_vm6 = vmmov %vm9405_vm2 }
 0x165   :  { %v2507_v47 = vsel %vm9410_vm6, %v2488_v11, 0  ;;  %vm9411_vm7 = vmmov %vm9405_vm2 }
 0x16e   :  { %v6954_v35 = vpop.eup %6953 }
 0x16f   :  { %v6956_v7 = vpop.eup %6955  ;;  %v594_v45 = vxor.u32 2147483648, %v6954_v35 }
 0x170   :  { %v591_v42 = vxor.u32 2147483648, %v6956_v7 }
 0x171   :  { %v1424_v17 = vsel %vm1422_vm14, %v594_v45, %v6956_v7  ;;  %v595_v12 = vsel %vm593_vm1, %v594_v45, %v6956_v7  ;;  %vm9409_vm14 = vmmov %vm9405_vm2  ;;  %v8265_v7 = vsub.s32 %v2057_v48, %v7355_v2  ;;  %vm4341_vm1 = vcmask 64512  }
 0x172   :  { %v1421_v22 = vsel %vm1419_vm12, %v6954_v35, %v591_v42  ;;  %v592_v16 = vsel %vm590_vm0, %v6954_v35, %v591_v42  ;;  %vm9408_vm12 = vmmov %vm9405_vm2  ;;  %v2510_v37 = vsel %vm9409_vm14, %v2489_v53, 0 }
 0x173   :  { %v1425_v58 = vsel %vm1418_vm5, %v1421_v22, %v1424_v17  ;;  %v596_v6 = vsel %vm589_vm9, %v592_v16, %v595_v12  ;;  %v8276_v16 = vsub.s32 %v2121_v26, %v7355_v2  ;;  %v2479_v26 = vld [vmem:[#allocation10 + $0x8] sm:$0xff]  ;;  %vm9412_vm0 = vmmov %vm9405_vm2  ;;  %vm4750_vm5 = vcmask 130048  }
 0x174   :  { %v1426_v36 = vsel %vm586_vm4, nan, %v1425_v58  ;;  %v597_v8 = vsel %vm586_vm4, nan, %v596_v6  ;;  %vm9413_vm4 = vmmov %vm9412_vm0  ;;  %vm6294_vm9 = vcmask 261120  }
 0x175   :  { %v1946_v55 = vpack.c.bf16 %v1426_v36, %v1220_v38  ;;  %v1942_v30 = vpack.c.bf16 %v597_v8, %v389_v4  ;;  %vm9416_vm3 = vmmov %vm9412_vm0 }
 0x176   :  { %vm9418_vm14 = vmmov %vm9412_vm0 }
 0x177   :  { %1973 = vmatpush1.bf16.msra.mxu1 %v1946_v55  ;;  %vm9419_vm6 = vmmov %vm9412_vm0 }
 0x178   :  { %1974 = vmatprep.subr.bf16.mxu1 %v1945_v33  ;;  %v2331_v33 = vld [vmem:[#allocation5 + $0x28] sm:$0xff] }
 0x179   :  { %v2336_v18 = vpack.c.bf16 %v2331_v33, %v2330_v41 }
 0x17b   :  { %1975 = vmatpush1.bf16.msra.mxu1 %v1944_v54  ;;  %v2355_v3 = vsel %vm9404_vm15, %v2336_v18, 0  ;;  %v2328_v54 = vld [vmem:[#allocation5 + $0x10] sm:$0xff]  ;;  %vm9414_vm15 = vmmov %vm9412_vm0 }
 0x17c   :  { %1976 = vmatprep.subr.bf16.mxu1 %v1943_v24  ;;  %v2335_v5 = vpack.c.bf16 %v2329_v60, %v2328_v54 }
 0x17e   :  { %v2352_v24 = vsel %vm9405_vm2, %v2335_v5, 0  ;;  %vm9415_vm2 = vmmov %vm9412_vm0 }
 0x17f   :  { %1977 = vmatpush1.bf16.msra.mxu1 %v1942_v30 }
 0x180   :  { %6706 = vmatprep.subr.bf16.mxu1 %v7193_v1 }
 0x182   :  { %6561 = vmatmul.mubr.msk.bf16.vlgmr.msra.gmra.mxu1 %vm9402_vm11, %v1951_v19  ;;  %vm6300_vm11 = vcmask 392192  }
 0x183   :  { %6707 = vmatpush3.bf16.xpose.msra.mxu1 %v2358_v21  ;;  %6714 = vmatprep.mubr.msk.bf16.mxu1 %vm9403_vm13, %v7193_v1 }
 0x184   :  { %6708 = vmatprep.subr.bf16.mxu1 %v7193_v1 }
 0x18b   :  { %6709 = vmatpush3.bf16.xpose.msra.mxu1 %v2355_v3 }
 0x18c   :  { %6710 = vmatprep.subr.bf16.mxu1 %v7193_v1 }
 0x193   :  { %6711 = vmatpush3.bf16.xpose.msra.mxu1 %v2352_v24 }
 0x194   :  { %6712 = vmatprep.subr.bf16.mxu1 %v7193_v1 }
 0x19b   :  { %6713 = vmatpush3.bf16.xpose.msra.mxu1 %v2349_v13 }
 0x19c   :  { %6730 = vmatprep.subr.bf16.mxu1 %v7193_v1 }
 0x1a2   :  { %6715 = vmatmul.mubr.msk.bf16.vlgmr.msra.gmra.mxu1 %vm9408_vm12, %v2325_v39  ;;  %v2480_v39 = vld [vmem:[#allocation10 + $0x10] sm:$0xff]  ;;  %vm9417_vm12 = vmmov %vm9412_vm0 }
 0x1a3   :  { %6738 = vmatprep.mubr.msk.bf16.mxu1 %vm9403_vm13, %v7193_v1  ;;  %6731 = vmatpush3.bf16.xpose.msra.mxu1 %v2510_v37 }
 0x1a4   :  { %6732 = vmatprep.subr.bf16.mxu1 %v7193_v1 }
 0x1ab   :  { %6733 = vmatpush3.bf16.xpose.msra.mxu1 %v2507_v47 }
 0x1ac   :  { %6734 = vmatprep.subr.bf16.mxu1 %v7193_v1 }
 0x1b6   :  { %v3158_v25 = vpop.permute.xlu1 %3157 }
 0x1b7   :  { %v3152_v28 = vpop.permute.xlu0 %3151  ;;  %v3193_v45 = vcombine.low %v8165_v34, %v3158_v25  ;;  %v3194_v42 = vcombine.high %v8165_v34, %v3158_v25 }
 0x1b9   :  { %v3201_v22 = vrot.slane %v3193_v45, %v8265_v7  ;;  %v3208_v12 = vrot.slane %v3194_v42, %v8265_v7  ;;  %v2478_v45 = vld [vmem:[#allocation10] sm:$0xff] }
 0x1ba   :  { %v3160_v35 = vpop.permute.xlu1 %3159  ;;  %v2486_v42 = vpack.c.bf16 %v2479_v26, %v2478_v45 }
 0x1bb   :  { %v3164_v49 = vpop.permute.xlu0 %3163  ;;  %v3329_v58 = vcombine.low %v8171_v23, %v3160_v35  ;;  %v3330_v36 = vcombine.high %v8171_v23, %v3160_v35 }
 0x1bc   :  { %v3209_v50 = vcombine.low %v3152_v28, %v3164_v49  ;;  %v3210_v62 = vcombine.high %v3152_v28, %v3164_v49  ;;  %v2481_v28 = vld [vmem:[#allocation10 + $0x18] sm:$0xff] }
 0x1bd   :  { %v3337_v19 = vrot.slane %v3329_v58, %v8265_v7  ;;  %v3344_v21 = vrot.slane %v3330_v36, %v8265_v7  ;;  %v2487_v29 = vpack.c.bf16 %v2481_v28, %v2480_v39  ;;  %v6562_v39 = vld [vmem:[#allocation7] ss:$0 sm:$0xff] }
 0x1be   :  { %v3217_v63 = vrot.slane %v3209_v50, %v8265_v7  ;;  %v3224_v44 = vrot.slane %v3210_v62, %v8265_v7  ;;  %v3166_v38 = vpop.permute.xlu1 %3165 }
 0x1bf   :  { %v8261_v27 = vpop.permute.xlu0 %3169  ;;  %v2504_v59 = vsel %vm9411_vm7, %v2487_v29, 0  ;;  %vm9420_vm7 = vmmov %vm9412_vm0 }
 0x1c0   :  { %v3257_v9 = vcombine.low %v3201_v22, %v3217_v63  ;;  %v3258_v6 = vcombine.high %v3201_v22, %v3217_v63  ;;  %v3273_v46 = vcombine.low %v3208_v12, %v3224_v44  ;;  %v3274_v51 = vcombine.high %v3208_v12, %v3224_v44  ;;  %6735 = vmatpush3.bf16.xpose.msra.mxu1 %v2504_v59 }
 0x1c1   :  { %6736 = vmatprep.subr.bf16.mxu1 %v7193_v1  ;;  %v2501_v44 = vsel %vm9412_vm0, %v2486_v42, 0 }
 0x1c2   :  { %v3265_v2 = vrot.slane %v3257_v9, %v8276_v16  ;;  %v3272_v32 = vrot.slane %v3258_v6, %v8276_v16  ;;  %v3281_v41 = vrot.slane %v3273_v46, %v8276_v16  ;;  %v3288_v33 = vrot.slane %v3274_v51, %v8276_v16  ;;  %v148_v51 = vld [vmem:[#allocation2] sm:$0xff] }
 0x1c3   :  { %v8269_v17 = vpop.permute.xlu0 %3175 }
 0x1c4   :  { %v6584_v5 = vcombine.low %v3265_v2, %v3272_v32  ;;  %v6586_v24 = vcombine.high %v3265_v2, %v3272_v32  ;;  %v6588_v15 = vcombine.low %v3281_v41, %v3288_v33  ;;  %v6590_v57 = vcombine.high %v3281_v41, %v3288_v33 }
 0x1c6   :  { %v3473_v40 = vrot.slane %v6584_v5, %v8265_v7  ;;  %v3489_v53 = vrot.slane %v6586_v24, %v8265_v7  ;;  %v3505_v56 = vrot.slane %v6588_v15, %v8265_v7  ;;  %v3521_v0 = vrot.slane %v6590_v57, %v8265_v7 }
 0x1c7   :  { %v3154_v55 = vpop.permute.xlu0 %3153 }
 0x1c8   :  { %v3345_v4 = vcombine.low %v3154_v55, %v3166_v38  ;;  %v3346_v8 = vcombine.high %v3154_v55, %v3166_v38  ;;  %v3529_v11 = vcombine.low %v3473_v40, %v3489_v53  ;;  %v3561_v48 = vcombine.low %v3505_v56, %v3521_v0  ;;  %6737 = vmatpush3.bf16.xpose.msra.mxu1 %v2501_v44 }
 0x1c9   :  { %v3530_v20 = vcombine.high %v3473_v40, %v3489_v53  ;;  %v3562_v61 = vcombine.high %v3505_v56, %v3521_v0  ;;  %6760 = vmatprep.subr.bf16.mxu1 %v7193_v1 }
 0x1ca   :  { %v3353_v30 = vrot.slane %v3345_v4, %v8265_v7  ;;  %v3360_v31 = vrot.slane %v3346_v8, %v8265_v7  ;;  %v3537_v63 = vrot.slane %v3529_v11, %v8276_v16  ;;  %v3569_v38 = vrot.slane %v3561_v48, %v8276_v16 }
 0x1cb   :  { %v3544_v22 = vrot.slane %v3530_v20, %v8276_v16  ;;  %v3576_v12 = vrot.slane %v3562_v61, %v8276_v16 }
 0x1cc   :  { %v3393_v18 = vcombine.low %v3337_v19, %v3353_v30  ;;  %v3394_v3 = vcombine.high %v3337_v19, %v3353_v30  ;;  %v3409_v54 = vcombine.low %v3344_v21, %v3360_v31  ;;  %v3410_v60 = vcombine.high %v3344_v21, %v3360_v31  ;;  %v149_v30 = vld [vmem:[#allocation2 + $0x8] sm:$0xff] }
 0x1cd   :  { %v3593_v31 = vcombine.low %v3537_v63, %v3569_v38  ;;  %v3596_v32 = vcombine.high %v3544_v22, %v3576_v12  ;;  %v2477_v21 = vpack.c.bf16 %v149_v30, %v148_v51  ;;  %v3594_v41 = vcombine.high %v3537_v63, %v3569_v38 }
 0x1ce   :  { %v3401_v10 = vrot.slane %v3393_v18, %v8276_v16  ;;  %v3408_v13 = vrot.slane %v3394_v3, %v8276_v16  ;;  %v3417_v43 = vrot.slane %v3409_v54, %v8276_v16  ;;  %v3424_v14 = vrot.slane %v3410_v60, %v8276_v16 }
 0x1cf   :  { %6739 = vmatmul.mubr.msk.bf16.vlgmr.msra.gmra.mxu1 %vm9413_vm4, %v2477_v21  ;;  %v3595_v60 = vcombine.low %v3544_v22, %v3576_v12  ;;  %vm9422_vm4 = vmmov %vm9412_vm0 }
 0x1d0   :  { %v6592_v52 = vcombine.low %v3401_v10, %v3408_v13  ;;  %v6594_v37 = vcombine.high %v3401_v10, %v3408_v13  ;;  %v6596_v25 = vcombine.low %v3417_v43, %v3424_v14  ;;  %v6598_v49 = vcombine.high %v3417_v43, %v3424_v14  ;;  %6762 = vmatprep.mubr.msk.bf16.mxu1 %vm9403_vm13, %v7193_v1 }
 0x1d2   :  { %v3609_v50 = vrot.slane %v6592_v52, %v8265_v7  ;;  %v3625_v47 = vrot.slane %v6594_v37, %v8265_v7  ;;  %v3641_v62 = vrot.slane %v6596_v25, %v8265_v7  ;;  %v3657_v35 = vrot.slane %v6598_v49, %v8265_v7  ;;  %v8357_v25 = vpop.permute.xlu1 %3171 }
 0x1d4   :  { %v3665_v58 = vcombine.low %v3609_v50, %v3625_v47  ;;  %v3697_v36 = vcombine.low %v3641_v62, %v3657_v35  ;;  %v3666_v55 = vcombine.high %v3609_v50, %v3625_v47  ;;  %v3698_v9 = vcombine.high %v3641_v62, %v3657_v35 }
 0x1d6   :  { %v3673_v6 = vrot.slane %v3665_v58, %v8276_v16  ;;  %v3705_v4 = vrot.slane %v3697_v36, %v8276_v16  ;;  %v3680_v8 = vrot.slane %v3666_v55, %v8276_v16  ;;  %v3712_v46 = vrot.slane %v3698_v9, %v8276_v16  ;;  %v8359_v49 = vpop.permute.xlu1 %3177 }
 0x1d8   :  { %v3729_v2 = vcombine.low %v3673_v6, %v3705_v4  ;;  %v3732_v19 = vcombine.high %v3680_v8, %v3712_v46  ;;  %v3730_v5 = vcombine.high %v3673_v6, %v3705_v4  ;;  %v3731_v15 = vcombine.low %v3680_v8, %v3712_v46 }
 0x1da   :  { %v3737_v33 = vpack.c.bf16 %v3729_v2, %v3593_v31  ;;  %v3740_v18 = vpack.c.bf16 %v3732_v19, %v3596_v32  ;;  %v8320_v24 = vpack.c.bf16 %v3730_v5, %v3594_v41  ;;  %v8322_v57 = vpack.c.bf16 %v3731_v15, %v3595_v60 }
 0x1dc   :  { %v4346_v3 = vsel %vm4341_vm1, %v3737_v33, 0  ;;  %v4487_v54 = vsel %vm4341_vm1, %v3740_v18, 0 }
 0x1dd   :  { %6743 = vmatpush3.bf16.xpose.msra.mxu0 %v4346_v3  ;;  %6761 = vmatpush3.bf16.xpose.msra.mxu1 %v4487_v54 }
 0x1de   :  { %6748 = vmatprep.subr.bf16.mxu0 %v7193_v1  ;;  %6772 = vmatprep.subr.bf16.mxu1 %v7193_v1 }
 0x242   :  { %v8324_v10 = vpop.f32.mrf.mxu1 }
 0x244   :  { %v8326_v13 = vpop.f32.mrf.mxu1 }
 0x246   :  { %v2000_v43 = vpop.f32.mrf.mxu1 }
 0x248   :  { %v2001_v14 = vpop.f32.mrf.mxu1 }
 0x262   :  { %v2394_v28 = vpop.f32.mrf.mxu1 }
 0x263   :  { %v2395_v29 = vadd.f32 %v6562_v39, %v2394_v28 }
 0x264   :  { %v6716_v40 = vpop.f32.mrf.mxu1 }
 0x265   :  { %2555 = vrot.lane.b32.xlu0 %v2395_v29, %s7203_s5 }
 0x266   :  { %v2397_v53 = vpop.f32.mrf.mxu1 }
 0x267   :  { %v2398_v59 = vadd.f32 %v6562_v39, %v2397_v53 }
 0x268   :  { %v6717_v56 = vpop.f32.mrf.mxu1 }
 0x269   :  { %2561 = vrot.lane.b32.xlu0 %v2395_v29, %s7202_s28  ;;  %2557 = vrot.lane.b32.xlu1 %v2398_v59, %s7203_s5 }
 0x26d   :  { %2567 = vrot.lane.b32.xlu0 %v2395_v29, %s7204_s8  ;;  %2563 = vrot.lane.b32.xlu1 %v2398_v59, %s7202_s28 }
 0x271   :  { %3181 = vrot.lane.b32.xlu0 %v8165_v34, %s7209_s21  ;;  %2569 = vrot.lane.b32.xlu1 %v2398_v59, %s7204_s8 }
 0x275   :  { %3187 = vrot.lane.b32.xlu0 %v8165_v34, %s7210_s23  ;;  %3183 = vrot.lane.b32.xlu1 %v8171_v23, %s7209_s21  ;;  %v1952_v34 = vld [vmem:[%s9364_s14] sm:$0xff]  ;;  %s7211_s14 = smov 48  }
 0x279   :  { %2573 = vrot.lane.b32.xlu0 %v2395_v29, %s7205_s6  ;;  %3189 = vrot.lane.b32.xlu1 %v8171_v23, %s7210_s23 }
 0x27d   :  { %2579 = vrot.lane.b32.xlu0 %v2395_v29, %s7206_s0  ;;  %2575 = vrot.lane.b32.xlu1 %v2398_v59, %s7205_s6 }
 0x281   :  { %2585 = vrot.lane.b32.xlu0 %v2395_v29, %s7209_s21  ;;  %2581 = vrot.lane.b32.xlu1 %v2398_v59, %s7206_s0 }
 0x285   :  { %2591 = vrot.lane.b32.xlu0 %v2395_v29, %s7210_s23  ;;  %2587 = vrot.lane.b32.xlu1 %v2398_v59, %s7209_s21 }
 0x289   :  { %1955 = vperm.xlu0 %6916, %v1952_v34   ;;  %2593 = vrot.lane.b32.xlu1 %v2398_v59, %s7210_s23 }
 0x28f   :  { %v8353_v23 = vpop.f32.mrf.mxu1 }
 0x291   :  { %v6740_v0 = vpop.f32.mrf.mxu1 }
 0x293   :  { %v8355_v52 = vpop.f32.mrf.mxu1 }
 0x295   :  { %v6741_v37 = vpop.f32.mrf.mxu1 }
 0x2d7   :  { %v2556_v11 = vpop.permute.xlu0 %2555 }
 0x2db   :  { %v2562_v48 = vpop.permute.xlu0 %2561  ;;  %v2558_v20 = vpop.permute.xlu1 %2557 }
 0x2dc   :  { %v2597_v61 = vcombine.low %v2395_v29, %v2562_v48  ;;  %v2598_v50 = vcombine.high %v2395_v29, %v2562_v48 }
 0x2de   :  { %v2605_v63 = vrot.slane %v2597_v61, %v8265_v7  ;;  %v2612_v44 = vrot.slane %v2598_v50, %v8265_v7 }
 0x2df   :  { %v2568_v47 = vpop.permute.xlu0 %2567  ;;  %v2564_v62 = vpop.permute.xlu1 %2563 }
 0x2e0   :  { %v2613_v35 = vcombine.low %v2556_v11, %v2568_v47  ;;  %v2614_v45 = vcombine.high %v2556_v11, %v2568_v47  ;;  %v2733_v26 = vcombine.low %v2398_v59, %v2564_v62  ;;  %v2734_v42 = vcombine.high %v2398_v59, %v2564_v62 }
 0x2e2   :  { %v2621_v38 = vrot.slane %v2613_v35, %v8265_v7  ;;  %v2628_v22 = vrot.slane %v2614_v45, %v8265_v7  ;;  %v2741_v4 = vrot.slane %v2733_v26, %v8265_v7  ;;  %v2748_v8 = vrot.slane %v2734_v42, %v8265_v7 }
 0x2e3   :  { %v3182_v12 = vpop.permute.xlu0 %3181  ;;  %v2570_v58 = vpop.permute.xlu1 %2569 }
 0x2e4   :  { %v2661_v36 = vcombine.low %v2605_v63, %v2621_v38  ;;  %v2662_v55 = vcombine.high %v2605_v63, %v2621_v38  ;;  %v2677_v9 = vcombine.low %v2612_v44, %v2628_v22  ;;  %v2678_v6 = vcombine.high %v2612_v44, %v2628_v22 }
 0x2e5   :  { %v2749_v46 = vcombine.low %v2558_v20, %v2570_v58  ;;  %v2750_v51 = vcombine.high %v2558_v20, %v2570_v58  ;;  %v3225_v19 = vcombine.low %v8261_v27, %v3182_v12  ;;  %v3226_v21 = vcombine.high %v8261_v27, %v3182_v12 }
 0x2e6   :  { %v2669_v30 = vrot.slane %v2661_v36, %v8276_v16  ;;  %v2676_v31 = vrot.slane %v2662_v55, %v8276_v16  ;;  %v2685_v2 = vrot.slane %v2677_v9, %v8276_v16  ;;  %v2692_v32 = vrot.slane %v2678_v6, %v8276_v16 }
 0x2e7   :  { %v2757_v41 = vrot.slane %v2749_v46, %v8265_v7  ;;  %v2764_v33 = vrot.slane %v2750_v51, %v8265_v7  ;;  %v3188_v18 = vpop.permute.xlu0 %3187  ;;  %v3184_v3 = vpop.permute.xlu1 %3183  ;;  %v8383_v27 = vsel %vm4341_vm1, %v8320_v24, 0  ;;  %v3233_v24 = vrot.slane %v3225_v19, %v8265_v7 }
 0x2e8   :  { %v6568_v54 = vcombine.low %v2669_v30, %v2676_v31  ;;  %v6570_v60 = vcombine.high %v2669_v30, %v2676_v31  ;;  %v6572_v5 = vcombine.low %v2685_v2, %v2692_v32  ;;  %v6574_v15 = vcombine.high %v2685_v2, %v2692_v32 }
 0x2e9   :  { %v2797_v43 = vcombine.low %v2741_v4, %v2757_v41  ;;  %v2798_v14 = vcombine.high %v2741_v4, %v2757_v41  ;;  %v2813_v39 = vcombine.low %v2748_v8, %v2764_v33  ;;  %v2814_v28 = vcombine.high %v2748_v8, %v2764_v33 }
 0x2ea   :  { %v8376_v29 = vrot.slane %v6568_v54, %v8265_v7  ;;  %v8379_v40 = vrot.slane %v6570_v60, %v8265_v7  ;;  %v8392_v11 = vrot.slane %v6572_v5, %v8265_v7  ;;  %v8395_v48 = vrot.slane %v6574_v15, %v8265_v7 }
 0x2eb   :  { %v2805_v53 = vrot.slane %v2797_v43, %v8276_v16  ;;  %v2812_v59 = vrot.slane %v2798_v14, %v8276_v16  ;;  %v2821_v56 = vrot.slane %v2813_v39, %v8276_v16  ;;  %v2828_v34 = vrot.slane %v2814_v28, %v8276_v16  ;;  %v8389_v0 = vpop.permute.xlu0 %2573  ;;  %v3190_v37 = vpop.permute.xlu1 %3189 }
 0x2ec   :  { %v3240_v20 = vrot.slane %v3226_v21, %v8265_v7  ;;  %v3241_v35 = vcombine.low %v8269_v17, %v3188_v18  ;;  %v3242_v45 = vcombine.high %v8269_v17, %v3188_v18  ;;  %v3361_v26 = vcombine.low %v8357_v25, %v3184_v3 }
 0x2ed   :  { %v6576_v61 = vcombine.low %v2805_v53, %v2812_v59  ;;  %v6578_v50 = vcombine.high %v2805_v53, %v2812_v59  ;;  %v6580_v47 = vcombine.low %v2821_v56, %v2828_v34  ;;  %v6582_v62 = vcombine.high %v2821_v56, %v2828_v34 }
 0x2ee   :  { %v3362_v42 = vcombine.high %v8357_v25, %v3184_v3  ;;  %v2933_v63 = vcombine.low %v8376_v29, %v8379_v40  ;;  %v2934_v44 = vcombine.high %v8376_v29, %v8379_v40  ;;  %v3249_v36 = vrot.slane %v3241_v35, %v8265_v7 }
 0x2ef   :  { %v8408_v38 = vrot.slane %v6576_v61, %v8265_v7  ;;  %v8411_v22 = vrot.slane %v6578_v50, %v8265_v7  ;;  %v2580_v12 = vpop.permute.xlu0 %2579  ;;  %v8413_v58 = vpop.permute.xlu1 %2575  ;;  %v8416_v17 = vrot.slane %v6580_v47, %v8265_v7  ;;  %v8419_v25 = vrot.slane %v6582_v62, %v8265_v7 }
 0x2f0   :  { %v3256_v55 = vrot.slane %v3242_v45, %v8265_v7  ;;  %v2965_v9 = vcombine.low %v8392_v11, %v8395_v48  ;;  %v2966_v6 = vcombine.high %v8392_v11, %v8395_v48  ;;  %v3369_v4 = vrot.slane %v3361_v26, %v8265_v7 }
 0x2f1   :  { %v3376_v8 = vrot.slane %v3362_v42, %v8265_v7  ;;  %v3289_v46 = vcombine.low %v3233_v24, %v3249_v36  ;;  %v3290_v51 = vcombine.high %v3233_v24, %v3249_v36  ;;  %v3069_v2 = vcombine.low %v8408_v38, %v8411_v22 }
 0x2f2   :  { %v3305_v30 = vcombine.low %v3240_v20, %v3256_v55  ;;  %v3306_v31 = vcombine.high %v3240_v20, %v3256_v55  ;;  %v3070_v32 = vcombine.high %v8408_v38, %v8411_v22  ;;  %v3377_v19 = vcombine.low %v8359_v49, %v3190_v37 }
 0x2f3   :  { %v3378_v21 = vcombine.high %v8359_v49, %v3190_v37  ;;  %v2586_v41 = vpop.permute.xlu0 %2585  ;;  %v8435_v33 = vpop.permute.xlu1 %2581  ;;  %v3101_v18 = vcombine.low %v8416_v17, %v8419_v25  ;;  %v3102_v3 = vcombine.high %v8416_v17, %v8419_v25  ;;  %v8442_v54 = vrot.slane %v3289_v46, %v8276_v16 }
 0x2f4   :  { %v8445_v60 = vrot.slane %v3290_v51, %v8276_v16  ;;  %v3385_v5 = vrot.slane %v3377_v19, %v8265_v7  ;;  %v8450_v49 = vrot.slane %v2933_v63, %v8276_v16  ;;  %v8453_v43 = vrot.slane %v2965_v9, %v8276_v16 }
 0x2f5   :  { %v3392_v15 = vrot.slane %v3378_v21, %v8265_v7  ;;  %v8456_v14 = vrot.slane %v3305_v30, %v8276_v16  ;;  %v8459_v39 = vrot.slane %v3306_v31, %v8276_v16  ;;  %v2629_v28 = vcombine.low %v8389_v0, %v2586_v41 }
 0x2f6   :  { %v2630_v53 = vcombine.high %v8389_v0, %v2586_v41  ;;  %v3425_v59 = vcombine.low %v3369_v4, %v3385_v5  ;;  %v3426_v56 = vcombine.high %v3369_v4, %v3385_v5  ;;  %v6585_v48 = vcombine.low %v8442_v54, %v8445_v60 }
 0x2f7   :  { %v3441_v34 = vcombine.low %v3376_v8, %v3392_v15  ;;  %v3442_v37 = vcombine.high %v3376_v8, %v3392_v15  ;;  %v2592_v11 = vpop.permute.xlu0 %2591  ;;  %v6587_v24 = vcombine.high %v8442_v54, %v8445_v60  ;;  %v2588_v50 = vpop.permute.xlu1 %2587  ;;  %v2637_v45 = vrot.slane %v2629_v28, %v8265_v7 }
 0x2f8   :  { %v2645_v20 = vcombine.low %v2580_v12, %v2592_v11  ;;  %v2646_v61 = vcombine.high %v2580_v12, %v2592_v11  ;;  %v8468_v47 = vrot.slane %v3425_v59, %v8276_v16  ;;  %v8471_v62 = vrot.slane %v3426_v56, %v8276_v16 }
 0x2f9   :  { %v8474_v0 = vrot.slane %v3441_v34, %v8276_v16  ;;  %v8477_v35 = vrot.slane %v3442_v37, %v8276_v16  ;;  %v2644_v26 = vrot.slane %v2630_v53, %v8265_v7  ;;  %v6589_v38 = vcombine.low %v8456_v14, %v8459_v39 }
 0x2fa   :  { %v2653_v42 = vrot.slane %v2645_v20, %v8265_v7  ;;  %v2660_v63 = vrot.slane %v2646_v61, %v8265_v7  ;;  %v6591_v22 = vcombine.high %v8456_v14, %v8459_v39  ;;  %v2765_v12 = vcombine.low %v8413_v58, %v2588_v50 }
 0x2fb   :  { %v2766_v17 = vcombine.high %v8413_v58, %v2588_v50  ;;  %v6593_v4 = vcombine.low %v8468_v47, %v8471_v62  ;;  %v6595_v8 = vcombine.high %v8468_v47, %v8471_v62  ;;  %v6597_v46 = vcombine.low %v8474_v0, %v8477_v35  ;;  %v2594_v21 = vpop.permute.xlu1 %2593 }
 0x2fc   :  { %v2693_v25 = vcombine.low %v2637_v45, %v2653_v42  ;;  %v2694_v36 = vcombine.high %v2637_v45, %v2653_v42  ;;  %v2709_v55 = vcombine.low %v2644_v26, %v2660_v63  ;;  %v2710_v9 = vcombine.high %v2644_v26, %v2660_v63 }
 0x2fd   :  { %v3077_v51 = vrot.slane %v3069_v2, %v8276_v16  ;;  %v3109_v41 = vrot.slane %v3101_v18, %v8276_v16  ;;  %v8505_v5 = vrot.slane %v2934_v44, %v8276_v16  ;;  %v8508_v15 = vrot.slane %v2966_v6, %v8276_v16 }
 0x2fe   :  { %v2701_v30 = vrot.slane %v2693_v25, %v8276_v16  ;;  %v2708_v31 = vrot.slane %v2694_v36, %v8276_v16  ;;  %v2717_v58 = vrot.slane %v2709_v55, %v8276_v16  ;;  %v2724_v19 = vrot.slane %v2710_v9, %v8276_v16 }
 0x2ff   :  { %v8511_v2 = vrot.slane %v3070_v32, %v8276_v16  ;;  %v2997_v59 = vcombine.low %v8450_v49, %v8453_v43  ;;  %v3133_v18 = vcombine.low %v3077_v51, %v3109_v41  ;;  %v8516_v56 = vrot.slane %v3102_v3, %v8276_v16 }
 0x300   :  { %v6569_v14 = vcombine.low %v2701_v30, %v2708_v31  ;;  %v6571_v39 = vcombine.high %v2701_v30, %v2708_v31  ;;  %v6573_v28 = vcombine.low %v2717_v58, %v2724_v19  ;;  %v6575_v53 = vcombine.high %v2717_v58, %v2724_v19 }
 0x301   :  { %v2781_v29 = vcombine.low %v8435_v33, %v2594_v21  ;;  %v6599_v40 = vcombine.high %v8474_v0, %v8477_v35  ;;  %v2773_v44 = vrot.slane %v2765_v12, %v8265_v7  ;;  %v2780_v6 = vrot.slane %v2766_v17, %v8265_v7 }
 0x302   :  { %v3000_v32 = vcombine.high %v8505_v5, %v8508_v15  ;;  %v3141_v34 = vpack.c.bf16 %v3133_v18, %v2997_v59  ;;  %v3136_v37 = vcombine.high %v8511_v2, %v8516_v56  ;;  %v2782_v11 = vcombine.high %v8435_v33, %v2594_v21 }
 0x303   :  { %v2789_v3 = vrot.slane %v2781_v29, %v8265_v7  ;;  %v8530_v20 = vrot.slane %v6569_v14, %v8265_v7  ;;  %v8533_v61 = vrot.slane %v6571_v39, %v8265_v7  ;;  %v8536_v50 = vrot.slane %v6573_v28, %v8265_v7 }
 0x304   :  { %v8539_v47 = vrot.slane %v6575_v53, %v8265_v7  ;;  %6745 = vmatmul.mubr.msk.bf16.vlgmr.msra.gmra.mxu0 %vm4341_vm1, %v3141_v34  ;;  %v3144_v62 = vpack.c.bf16 %v3136_v37, %v3000_v32  ;;  %v2796_v45 = vrot.slane %v2782_v11, %v8265_v7  ;;  %v2998_v42 = vcombine.high %v8450_v49, %v8453_v43 }
 0x305   :  { %v2829_v33 = vcombine.low %v2773_v44, %v2789_v3  ;;  %v2830_v26 = vcombine.high %v2773_v44, %v2789_v3  ;;  %6749 = vmatpush3.bf16.xpose.msra.mxu0 %v8383_v27  ;;  %6750 = vmatprep.mubr.msk.bf16.mxu0 %vm9403_vm13, %v7193_v1  ;;  %v3134_v63 = vcombine.high %v3077_v51, %v3109_v41  ;;  %v1956_v41 = vpop.permute.xlu0 %1955  ;;  %v4440_v39 = vsel %vm4341_vm1, %v8322_v57, 0 }
 0x306   :  { %v8552_v12 = vrot.slane %v6585_v48, %v8265_v7  ;;  %6763 = vmatmul.mubr.msk.bf16.vlgmr.msra.gmra.mxu1 %vm4341_vm1, %v3144_v62  ;;  %v2845_v27 = vcombine.low %v2780_v6, %v2796_v45  ;;  %v2846_v36 = vcombine.high %v2780_v6, %v2796_v45  ;;  %6754 = vmatprep.subr.bf16.mxu0 %v7193_v1 }
 0x307   :  { %v2837_v17 = vrot.slane %v2829_v33, %v8276_v16  ;;  %v2844_v25 = vrot.slane %v2830_v26, %v8276_v16  ;;  %v3142_v55 = vpack.c.bf16 %v3134_v63, %v2998_v42  ;;  %v8562_v49 = vrot.slane %v6587_v24, %v8265_v7  ;;  %6774 = vmatprep.mubr.msk.bf16.mxu1 %vm9403_vm13, %v7193_v1 }
 0x308   :  { %v8565_v43 = vrot.slane %v6589_v38, %v8265_v7  ;;  %v8568_v48 = vrot.slane %v6591_v22, %v8265_v7  ;;  %v2853_v9 = vrot.slane %v2845_v27, %v8276_v16  ;;  %v2860_v51 = vrot.slane %v2846_v36, %v8276_v16 }
 0x309   :  { %v6577_v30 = vcombine.low %v2837_v17, %v2844_v25  ;;  %v6579_v31 = vcombine.high %v2837_v17, %v2844_v25  ;;  %v3545_v54 = vcombine.low %v8552_v12, %v8562_v49  ;;  %v8579_v24 = vrot.slane %v6593_v4, %v8265_v7 }
 0x30a   :  { %v3577_v60 = vcombine.low %v8565_v43, %v8568_v48  ;;  %v8582_v38 = vrot.slane %v6595_v8, %v8265_v7  ;;  %v6581_v19 = vcombine.low %v2853_v9, %v2860_v51  ;;  %v6583_v21 = vcombine.high %v2853_v9, %v2860_v51 }
 0x30b   :  { %v8585_v22 = vrot.slane %v6577_v30, %v8265_v7  ;;  %v8588_v58 = vrot.slane %v6579_v31, %v8265_v7  ;;  %v2949_v14 = vcombine.low %v8530_v20, %v8533_v61  ;;  %v3648_v4 = vrot.slane %v6597_v46, %v8265_v7 }
 0x30c   :  { %v3664_v8 = vrot.slane %v6599_v40, %v8265_v7  ;;  %v8600_v28 = vrot.slane %v6581_v19, %v8265_v7  ;;  %v8603_v53 = vrot.slane %v6583_v21, %v8265_v7  ;;  %6751 = vmatmul.mubr.msk.bf16.vlgmr.msra.gmra.mxu0 %vm4341_vm1, %v3142_v55  ;;  %v3553_v59 = vrot.slane %v3545_v54, %v8276_v16 }
 0x30d   :  { %v3585_v18 = vrot.slane %v3577_v60, %v8276_v16  ;;  %v2950_v57 = vcombine.high %v8530_v20, %v8533_v61  ;;  %6755 = vmatpush3.bf16.xpose.msra.mxu0 %v4440_v39  ;;  %v3681_v0 = vcombine.low %v8579_v24, %v8582_v38  ;;  %v1997_v46 = vadd.f32 %v8324_v10, %v1956_v41 }
 0x30e   :  { %v3713_v35 = vcombine.low %v3648_v4, %v3664_v8  ;;  %v2981_v29 = vcombine.low %v8536_v50, %v8539_v47  ;;  %v3085_v40 = vcombine.low %v8585_v22, %v8588_v58  ;;  %v3117_v44 = vcombine.low %v8600_v28, %v8603_v53  ;;  %6756 = vmatprep.mubr.msk.bf16.mxu0 %vm9403_vm13, %v7193_v1 }
 0x30f   :  { %6766 = vmatprep.subr.bf16.mxu0 %v7193_v1  ;;  %v3086_v6 = vcombine.high %v8585_v22, %v8588_v58  ;;  %v3689_v32 = vrot.slane %v3681_v0, %v8276_v16  ;;  %v2003_v34 = vmax.f32 %v1997_v46, 1e-06  ;;  %v3598_v37 = vcombine.high %v3553_v59, %v3585_v18 }
 0x310   :  { %v3721_v10 = vrot.slane %v3713_v35, %v8276_v16  ;;  %v2999_v11 = vcombine.low %v8505_v5, %v8508_v15  ;;  %v3135_v3 = vcombine.low %v8511_v2, %v8516_v56  ;;  %v3597_v62 = vcombine.low %v3553_v59, %v3585_v18 }
 0x311   :  { %6957 = vlog2.f32 %v2003_v34  ;;  %v2957_v26 = vrot.slane %v2949_v14, %v8276_v16  ;;  %v2989_v63 = vrot.slane %v2981_v29, %v8276_v16  ;;  %v3093_v17 = vrot.slane %v3085_v40, %v8276_v16 }
 0x312   :  { %v3734_v45 = vcombine.high %v3689_v32, %v3721_v10  ;;  %v3733_v33 = vcombine.low %v3689_v32, %v3721_v10  ;;  %v3143_v42 = vpack.c.bf16 %v3135_v3, %v2999_v11  ;;  %v3125_v25 = vrot.slane %v3117_v44, %v8276_v16 }
 0x313   :  { %v3118_v27 = vcombine.high %v8600_v28, %v8603_v53  ;;  %v1999_v15 = vadd.f32 %v8326_v13, %v1956_v41  ;;  %v3546_v55 = vcombine.high %v8552_v12, %v8562_v49  ;;  %v3578_v9 = vcombine.high %v8565_v43, %v8568_v48 }
 0x314   :  { %v3742_v5 = vpack.c.bf16 %v3734_v45, %v3598_v37  ;;  %v3741_v2 = vpack.c.bf16 %v3733_v33, %v3597_v62  ;;  %6757 = vmatmul.mubr.msk.bf16.vlgmr.msra.gmra.mxu0 %vm4341_vm1, %v3143_v42  ;;  %v3137_v56 = vcombine.low %v3093_v17, %v3125_v25  ;;  %v3138_v36 = vcombine.high %v3093_v17, %v3125_v25 }
 0x315   :  { %6768 = vmatprep.mubr.msk.bf16.mxu0 %vm9403_vm13, %v7193_v1  ;;  %v3682_v13 = vcombine.high %v8579_v24, %v8582_v38  ;;  %v3714_v31 = vcombine.high %v3648_v4, %v3664_v8  ;;  %v3001_v54 = vcombine.low %v2957_v26, %v2989_v63  ;;  %v3002_v60 = vcombine.high %v2957_v26, %v2989_v63 }
 0x316   :  { %v4581_v51 = vsel %vm4341_vm1, %v3742_v5, 0  ;;  %v4534_v30 = vsel %vm4341_vm1, %v3741_v2, 0  ;;  %v3560_v12 = vrot.slane %v3546_v55, %v8276_v16  ;;  %v3592_v49 = vrot.slane %v3578_v9, %v8276_v16 }
 0x317   :  { %6773 = vmatpush3.bf16.xpose.msra.mxu1 %v4581_v51  ;;  %6767 = vmatpush3.bf16.xpose.msra.mxu0 %v4534_v30  ;;  %v3696_v43 = vrot.slane %v3682_v13, %v8276_v16  ;;  %v3728_v48 = vrot.slane %v3714_v31, %v8276_v16  ;;  %v2982_v24 = vcombine.high %v8536_v50, %v8539_v47  ;;  %v2004_v38 = vmax.f32 %v1999_v15, 1e-06 }
 0x318   :  { %6778 = vmatprep.subr.bf16.mxu0 %v7193_v1  ;;  %6784 = vmatprep.subr.bf16.mxu1 %v7193_v1  ;;  %v3145_v22 = vpack.c.bf16 %v3137_v56, %v3001_v54  ;;  %v3146_v58 = vpack.c.bf16 %v3138_v36, %v3002_v60  ;;  %v3599_v19 = vcombine.low %v3560_v12, %v3592_v49 }
 0x319   :  { %v3735_v21 = vcombine.low %v3696_v43, %v3728_v48  ;;  %v3600_v41 = vcombine.high %v3560_v12, %v3592_v49  ;;  %v3736_v14 = vcombine.high %v3696_v43, %v3728_v48  ;;  %v3100_v8 = vrot.slane %v3086_v6, %v8276_v16  ;;  %v6566_v6 = vld [vmem:[%s9360_s10] ss:$0 sm:$0xff]  ;;  %s7215_s10 = smov 24  }
 0x31a   :  { %v3132_v28 = vrot.slane %v3118_v27, %v8276_v16  ;;  %6959 = vlog2.f32 %v2004_v38  ;;  %v2964_v53 = vrot.slane %v2950_v57, %v8276_v16  ;;  %v2996_v59 = vrot.slane %v2982_v24, %v8276_v16 }
 0x31b   :  { %v3743_v39 = vpack.c.bf16 %v3735_v21, %v3599_v19  ;;  %v3744_v4 = vpack.c.bf16 %v3736_v14, %v3600_v41  ;;  %v8709_v32 = vadd.f32 %v6566_v6, %v8353_v23  ;;  %v8716_v10 = vadd.f32 %v6566_v6, %v8355_v52 }
 0x31c   :  { %v3139_v35 = vcombine.low %v3100_v8, %v3132_v28  ;;  %v3140_v46 = vcombine.high %v3100_v8, %v3132_v28  ;;  %v3003_v20 = vcombine.low %v2964_v53, %v2996_v59  ;;  %v3004_v61 = vcombine.high %v2964_v53, %v2996_v59 }
 0x31d   :  { %v4628_v50 = vsel %vm4341_vm1, %v3743_v39, 0  ;;  %v4675_v47 = vsel %vm4341_vm1, %v3744_v4, 0 }
 0x31e   :  { %6769 = vmatmul.mubr.msk.bf16.vlgmr.msra.gmra.mxu0 %vm4341_vm1, %v3145_v22  ;;  %6775 = vmatmul.mubr.msk.bf16.vlgmr.msra.gmra.mxu1 %vm4341_vm1, %v3146_v58  ;;  %v6958_v18 = vpop.eup %6957  ;;  %v3147_v57 = vpack.c.bf16 %v3139_v35, %v3003_v20  ;;  %v3148_v29 = vpack.c.bf16 %v3140_v46, %v3004_v61 }
 0x31f   :  { %6779 = vmatpush3.bf16.xpose.msra.mxu0 %v4628_v50  ;;  %6785 = vmatpush3.bf16.xpose.msra.mxu1 %v4675_v47  ;;  %v8667_v0 = vmul.f32 0.6931472, %v6958_v18 }
 0x320   :  { %6780 = vmatprep.mubr.msk.bf16.mxu0 %vm9403_vm13, %v7193_v1  ;;  %6786 = vmatprep.mubr.msk.bf16.mxu1 %vm9403_vm13, %v7193_v1 }
 0x321   :  { %6790 = vmatprep.subr.bf16.mxu0 %v7193_v1  ;;  %6796 = vmatprep.subr.bf16.mxu1 %v7193_v1 }
 0x322   :  { %2016 = vrot.lane.b32.xlu0 %v8667_v0, %s7209_s21  ;;  %2010 = vrot.lane.b32.xlu1 %v8667_v0, %s7202_s28 }
 0x326   :  { %6781 = vmatmul.mubr.msk.bf16.vlgmr.msra.gmra.mxu0 %vm4341_vm1, %v3147_v57  ;;  %6787 = vmatmul.mubr.msk.bf16.vlgmr.msra.gmra.mxu1 %vm4341_vm1, %v3148_v29 }
 0x327   :  { %2022 = vrot.lane.b32.xlu0 %v8667_v0, %s7211_s14  ;;  %2013 = vrot.lane.b32.xlu1 %v8667_v0, %s7205_s6  ;;  %v6960_v40 = vpop.eup %6959 }
 0x328   :  { %6792 = vmatprep.mubr.msk.bf16.mxu0 %vm9403_vm13, %v7193_v1  ;;  %6798 = vmatprep.mubr.msk.bf16.mxu1 %vm9403_vm13, %v7193_v1  ;;  %v8692_v44 = vmul.f32 0.6931472, %v6960_v40 }
 0x32b   :  { %2028 = vrot.lane.b32.xlu0 %v8667_v0, %s7212_s25  ;;  %2019 = vrot.lane.b32.xlu1 %v8667_v0, %s7213_s3 }
 0x32f   :  { %2035 = vrot.lane.b32.xlu0 %v8692_v44, %s7205_s6  ;;  %2025 = vrot.lane.b32.xlu1 %v8667_v0, %s7214_s26 }
 0x333   :  { %2041 = vrot.lane.b32.xlu0 %v8692_v44, %s7213_s3  ;;  %2032 = vrot.lane.b32.xlu1 %v8692_v44, %s7202_s28 }
 0x337   :  { %2047 = vrot.lane.b32.xlu0 %v8692_v44, %s7214_s26  ;;  %2038 = vrot.lane.b32.xlu1 %v8692_v44, %s7209_s21 }
 0x33b   :  { %2044 = vrot.lane.b32.xlu1 %v8692_v44, %s7211_s14  ;;  %3759 = vrot.lane.b32.xlu0 %v8709_v32, %s7204_s8 }
 0x33f   :  { %2050 = vrot.lane.b32.xlu1 %v8692_v44, %s7212_s25  ;;  %3749 = vrot.lane.b32.xlu0 %v8716_v10, %s7203_s5 }
 0x343   :  { %3747 = vrot.lane.b32.xlu1 %v8709_v32, %s7203_s5  ;;  %s7217_s5 = smov 56  }
 0x347   :  { %3753 = vrot.lane.b32.xlu1 %v8709_v32, %s7202_s28 }
 0x34b   :  { %3755 = vrot.lane.b32.xlu1 %v8716_v10, %s7202_s28  ;;  %s7216_s28 = smov 40  }
 0x34f   :  { %3761 = vrot.lane.b32.xlu1 %v8716_v10, %s7204_s8 }
 0x394   :  { %v8730_v23 = vpop.permute.xlu0 %2016  ;;  %v8732_v52 = vpop.permute.xlu1 %2010 }
 0x395   :  { %v2069_v2 = vcombine.low %v8732_v52, %v8730_v23 }
 0x397   :  { %v2077_v30 = vrot.slane %v2069_v2, %v8265_v7 }
 0x399   :  { %v8734_v34 = vpop.permute.xlu0 %2022  ;;  %v8736_v37 = vpop.permute.xlu1 %2013 }
 0x39a   :  { %v2053_v5 = vcombine.low %v8667_v0, %v8736_v37 }
 0x39c   :  { %v2061_v9 = vrot.slane %v2053_v5, %v8265_v7 }
 0x39d   :  { %v8738_v11 = vpop.permute.xlu1 %2019  ;;  %v8740_v3 = vpop.permute.xlu0 %2028 }
 0x39e   :  { %v2101_v25 = vcombine.low %v8734_v34, %v8740_v3  ;;  %v2117_v49 = vcombine.low %v2061_v9, %v2077_v30  ;;  %v2118_v43 = vcombine.high %v2061_v9, %v2077_v30 }
 0x3a0   :  { %v2109_v36 = vrot.slane %v2101_v25, %v8265_v7  ;;  %v8794_v59 = vrot.slane %v2117_v49, %v8276_v16  ;;  %v8797_v18 = vrot.slane %v2118_v43, %v8276_v16 }
 0x3a1   :  { %v8742_v62 = vpop.permute.xlu1 %2025  ;;  %v8744_v45 = vpop.permute.xlu0 %2035 }
 0x3a2   :  { %v2085_v17 = vcombine.low %v8738_v11, %v8742_v62  ;;  %v2189_v48 = vcombine.low %v8692_v44, %v8744_v45 }
 0x3a4   :  { %v2093_v56 = vrot.slane %v2085_v17, %v8265_v7  ;;  %v2197_v50 = vrot.slane %v2189_v48, %v8265_v7 }
 0x3a5   :  { %v8746_v33 = vpop.permute.xlu1 %2032  ;;  %v8750_v42 = vpop.permute.xlu0 %2041 }
 0x3a6   :  { %v2149_v13 = vcombine.low %v2093_v56, %v2109_v36  ;;  %v2150_v31 = vcombine.high %v2093_v56, %v2109_v36 }
 0x3a8   :  { %v8784_v39 = vrot.slane %v2149_v13, %v8276_v16  ;;  %v8787_v4 = vrot.slane %v2150_v31, %v8276_v16 }
 0x3a9   :  { %v8748_v26 = vpop.permute.xlu1 %2038  ;;  %v8758_v27 = vpop.permute.xlu0 %2047 }
 0x3aa   :  { %v2205_v54 = vcombine.low %v8746_v33, %v8748_v26  ;;  %v2221_v41 = vcombine.low %v8750_v42, %v8758_v27  ;;  %v2181_v40 = vcombine.low %v8794_v59, %v8784_v39  ;;  %v2184_v6 = vcombine.high %v8797_v18, %v8787_v4 }
 0x3ac   :  { %v2213_v14 = vrot.slane %v2205_v54, %v8265_v7  ;;  %v2229_v57 = vrot.slane %v2221_v41, %v8265_v7 }
 0x3ad   :  { %v8752_v63 = vpop.permute.xlu1 %2044  ;;  %v3760_v55 = vpop.permute.xlu0 %3759 }
 0x3ae   :  { %v2253_v29 = vcombine.low %v2197_v50, %v2213_v14  ;;  %v2254_v36 = vcombine.high %v2197_v50, %v2213_v14 }
 0x3b0   :  { %v8811_v48 = vrot.slane %v2253_v29, %v8276_v16 }
 0x3b1   :  { %v8762_v15 = vpop.permute.xlu1 %2050  ;;  %v3750_v56 = vpop.permute.xlu0 %3749 }
 0x3b2   :  { %v2237_v24 = vcombine.low %v8752_v63, %v8762_v15 }
 0x3b4   :  { %v2245_v47 = vrot.slane %v2237_v24, %v8265_v7 }
 0x3b5   :  { %v3748_v51 = vpop.permute.xlu1 %3747 }
 0x3b6   :  { %v3805_v60 = vcombine.low %v3748_v51, %v3760_v55  ;;  %v3806_v12 = vcombine.high %v3748_v51, %v3760_v55  ;;  %v2285_v55 = vcombine.low %v2229_v57, %v2245_v47 }
 0x3b8   :  { %v3813_v22 = vrot.slane %v3805_v60, %v8265_v7  ;;  %v3820_v58 = vrot.slane %v3806_v12, %v8265_v7  ;;  %v2286_v12 = vcombine.high %v2229_v57, %v2245_v47  ;;  %v8830_v50 = vrot.slane %v2285_v55, %v8276_v16 }
 0x3b9   :  { %v3754_v38 = vpop.permute.xlu1 %3753  ;;  %v8833_v47 = vrot.slane %v2254_v36, %v8276_v16 }
 0x3ba   :  { %v3789_v19 = vcombine.low %v8709_v32, %v3754_v38  ;;  %v3790_v21 = vcombine.high %v8709_v32, %v3754_v38 }
 0x3bc   :  { %v3797_v8 = vrot.slane %v3789_v19, %v8265_v7  ;;  %v3804_v28 = vrot.slane %v3790_v21, %v8265_v7 }
 0x3bd   :  { %v3756_v53 = vpop.permute.xlu1 %3755 }
 0x3be   :  { %v3853_v35 = vcombine.low %v3797_v8, %v3813_v22  ;;  %v3854_v46 = vcombine.high %v3797_v8, %v3813_v22  ;;  %v3869_v20 = vcombine.low %v3804_v28, %v3820_v58  ;;  %v3870_v61 = vcombine.high %v3804_v28, %v3820_v58 }
 0x3bf   :  { %v3925_v9 = vcombine.low %v8716_v10, %v3756_v53  ;;  %v3926_v51 = vcombine.high %v8716_v10, %v3756_v53 }
 0x3c0   :  { %v3861_v17 = vrot.slane %v3853_v35, %v8276_v16  ;;  %v3868_v25 = vrot.slane %v3854_v46, %v8276_v16  ;;  %v3877_v5 = vrot.slane %v3869_v20, %v8276_v16  ;;  %v3884_v2 = vrot.slane %v3870_v61, %v8276_v16 }
 0x3c1   :  { %v3762_v30 = vpop.permute.xlu1 %3761  ;;  %v3933_v19 = vrot.slane %v3925_v9, %v8265_v7  ;;  %v3940_v21 = vrot.slane %v3926_v51, %v8265_v7 }
 0x3c2   :  { %v6600_v13 = vcombine.low %v3861_v17, %v3868_v25  ;;  %v6602_v31 = vcombine.high %v3861_v17, %v3868_v25  ;;  %v6604_v54 = vcombine.low %v3877_v5, %v3884_v2  ;;  %v6606_v60 = vcombine.high %v3877_v5, %v3884_v2 }
 0x3c3   :  { %v3941_v49 = vcombine.low %v3750_v56, %v3762_v30  ;;  %v3942_v43 = vcombine.high %v3750_v56, %v3762_v30  ;;  %v8840_v5 = vrot.slane %v2286_v12, %v8276_v16 }
 0x3c4   :  { %v8814_v24 = vrot.slane %v6600_v13, %v8265_v7  ;;  %v8817_v38 = vrot.slane %v6602_v31, %v8265_v7  ;;  %v8820_v22 = vrot.slane %v6604_v54, %v8265_v7  ;;  %v8823_v58 = vrot.slane %v6606_v60, %v8265_v7  ;;  %v4382_v8 = vpop.f32.mrf.mxu0 }
 0x3c5   :  { %v3949_v41 = vrot.slane %v3941_v49, %v8265_v7  ;;  %v3956_v14 = vrot.slane %v3942_v43, %v8265_v7  ;;  %v4718_v28 = vmul.f32 0.35355338, %v4382_v8  ;;  %v2317_v54 = vcombine.low %v8811_v48, %v8830_v50 }
 0x3c6   :  { %v4126_v53 = vcombine.high %v8814_v24, %v8817_v38  ;;  %v4523_v57 = vpop.f32.mrf.mxu1  ;;  %v6746_v29 = vpop.f32.mrf.mxu0  ;;  %v4158_v2 = vcombine.high %v8820_v22, %v8823_v58 }
 0x3c7   :  { %v3989_v35 = vcombine.low %v3933_v19, %v3949_v41  ;;  %v3990_v46 = vcombine.high %v3933_v19, %v3949_v41  ;;  %v4005_v20 = vcombine.low %v3940_v21, %v3956_v14  ;;  %v4006_v61 = vcombine.high %v3940_v21, %v3956_v14 }
 0x3c8   :  { %v4724_v17 = vmul.f32 0.35355338, %v4523_v57  ;;  %v8837_v25 = vadd.f32 %v4718_v28, %v2181_v40  ;;  %v6764_v51 = vpop.f32.mrf.mxu1  ;;  %v4385_v30 = vpop.f32.mrf.mxu0 }
 0x3c9   :  { %v3997_v56 = vrot.slane %v3989_v35, %v8276_v16  ;;  %v4004_v36 = vrot.slane %v3990_v46, %v8276_v16  ;;  %v4013_v55 = vrot.slane %v4005_v20, %v8276_v16  ;;  %v4020_v9 = vrot.slane %v4006_v61, %v8276_v16 }
 0x3ca   :  { %v4719_v13 = vmul.f32 0.35355338, %v4385_v30  ;;  %v4751_v40 = vsel %vm4750_vm5, %v8837_v25, -inf  ;;  %v8850_v31 = vadd.f32 %v4724_v17, %v2184_v6  ;;  %v4526_v19 = vpop.f32.mrf.mxu1  ;;  %v6747_v21 = vpop.f32.mrf.mxu0  ;;  %v2320_v6 = vcombine.high %v8833_v47, %v8840_v5 }
 0x3cb   :  { %v6608_v60 = vcombine.low %v3997_v56, %v4004_v36  ;;  %v6610_v12 = vcombine.high %v3997_v56, %v4004_v36  ;;  %v6612_v49 = vcombine.low %v4013_v55, %v4020_v9  ;;  %v6614_v43 = vcombine.high %v4013_v55, %v4020_v9  ;;  %4752 = vmax.xlane.f32.xlu0 %v4751_v40 }
 0x3cc   :  { %v4725_v41 = vmul.f32 0.35355338, %v4526_v19  ;;  %v4769_v14 = vsel %vm4750_vm5, %v8850_v31, -inf  ;;  %v8856_v8 = vadd.f32 %v4719_v13, %v2317_v54  ;;  %v6765_v28 = vpop.f32.mrf.mxu1  ;;  %v4429_v35 = vpop.f32.mrf.mxu0  ;;  %v2182_v36 = vcombine.high %v8794_v59, %v8784_v39 }
 0x3cd   :  { %4770 = vmax.xlane.f32.xlu1 %v4769_v14  ;;  %v8861_v46 = vrot.slane %v6608_v60, %v8265_v7  ;;  %v8864_v20 = vrot.slane %v6610_v12, %v8265_v7  ;;  %v8867_v61 = vrot.slane %v6612_v49, %v8265_v7  ;;  %v8870_v57 = vrot.slane %v6614_v43, %v8265_v7 }
 0x3ce   :  { %v4720_v29 = vmul.f32 0.35355338, %v4429_v35  ;;  %v4754_v17 = vsel %vm4750_vm5, %v8856_v8, -inf  ;;  %v8874_v56 = vadd.f32 %v4725_v41, %v2320_v6  ;;  %v2054_v55 = vcombine.high %v8667_v0, %v8736_v37  ;;  %v6752_v51 = vpop.f32.mrf.mxu0 }
 0x3cf   :  { %v2086_v9 = vcombine.high %v8738_v11, %v8742_v62  ;;  %v4262_v30 = vcombine.high %v8861_v46, %v8864_v20  ;;  %v4294_v13 = vcombine.high %v8867_v61, %v8870_v57  ;;  %v4140_v39 = vrot.slane %v4126_v53, %v8276_v16 }
 0x3d0   :  { %v4772_v40 = vsel %vm4750_vm5, %v8874_v56, -inf  ;;  %v8888_v54 = vadd.f32 %v4720_v29, %v2182_v36  ;;  %v4172_v59 = vrot.slane %v4158_v2, %v8276_v16  ;;  %v2102_v0 = vcombine.high %v8734_v34, %v8740_v3  ;;  %v4432_v37 = vpop.f32.mrf.mxu0 }
 0x3d1   :  { %4755 = vmax.xlane.f32.xlu1 %v4754_v17  ;;  %4773 = vmax.xlane.f32.xlu0 %v4772_v40  ;;  %v2318_v11 = vcombine.high %v8811_v48, %v8830_v50  ;;  %v4276_v62 = vrot.slane %v4262_v30, %v8276_v16  ;;  %v4721_v60 = vmul.f32 0.35355338, %v4432_v37  ;;  %v4308_v53 = vrot.slane %v4294_v13, %v8276_v16 }
 0x3d2   :  { %v4757_v12 = vsel %vm4750_vm5, %v8888_v54, -inf  ;;  %v4192_v49 = vcombine.high %v4140_v39, %v4172_v59  ;;  %v2070_v2 = vcombine.high %v8732_v52, %v8730_v23  ;;  %v2100_v34 = vrot.slane %v2086_v9, %v8265_v7  ;;  %v6753_v43 = vpop.f32.mrf.mxu0 }
 0x3d3   :  { %v2238_v3 = vcombine.high %v8752_v63, %v8762_v15  ;;  %v4191_v19 = vcombine.low %v4140_v39, %v4172_v59  ;;  %v8905_v48 = vadd.f32 %v4721_v60, %v2318_v11  ;;  %v4328_v50 = vcombine.high %v4276_v62, %v4308_v53 }
 0x3d4   :  { %v4327_v21 = vcombine.low %v4276_v62, %v4308_v53  ;;  %v2068_v41 = vrot.slane %v2054_v55, %v8265_v7  ;;  %v2116_v14 = vrot.slane %v2102_v0, %v8265_v7  ;;  %v2222_v6 = vcombine.high %v8750_v42, %v8758_v27  ;;  %v4476_v52 = vpop.f32.mrf.mxu0 }
 0x3d5   :  { %v2206_v23 = vcombine.high %v8746_v33, %v8748_v26  ;;  %4758 = vmax.xlane.f32.xlu0 %v4757_v12  ;;  %v4760_v63 = vsel %vm4750_vm5, %v8905_v48, -inf  ;;  %v8915_v15 = vpack.c.bf16 %v4328_v50, %v4192_v49  ;;  %v2084_v35 = vrot.slane %v2070_v2, %v8265_v7 }
 0x3d6   :  { %v8917_v28 = vpack.c.bf16 %v4327_v21, %v4191_v19  ;;  %v2190_v29 = vcombine.high %v8692_v44, %v8744_v45  ;;  %v2165_v17 = vcombine.low %v2100_v34, %v2116_v14  ;;  %v2252_v42 = vrot.slane %v2238_v3, %v8265_v7  ;;  %v6758_v27 = vpop.f32.mrf.mxu0 }
 0x3d7   :  { %v2133_v36 = vcombine.low %v2068_v41, %v2084_v35  ;;  %v2236_v33 = vrot.slane %v2222_v6, %v8265_v7  ;;  %v2220_v26 = vrot.slane %v2206_v23, %v8265_v7  ;;  %v2166_v45 = vcombine.high %v2100_v34, %v2116_v14 }
 0x3d8   :  { %v4479_v55 = vpop.f32.mrf.mxu0  ;;  %v2204_v9 = vrot.slane %v2190_v29, %v8265_v7  ;;  %v2173_v13 = vrot.slane %v2165_v17, %v8276_v16  ;;  %v4722_v0 = vmul.f32 0.35355338, %v4476_v52  ;;  %v2134_v60 = vcombine.high %v2068_v41, %v2084_v35 }
 0x3d9   :  { %4761 = vmax.xlane.f32.xlu0 %v4760_v63  ;;  %v2301_v51 = vcombine.low %v2236_v33, %v2252_v42  ;;  %v2141_v44 = vrot.slane %v2133_v36, %v8276_v16  ;;  %v2183_v2 = vcombine.low %v8797_v18, %v8787_v4  ;;  %v2302_v43 = vcombine.high %v2236_v33, %v2252_v42 }
 0x3da   :  { %v6759_v30 = vpop.f32.mrf.mxu0  ;;  %v2269_v40 = vcombine.low %v2204_v9, %v2220_v26  ;;  %v4723_v19 = vmul.f32 0.35355338, %v4479_v55  ;;  %v8935_v21 = vrot.slane %v2166_v45, %v8276_v16  ;;  %v2270_v52 = vcombine.high %v2204_v9, %v2220_v26 }
 0x3db   :  { %v2186_v11 = vcombine.high %v2141_v44, %v2173_v13  ;;  %v2309_v62 = vrot.slane %v2301_v51, %v8276_v16  ;;  %v8939_v6 = vadd.f32 %v4722_v0, %v2183_v2  ;;  %v2319_v18 = vcombine.low %v8833_v47, %v8840_v5 }
 0x3dc   :  { %v2277_v3 = vrot.slane %v2269_v40, %v8276_v16  ;;  %v8944_v35 = vrot.slane %v2134_v60, %v8276_v16  ;;  %v2316_v33 = vrot.slane %v2302_v43, %v8276_v16  ;;  %v2284_v30 = vrot.slane %v2270_v52, %v8276_v16 }
 0x3dd   :  { %v8948_v27 = vadd.f32 %v4723_v19, %v2319_v18  ;;  %v4763_v9 = vsel %vm4750_vm5, %v8939_v6, -inf  ;;  %v2185_v45 = vcombine.low %v2141_v44, %v2173_v13  ;;  %v4157_v18 = vcombine.low %v8820_v22, %v8823_v58 }
 0x3de   :  { %v4570_v39 = vpop.f32.mrf.mxu0  ;;  %v4617_v59 = vpop.f32.mrf.mxu1  ;;  %v2322_v23 = vcombine.high %v2277_v3, %v2309_v62  ;;  %v2188_v36 = vcombine.high %v8944_v35, %v8935_v21  ;;  %v2321_v13 = vcombine.low %v2277_v3, %v2309_v62  ;;  %v4261_v3 = vcombine.low %v8861_v46, %v8864_v20 }
 0x3df   :  { %v4728_v37 = vmul.f32 0.35355338, %v4617_v59  ;;  %v4726_v26 = vmul.f32 0.35355338, %v4570_v39  ;;  %v4766_v39 = vsel %vm4750_vm5, %v8948_v27, -inf }
 0x3e0   :  { %v6770_v12 = vpop.f32.mrf.mxu0  ;;  %v6776_v49 = vpop.f32.mrf.mxu1 }
 0x3e1   :  { %v8929_v53 = vadd.f32 %v4728_v37, %v2186_v11  ;;  %v2324_v37 = vcombine.high %v2284_v30, %v2316_v33  ;;  %v8964_v49 = vadd.f32 %v4726_v26, %v2185_v45  ;;  %v4165_v26 = vrot.slane %v4157_v18, %v8276_v16 }
 0x3e2   :  { %v4573_v34 = vpop.f32.mrf.mxu0  ;;  %v4620_v50 = vpop.f32.mrf.mxu1 }
 0x3e3   :  { %v4729_v14 = vmul.f32 0.35355338, %v4620_v50  ;;  %v4781_v41 = vsel %vm4750_vm5, %v8929_v53, -inf  ;;  %v4727_v11 = vmul.f32 0.35355338, %v4573_v34  ;;  %v4775_v50 = vsel %vm4750_vm5, %v8964_v49, -inf }
 0x3e4   :  { %v6771_v63 = vpop.f32.mrf.mxu0  ;;  %4782 = vmax.xlane.f32.xlu1 %v4781_v41  ;;  %v6777_v4 = vpop.f32.mrf.mxu1  ;;  %v2323_v41 = vcombine.low %v2284_v30, %v2316_v33 }
 0x3e5   :  { %v8946_v29 = vadd.f32 %v4729_v14, %v2322_v23  ;;  %v8972_v14 = vadd.f32 %v4727_v11, %v2321_v13  ;;  %v4293_v63 = vcombine.low %v8867_v61, %v8870_v57  ;;  %v4125_v4 = vcombine.low %v8814_v24, %v8817_v38 }
 0x3e6   :  { %v4664_v17 = vpop.f32.mrf.mxu0  ;;  %v4711_v42 = vpop.f32.mrf.mxu1  ;;  %v2187_v24 = vcombine.low %v8944_v35, %v8935_v21 }
 0x3e7   :  { %v4732_v55 = vmul.f32 0.35355338, %v4711_v42  ;;  %v4784_v47 = vsel %vm4750_vm5, %v8946_v29, -inf  ;;  %v4778_v23 = vsel %vm4750_vm5, %v8972_v14, -inf  ;;  %v4269_v42 = vrot.slane %v4261_v3, %v8276_v16 }
 0x3e8   :  { %v6782_v5 = vpop.f32.mrf.mxu0  ;;  %4764 = vmax.xlane.f32.xlu1 %v4763_v9  ;;  %4785 = vmax.xlane.f32.xlu0 %v4784_v47  ;;  %v6788_v51 = vpop.f32.mrf.mxu1  ;;  %v4133_v33 = vrot.slane %v4125_v4, %v8276_v16  ;;  %v4730_v61 = vmul.f32 0.35355338, %v4664_v17 }
 0x3e9   :  { %v8958_v40 = vadd.f32 %v4732_v55, %v2188_v36  ;;  %v4301_v36 = vrot.slane %v4293_v63, %v8276_v16 }
 0x3ea   :  { %v4667_v59 = vpop.f32.mrf.mxu0  ;;  %v4714_v0 = vpop.f32.mrf.mxu1  ;;  %v4189_v9 = vcombine.low %v4133_v33, %v4165_v26  ;;  %v4190_v57 = vcombine.high %v4133_v33, %v4165_v26  ;;  %v8994_v38 = vadd.f32 %v4730_v61, %v2187_v24 }
 0x3eb   :  { %v4733_v60 = vmul.f32 0.35355338, %v4714_v0  ;;  %v4793_v12 = vsel %vm4750_vm5, %v8958_v40, -inf  ;;  %v4731_v44 = vmul.f32 0.35355338, %v4667_v59  ;;  %v4325_v55 = vcombine.low %v4269_v42, %v4301_v36 }
 0x3ec   :  { %v6783_v2 = vpop.f32.mrf.mxu0  ;;  %4767 = vmax.xlane.f32.xlu0 %v4766_v39  ;;  %4794 = vmax.xlane.f32.xlu1 %v4793_v12  ;;  %v6789_v43 = vpop.f32.mrf.mxu1  ;;  %v4326_v20 = vcombine.high %v4269_v42, %v4301_v36  ;;  %v4787_v22 = vsel %vm4750_vm5, %v8994_v38, -inf }
 0x3ed   :  { %v8966_v19 = vadd.f32 %v4733_v60, %v2324_v37  ;;  %v8976_v52 = vadd.f32 %v4731_v44, %v2323_v41  ;;  %v4333_v46 = vpack.c.bf16 %v4325_v55, %v4189_v9 }
 0x3ee   :  { %v4334_v47 = vpack.c.bf16 %v4326_v20, %v4190_v57 }
 0x3ef   :  { %v4796_v34 = vsel %vm4750_vm5, %v8966_v19, -inf  ;;  %v4790_v62 = vsel %vm4750_vm5, %v8976_v52, -inf }
 0x3f0   :  { %4776 = vmax.xlane.f32.xlu1 %v4775_v50  ;;  %4797 = vmax.xlane.f32.xlu0 %v4796_v34 }
 0x3f4   :  { %4779 = vmax.xlane.f32.xlu0 %v4778_v23 }
 0x3f8   :  { %4791 = vmax.xlane.f32.xlu0 %v4790_v62 }
 0x41d   :  { %4935 = vxpose.xlu1.c.b16.start.end [1/1] (short) (narrow) %v4333_v46, 16 }
 0x425   :  { %4997 = vxpose.xlu0.c.b16.start.end [1/1] (short) (narrow) %v4334_v47, 16 }
 0x42a   :  { %4788 = vmax.xlane.f32.xlu1 %v4787_v22 }
 0x42e   :  { %3765 = vrot.lane.b32.xlu0 %v8709_v32, %s7205_s6 }
 0x432   :  { %3771 = vrot.lane.b32.xlu0 %v8709_v32, %s7206_s0 }
 0x436   :  { %3777 = vrot.lane.b32.xlu0 %v8709_v32, %s7209_s21 }
 0x43a   :  { %3783 = vrot.lane.b32.xlu0 %v8709_v32, %s7210_s23 }
 0x43b   :  { %3767 = vrot.lane.b32.xlu1 %v8716_v10, %s7205_s6 }
 0x43f   :  { %3773 = vrot.lane.b32.xlu1 %v8716_v10, %s7206_s0 }
 0x443   :  { %3779 = vrot.lane.b32.xlu1 %v8716_v10, %s7209_s21 }
 0x447   :  { %3785 = vrot.lane.b32.xlu1 %v8716_v10, %s7210_s23  ;;  %s7218_s23 = smov [#allocation13]  }
 0x448   :  { %s6482_s4 = sshll.u32 %s7218_s23, 4  ;;  %s6483_s4 = int_to_ptr.vmem [resolvable:$true] %s6482_s4 }
 0x449   :  { %s7155_s24 = scalar_lea.vmem %s6483_s4, 256  ;;  %p7160_p3 = scmp.lt.s32.totalorder %s6483_s4, %s6483_s4 }
 0x44a   :  { %p7156_p2 = scmp.ne.s32.totalorder %s6483_s4, %s7155_s24  ;;  %p7161_p4 = scmp.lt.s32.totalorder %s7155_s24, %s7155_s24 }
 0x44c   :  { %p7162_p5 = por %p7161_p4, %p7160_p3 }
 0x44e   :  { %p7163_p6 = pnand %p7162_p5, %p7156_p2 }
 0x454   :  { %v4753_v58 = vpop.xlane.xlu0 %4752 }
 0x455   :  { %v4799_v21 = vsub.f32 %v8837_v25, %v4753_v58 }
 0x456   :  { %v4771_v35 = vpop.xlane.xlu1 %4770 }
 0x457   :  { %v4815_v17 = vmul.f32 1.442695, %v4799_v21  ;;  %v4805_v32 = vsub.f32 %v8850_v31, %v4771_v35 }
 0x459   :  { %6961 = vpow2.f32 %v4815_v17  ;;  %v4827_v45 = vmul.f32 1.442695, %v4805_v32 }
 0x45a   :  { %v4756_v5 = vpop.xlane.xlu1 %4755  ;;  %v4774_v51 = vpop.xlane.xlu0 %4773 }
 0x45b   :  { %v4800_v30 = vsub.f32 %v8856_v8, %v4756_v5  ;;  %v4806_v62 = vsub.f32 %v8874_v56, %v4774_v51 }
 0x45d   :  { %v4817_v59 = vmul.f32 1.442695, %v4800_v30 }
 0x45e   :  { %v4759_v0 = vpop.xlane.xlu0 %4758 }
 0x45f   :  { %6963 = vpow2.f32 %v4817_v59  ;;  %v4801_v39 = vsub.f32 %v8888_v54, %v4759_v0 }
 0x460   :  { %6965 = vpow2.f32 %v4827_v45 }
 0x461   :  { %v4819_v10 = vmul.f32 1.442695, %v4801_v39 }
 0x462   :  { %v4762_v37 = vpop.xlane.xlu0 %4761 }
 0x463   :  { %6967 = vpow2.f32 %v4819_v10  ;;  %v4802_v25 = vsub.f32 %v8905_v48, %v4762_v37 }
 0x465   :  { %v4821_v11 = vmul.f32 1.442695, %v4802_v25 }
 0x466   :  { %v9019_v60 = vpop.eup %6961 }
 0x467   :  { %6969 = vpow2.f32 %v4821_v11  ;;  %v4847_v31 = vsel %vm4750_vm5, %v9019_v60, 0.0 }
 0x468   :  { %4848 = vadd.xlane.f32.xlu0 %v4847_v31 }
 0x46c   :  { %v9023_v8 = vpop.eup %6963 }
 0x46d   :  { %v4783_v12 = vpop.xlane.xlu1 %4782  ;;  %v4850_v54 = vsel %vm4750_vm5, %v9023_v8, 0.0  ;;  %v9027_v2 = vpop.eup %6965 }
 0x46e   :  { %4851 = vadd.xlane.f32.xlu1 %v4850_v54  ;;  %v4809_v48 = vsub.f32 %v8929_v53, %v4783_v12  ;;  %v4865_v50 = vsel %vm4750_vm5, %v9027_v2, 0.0 }
 0x470   :  { %v9029_v43 = vpop.eup %6967  ;;  %v4835_v3 = vmul.f32 1.442695, %v4809_v48 }
 0x471   :  { %v4765_v13 = vpop.xlane.xlu1 %4764  ;;  %v4786_v44 = vpop.xlane.xlu0 %4785  ;;  %v4853_v34 = vsel %vm4750_vm5, %v9029_v43, 0.0 }
 0x472   :  { %v4803_v41 = vsub.f32 %v8939_v6, %v4765_v13  ;;  %4866 = vadd.xlane.f32.xlu1 %v4865_v50  ;;  %4854 = vadd.xlane.f32.xlu0 %v4853_v34  ;;  %v4810_v36 = vsub.f32 %v8946_v29, %v4786_v44  ;;  %v4829_v6 = vmul.f32 1.442695, %v4806_v62 }
 0x474   :  { %v9037_v23 = vpop.eup %6969  ;;  %v4823_v63 = vmul.f32 1.442695, %v4803_v41  ;;  %v4837_v46 = vmul.f32 1.442695, %v4810_v36 }
 0x475   :  { %v4768_v4 = vpop.xlane.xlu0 %4767  ;;  %v4795_v53 = vpop.xlane.xlu1 %4794  ;;  %v4856_v18 = vsel %vm4750_vm5, %v9037_v23, 0.0 }
 0x476   :  { %6971 = vpow2.f32 %v4823_v63  ;;  %v4804_v42 = vsub.f32 %v8948_v27, %v4768_v4  ;;  %4857 = vadd.xlane.f32.xlu0 %v4856_v18  ;;  %v4813_v26 = vsub.f32 %v8958_v40, %v4795_v53 }
 0x477   :  { %6973 = vpow2.f32 %v4835_v3 }
 0x478   :  { %v4825_v33 = vmul.f32 1.442695, %v4804_v42  ;;  %v4843_v20 = vmul.f32 1.442695, %v4813_v26 }
 0x479   :  { %v4777_v55 = vpop.xlane.xlu1 %4776  ;;  %v4798_v56 = vpop.xlane.xlu0 %4797 }
 0x47a   :  { %6975 = vpow2.f32 %v4825_v33  ;;  %v4807_v9 = vsub.f32 %v8964_v49, %v4777_v55  ;;  %v4814_v29 = vsub.f32 %v8966_v19, %v4798_v56 }
 0x47b   :  { %6977 = vpow2.f32 %v4829_v6 }
 0x47c   :  { %v4831_v61 = vmul.f32 1.442695, %v4807_v9  ;;  %v4845_v22 = vmul.f32 1.442695, %v4814_v29 }
 0x47d   :  { %v4780_v57 = vpop.xlane.xlu0 %4779 }
 0x47e   :  { %6979 = vpow2.f32 %v4831_v61  ;;  %v4808_v27 = vsub.f32 %v8972_v14, %v4780_v57 }
 0x47f   :  { %6981 = vpow2.f32 %v4837_v46  ;;  %v9091_v44 = vpop.trf.xlu1 }
 0x480   :  { %6983 = vpow2.f32 %v4843_v20  ;;  %v4833_v47 = vmul.f32 1.442695, %v4808_v27 }
 0x481   :  { %v4792_v24 = vpop.xlane.xlu0 %4791 }
 0x482   :  { %6985 = vpow2.f32 %v4833_v47  ;;  %v4812_v49 = vsub.f32 %v8976_v52, %v4792_v24 }
 0x483   :  { %v9048_v40 = vpop.eup %6971  ;;  %6987 = vpow2.f32 %v4845_v22 }
 0x484   :  { %v4859_v58 = vsel %vm4750_vm5, %v9048_v40, 0.0  ;;  %v9053_v21 = vpop.eup %6973  ;;  %v4841_v14 = vmul.f32 1.442695, %v4812_v49 }
 0x485   :  { %4860 = vadd.xlane.f32.xlu1 %v4859_v58  ;;  %v4877_v19 = vsel %vm4750_vm5, %v9053_v21, 0.0 }
 0x486   :  { %6989 = vpow2.f32 %v4841_v14 }
 0x487   :  { %v9055_v35 = vpop.eup %6975  ;;  %v9087_v31 = vpop.trf.xlu0 }
 0x488   :  { %v4862_v17 = vsel %vm4750_vm5, %v9055_v35, 0.0  ;;  %v9061_v32 = vpop.eup %6977 }
 0x489   :  { %4878 = vadd.xlane.f32.xlu1 %v4877_v19  ;;  %4863 = vadd.xlane.f32.xlu0 %v4862_v17  ;;  %v4868_v30 = vsel %vm4750_vm5, %v9061_v32, 0.0 }
 0x48b   :  { %v9063_v52 = vpop.eup %6979 }
 0x48c   :  { %v9065_v5 = vpop.eup %6981  ;;  %v4871_v51 = vsel %vm4750_vm5, %v9063_v52, 0.0 }
 0x48d   :  { %v9071_v45 = vpop.eup %6983  ;;  %4872 = vadd.xlane.f32.xlu1 %v4871_v51  ;;  %4869 = vadd.xlane.f32.xlu0 %v4868_v30  ;;  %v4880_v0 = vsel %vm4750_vm5, %v9065_v5, 0.0 }
 0x48e   :  { %v4889_v59 = vsel %vm4750_vm5, %v9071_v45, 0.0 }
 0x48f   :  { %v9077_v39 = vpop.eup %6985 }
 0x490   :  { %v4874_v10 = vsel %vm4750_vm5, %v9077_v39, 0.0  ;;  %v9081_v37 = vpop.eup %6987 }
 0x491   :  { %4890 = vadd.xlane.f32.xlu1 %v4889_v59  ;;  %4881 = vadd.xlane.f32.xlu0 %v4880_v0  ;;  %v4892_v25 = vsel %vm4750_vm5, %v9081_v37, 0.0 }
 0x493   :  { %v9085_v11 = vpop.eup %6989 }
 0x494   :  { %v4886_v12 = vsel %vm4750_vm5, %v9085_v11, 0.0 }
 0x495   :  { %4875 = vadd.xlane.f32.xlu0 %v4874_v10 }
 0x499   :  { %4893 = vadd.xlane.f32.xlu0 %v4892_v25 }
 0x49d   :  { %4887 = vadd.xlane.f32.xlu0 %v4886_v12 }
 0x4a0   :  { %v3766_v54 = vpop.permute.xlu0 %3765 }
 0x4a4   :  { %v3772_v48 = vpop.permute.xlu0 %3771 }
 0x4a8   :  { %v3778_v13 = vpop.permute.xlu0 %3777 }
 0x4a9   :  { %v3821_v63 = vcombine.low %v3766_v54, %v3778_v13  ;;  %v3822_v4 = vcombine.high %v3766_v54, %v3778_v13 }
 0x4ab   :  { %v3829_v6 = vrot.slane %v3821_v63, %v8265_v7  ;;  %v3836_v33 = vrot.slane %v3822_v4, %v8265_v7 }
 0x4ac   :  { %v3784_v50 = vpop.permute.xlu0 %3783 }
 0x4ad   :  { %v3837_v34 = vcombine.low %v3772_v48, %v3784_v50  ;;  %v3838_v41 = vcombine.high %v3772_v48, %v3784_v50 }
 0x4af   :  { %v3845_v18 = vrot.slane %v3837_v34, %v8265_v7  ;;  %v3852_v42 = vrot.slane %v3838_v41, %v8265_v7 }
 0x4b1   :  { %v3885_v26 = vcombine.low %v3829_v6, %v3845_v18  ;;  %v3886_v55 = vcombine.high %v3829_v6, %v3845_v18  ;;  %v3901_v56 = vcombine.low %v3836_v33, %v3852_v42  ;;  %v3902_v9 = vcombine.high %v3836_v33, %v3852_v42 }
 0x4b3   :  { %v4789_v62 = vpop.xlane.xlu1 %4788  ;;  %v3900_v20 = vrot.slane %v3886_v55, %v8276_v16  ;;  %v3909_v61 = vrot.slane %v3901_v56, %v8276_v16  ;;  %v3916_v57 = vrot.slane %v3902_v9, %v8276_v16 }
 0x4b4   :  { %v4811_v3 = vsub.f32 %v8994_v38, %v4789_v62  ;;  %v3893_v38 = vrot.slane %v3885_v26, %v8276_v16 }
 0x4b5   :  { %v6605_v49 = vcombine.low %v3909_v61, %v3916_v57  ;;  %v6607_v58 = vcombine.high %v3909_v61, %v3916_v57 }
 0x4b6   :  { %v4839_v53 = vmul.f32 1.442695, %v4811_v3  ;;  %v6601_v24 = vcombine.low %v3893_v38, %v3900_v20  ;;  %v6603_v22 = vcombine.high %v3893_v38, %v3900_v20 }
 0x4b7   :  { %v3768_v36 = vpop.permute.xlu1 %3767  ;;  %v4108_v48 = vrot.slane %v6605_v49, %v8265_v7  ;;  %v4124_v13 = vrot.slane %v6607_v58, %v8265_v7 }
 0x4b8   :  { %6991 = vpow2.f32 %v4839_v53  ;;  %v4076_v12 = vrot.slane %v6601_v24, %v8265_v7  ;;  %v4092_v54 = vrot.slane %v6603_v22, %v8265_v7 }
 0x4b9   :  { %v4173_v42 = vcombine.low %v4108_v48, %v4124_v13 }
 0x4ba   :  { %v4141_v18 = vcombine.low %v4076_v12, %v4092_v54  ;;  %v4142_v61 = vcombine.high %v4076_v12, %v4092_v54 }
 0x4bb   :  { %v3774_v46 = vpop.permute.xlu1 %3773  ;;  %v4181_v20 = vrot.slane %v4173_v42, %v8276_v16 }
 0x4bc   :  { %v4149_v38 = vrot.slane %v4141_v18, %v8276_v16 }
 0x4bf   :  { %v3780_v27 = vpop.permute.xlu1 %3779 }
 0x4c0   :  { %v3957_v29 = vcombine.low %v3768_v36, %v3780_v27  ;;  %v3958_v47 = vcombine.high %v3768_v36, %v3780_v27 }
 0x4c2   :  { %v3965_v30 = vrot.slane %v3957_v29, %v8265_v7  ;;  %v3972_v59 = vrot.slane %v3958_v47, %v8265_v7 }
 0x4c3   :  { %v3786_v14 = vpop.permute.xlu1 %3785 }
 0x4c4   :  { %v3973_v19 = vcombine.low %v3774_v46, %v3786_v14  ;;  %v3974_v17 = vcombine.high %v3774_v46, %v3786_v14  ;;  %v4194_v14 = vcombine.high %v4149_v38, %v4181_v20 }
 0x4c5   :  { %v9102_v51 = vpop.eup %6991 }
 0x4c6   :  { %v3981_v0 = vrot.slane %v3973_v19, %v8265_v7  ;;  %v3988_v10 = vrot.slane %v3974_v17, %v8265_v7  ;;  %v4883_v25 = vsel %vm4750_vm5, %v9102_v51, 0.0  ;;  %v4156_v17 = vrot.slane %v4142_v61, %v8276_v16 }
 0x4c7   :  { %4884 = vadd.xlane.f32.xlu1 %v4883_v25 }
 0x4c8   :  { %v4021_v50 = vcombine.low %v3965_v30, %v3981_v0  ;;  %v4022_v34 = vcombine.high %v3965_v30, %v3981_v0  ;;  %v4037_v41 = vcombine.low %v3972_v59, %v3988_v10  ;;  %v4038_v62 = vcombine.high %v3972_v59, %v3988_v10 }
 0x4ca   :  { %v4029_v3 = vrot.slane %v4021_v50, %v8276_v16  ;;  %v4036_v63 = vrot.slane %v4022_v34, %v8276_v16  ;;  %v4045_v4 = vrot.slane %v4037_v41, %v8276_v16  ;;  %v4052_v53 = vrot.slane %v4038_v62, %v8276_v16  ;;  %5121 = vxpose.xlu0.c.b16.start.end [1/1] (short) (narrow) %v8915_v15, 16 }
 0x4cb   :  { %v4174_v15 = vcombine.high %v4108_v48, %v4124_v13  ;;  %v4193_v48 = vcombine.low %v4149_v38, %v4181_v20 }
 0x4cc   :  { %v6609_v36 = vcombine.low %v4029_v3, %v4036_v63  ;;  %v6611_v6 = vcombine.high %v4029_v3, %v4036_v63  ;;  %v6613_v33 = vcombine.low %v4045_v4, %v4052_v53  ;;  %v6615_v26 = vcombine.high %v4045_v4, %v4052_v53 }
 0x4cd   :  { %v4188_v30 = vrot.slane %v4174_v15, %v8276_v16 }
 0x4ce   :  { %v4212_v55 = vrot.slane %v6609_v36, %v8265_v7  ;;  %v4228_v56 = vrot.slane %v6611_v6, %v8265_v7  ;;  %v4244_v9 = vrot.slane %v6613_v33, %v8265_v7  ;;  %v4260_v46 = vrot.slane %v6615_v26, %v8265_v7 }
 0x4cf   :  { %v4196_v10 = vcombine.high %v4156_v17, %v4188_v30  ;;  %v4195_v41 = vcombine.low %v4156_v17, %v4188_v30 }
 0x4d0   :  { %v4277_v57 = vcombine.low %v4212_v55, %v4228_v56  ;;  %v4309_v27 = vcombine.low %v4244_v9, %v4260_v46  ;;  %v4278_v29 = vcombine.high %v4212_v55, %v4228_v56  ;;  %v4310_v47 = vcombine.high %v4244_v9, %v4260_v46 }
 0x4d2   :  { %v4285_v24 = vrot.slane %v4277_v57, %v8276_v16  ;;  %v4317_v22 = vrot.slane %v4309_v27, %v8276_v16  ;;  %v4292_v49 = vrot.slane %v4278_v29, %v8276_v16  ;;  %v4324_v58 = vrot.slane %v4310_v47, %v8276_v16 }
 0x4d4   :  { %v4330_v19 = vcombine.high %v4285_v24, %v4317_v22  ;;  %v4332_v0 = vcombine.high %v4292_v49, %v4324_v58  ;;  %v4329_v12 = vcombine.low %v4285_v24, %v4317_v22  ;;  %v4331_v50 = vcombine.low %v4292_v49, %v4324_v58 }
 0x4d6   :  { %v4338_v59 = vpack.c.bf16 %v4330_v19, %v4194_v14  ;;  %v4340_v25 = vpack.c.bf16 %v4332_v0, %v4196_v10  ;;  %v4337_v13 = vpack.c.bf16 %v4329_v12, %v4193_v48  ;;  %v4339_v62 = vpack.c.bf16 %v4331_v50, %v4195_v41 }
 0x4d8   :  { %5245 = vxpose.xlu0.c.b16.start.end [1/1] (short) (narrow) %v4338_v59, 16 }
 0x4dc   :  { %5369 = vxpose.xlu0.c.b16.start.end [1/1] (short) (narrow) %v4340_v25, 16 }
 0x4f1   :  { %v4849_v54 = vpop.xlane.xlu0 %4848 }
 0x4f2   :  { %6993 = vrcp.f32 %v4849_v54 }
 0x4f4   :  { %5059 = vxpose.xlu1.c.b16.start.end [1/1] (short) (narrow) %v8917_v28, 16 }
 0x4f7   :  { %v4852_v34 = vpop.xlane.xlu1 %4851 }
 0x4f8   :  { %6995 = vrcp.f32 %v4852_v34  ;;  %5183 = vxpose.xlu1.c.b16.start.end [1/1] (short) (narrow) %v4337_v13, 16 }
 0x4fb   :  { %v4855_v3 = vpop.xlane.xlu0 %4854  ;;  %v4867_v33 = vpop.xlane.xlu1 %4866 }
 0x4fc   :  { %5307 = vxpose.xlu1.c.b16.start.end [1/1] (short) (narrow) %v4339_v62, 16  ;;  %6997 = vrcp.f32 %v4855_v3 }
 0x4ff   :  { %v4858_v63 = vpop.xlane.xlu0 %4857  ;;  %v6994_v4 = vpop.eup %6993 }
 0x500   :  { %6999 = vrcp.f32 %v4858_v63  ;;  %v4896_v18 = vmul.f32 %v6994_v4, %v9019_v60 }
 0x505   :  { %v6996_v53 = vpop.eup %6995 }
 0x506   :  { %v4898_v28 = vmul.f32 %v6996_v53, %v9023_v8 }
 0x508   :  { %v4927_v42 = vpack.c.bf16 %v4898_v28, %v4896_v18 }
 0x509   :  { %v6998_v6 = vpop.eup %6997 }
 0x50a   :  { %v4955_v36 = vsel %vm4750_vm5, %v4927_v42, 0  ;;  %v4900_v55 = vmul.f32 %v6998_v6, %v9029_v43 }
 0x50b   :  { %6791 = vmatpush3.bf16.xpose.msra.mxu0 %v4955_v36 }
 0x50c   :  { %6802 = vmatprep.subr.bf16.mxu0 %v7193_v1 }
 0x50d   :  { %v7000_v26 = vpop.eup %6999 }
 0x50e   :  { %v4902_v56 = vmul.f32 %v7000_v26, %v9037_v23  ;;  %v4861_v9 = vpop.xlane.xlu1 %4860 }
 0x50f   :  { %7001 = vrcp.f32 %v4861_v9 }
 0x510   :  { %v4928_v46 = vpack.c.bf16 %v4902_v56, %v4900_v55 }
 0x512   :  { %6793 = vmatmul.mubr.msk.bf16.vlgmr.msra.gmra.mxu0 %vm4750_vm5, %v9091_v44  ;;  %v5017_v60 = vsel %vm4750_vm5, %v4928_v46, 0  ;;  %v4864_v8 = vpop.xlane.xlu0 %4863  ;;  %v4879_v43 = vpop.xlane.xlu1 %4878 }
 0x513   :  { %6797 = vmatpush3.bf16.xpose.msra.mxu1 %v5017_v60  ;;  %6804 = vmatprep.mubr.msk.bf16.mxu0 %vm9403_vm13, %v7193_v1  ;;  %7003 = vrcp.f32 %v4864_v8 }
 0x514   :  { %6808 = vmatprep.subr.bf16.mxu1 %v7193_v1  ;;  %7005 = vrcp.f32 %v4867_v33 }
 0x516   :  { %v4870_v38 = vpop.xlane.xlu0 %4869  ;;  %v4873_v44 = vpop.xlane.xlu1 %4872 }
 0x517   :  { %7007 = vrcp.f32 %v4870_v38 }
 0x518   :  { %7009 = vrcp.f32 %v4879_v43 }
 0x51a   :  { %6799 = vmatmul.mubr.msk.bf16.vlgmr.msra.gmra.mxu1 %vm4750_vm5, %v9087_v31  ;;  %v4882_v23 = vpop.xlane.xlu0 %4881  ;;  %v4891_v57 = vpop.xlane.xlu1 %4890 }
 0x51b   :  { %6810 = vmatprep.mubr.msk.bf16.mxu1 %vm9403_vm13, %v7193_v1  ;;  %7011 = vrcp.f32 %v4882_v23 }
 0x51c   :  { %v7002_v61 = vpop.eup %7001 }
 0x51d   :  { %v4904_v29 = vmul.f32 %v7002_v61, %v9048_v40 }
 0x51e   :  { %v4876_v20 = vpop.xlane.xlu0 %4875 }
 0x520   :  { %v7004_v15 = vpop.eup %7003 }
 0x521   :  { %v4906_v47 = vmul.f32 %v7004_v15, %v9055_v35  ;;  %v7006_v24 = vpop.eup %7005 }
 0x522   :  { %v4894_v27 = vpop.xlane.xlu0 %4893  ;;  %v4908_v58 = vmul.f32 %v7006_v24, %v9027_v2 }
 0x523   :  { %7013 = vrcp.f32 %v4894_v27  ;;  %v4929_v22 = vpack.c.bf16 %v4906_v47, %v4904_v29 }
 0x524   :  { %v7008_v31 = vpop.eup %7007  ;;  %7015 = vrcp.f32 %v4891_v57 }
 0x525   :  { %v5079_v49 = vsel %vm4750_vm5, %v4929_v22, 0  ;;  %v4910_v14 = vmul.f32 %v7008_v31, %v9061_v32  ;;  %v7010_v19 = vpop.eup %7009  ;;  %7017 = vrcp.f32 %v4876_v20 }
 0x526   :  { %6803 = vmatpush3.bf16.xpose.msra.mxu0 %v5079_v49  ;;  %v4888_v59 = vpop.xlane.xlu0 %4887  ;;  %v4916_v0 = vmul.f32 %v7010_v19, %v9053_v21  ;;  %7019 = vrcp.f32 %v4873_v44 }
 0x527   :  { %v4930_v17 = vpack.c.bf16 %v4910_v14, %v4908_v58  ;;  %6814 = vmatprep.subr.bf16.mxu0 %v7193_v1  ;;  %7021 = vrcp.f32 %v4888_v59 }
 0x528   :  { %v7012_v30 = vpop.eup %7011 }
 0x529   :  { %v5141_v40 = vsel %vm4750_vm5, %v4930_v17, 0  ;;  %v4918_v35 = vmul.f32 %v7012_v30, %v9065_v5 }
 0x52a   :  { %6809 = vmatpush3.bf16.xpose.msra.mxu1 %v5141_v40 }
 0x52b   :  { %6820 = vmatprep.subr.bf16.mxu1 %v7193_v1  ;;  %v4932_v10 = vpack.c.bf16 %v4918_v35, %v4916_v0 }
 0x52c   :  { %v5129_v2 = vpop.trf.xlu0 }
 0x52d   :  { %v5265_v12 = vsel %vm4750_vm5, %v4932_v10, 0 }
 0x530   :  { %v7014_v25 = vpop.eup %7013 }
 0x531   :  { %v7016_v32 = vpop.eup %7015  ;;  %6811 = vmatmul.mubr.msk.bf16.vlgmr.msra.gmra.mxu1 %vm4750_vm5, %v5129_v2  ;;  %v4926_v5 = vmul.f32 %v7014_v25, %v9081_v37 }
 0x532   :  { %6821 = vmatpush3.bf16.xpose.msra.mxu1 %v5265_v12  ;;  %6822 = vmatprep.mubr.msk.bf16.mxu1 %vm9403_vm13, %v7193_v1  ;;  %v4924_v54 = vmul.f32 %v7016_v32, %v9071_v45  ;;  %v7018_v37 = vpop.eup %7017 }
 0x533   :  { %6832 = vmatprep.subr.bf16.mxu1 %v7193_v1  ;;  %v7020_v34 = vpop.eup %7019  ;;  %v4914_v45 = vmul.f32 %v7018_v37, %v9077_v39 }
 0x534   :  { %v4934_v48 = vpack.c.bf16 %v4926_v5, %v4924_v54  ;;  %v4912_v62 = vmul.f32 %v7020_v34, %v9063_v52  ;;  %v7022_v53 = vpop.eup %7021 }
 0x535   :  { %v4922_v52 = vmul.f32 %v7022_v53, %v9085_v11 }
 0x536   :  { %v5389_v13 = vsel %vm4750_vm5, %v4934_v48, 0  ;;  %v4931_v3 = vpack.c.bf16 %v4914_v45, %v4912_v62 }
 0x538   :  { %v5203_v4 = vsel %vm4750_vm5, %v4931_v3, 0 }
 0x53a   :  { %v5253_v21 = vpop.trf.xlu0 }
 0x53b   :  { %6823 = vmatmul.mubr.msk.bf16.vlgmr.msra.gmra.mxu1 %vm4750_vm5, %v5253_v21 }
 0x53c   :  { %6833 = vmatpush3.bf16.xpose.msra.mxu1 %v5389_v13  ;;  %6834 = vmatprep.mubr.msk.bf16.mxu1 %vm9403_vm13, %v7193_v1 }
 0x53e   :  { %v5377_v50 = vpop.trf.xlu0 }
 0x543   :  { %6835 = vmatmul.mubr.msk.bf16.vlgmr.msra.gmra.mxu1 %vm4750_vm5, %v5377_v50 }
 0x550   :  { %v4885_v41 = vpop.xlane.xlu1 %4884 }
 0x551   :  { %7023 = vrcp.f32 %v4885_v41 }
 0x556   :  { %v5067_v63 = vpop.trf.xlu1 }
 0x557   :  { %6805 = vmatmul.mubr.msk.bf16.vlgmr.msra.gmra.mxu0 %vm4750_vm5, %v5067_v63 }
 0x558   :  { %6815 = vmatpush3.bf16.xpose.msra.mxu0 %v5203_v4  ;;  %6816 = vmatprep.mubr.msk.bf16.mxu0 %vm9403_vm13, %v7193_v1 }
 0x559   :  { %6826 = vmatprep.subr.bf16.mxu0 %v7193_v1 }
 0x55a   :  { %v5191_v18 = vpop.trf.xlu1 }
 0x55e   :  { %v7024_v28 = vpop.eup %7023  ;;  %v5315_v6 = vpop.trf.xlu1 }
 0x55f   :  { %6817 = vmatmul.mubr.msk.bf16.vlgmr.msra.gmra.mxu0 %vm4750_vm5, %v5191_v18  ;;  %v4920_v39 = vmul.f32 %v7024_v28, %v9102_v51 }
 0x560   :  { %6828 = vmatprep.mubr.msk.bf16.mxu0 %vm9403_vm13, %v7193_v1 }
 0x561   :  { %v4933_v42 = vpack.c.bf16 %v4922_v52, %v4920_v39 }
 0x563   :  { %v5327_v36 = vsel %vm4750_vm5, %v4933_v42, 0 }
 0x564   :  { %6827 = vmatpush3.bf16.xpose.msra.mxu0 %v5327_v36 }
 0x565   :  { %6838 = vmatprep.subr.bf16.mxu0 %v7193_v1 }
 0x56b   :  { %6829 = vmatmul.mubr.msk.bf16.vlgmr.msra.gmra.mxu0 %vm4750_vm5, %v5315_v6 }
 0x56c   :  { %6846 = vmatprep.mubr.msk.bf16.mxu0 %vm9403_vm13, %v7193_v1  ;;  %vm6303_vm13 = vcmask 457728  }
 0x5d2   :  { %v4991_v33 = vpop.f32.mrf.mxu0 }
 0x5d3   :  { %5431 = vxpose.xlu1.b32.start.end [1/1] (short) (narrow) %v4991_v33, 16 }
 0x5d4   :  { %v6794_v51 = vpop.f32.mrf.mxu0 }
 0x5d6   :  { %v4994_v26 = vpop.f32.mrf.mxu0 }
 0x5d8   :  { %v6795_v11 = vpop.f32.mrf.mxu0 }
 0x5da   :  { %v5053_v55 = vpop.f32.mrf.mxu1 }
 0x5db   :  { %5463 = vxpose.xlu0.b32.start.end [1/1] (short) (narrow) %v5053_v55, 16 }
 0x5dc   :  { %v6800_v56 = vpop.f32.mrf.mxu1 }
 0x5de   :  { %v5056_v9 = vpop.f32.mrf.mxu1 }
 0x5e0   :  { %v6801_v46 = vpop.f32.mrf.mxu1 }
 0x5f1   :  { %v5177_v60 = vpop.f32.mrf.mxu1 }
 0x5f2   :  { %5527 = vxpose.xlu1.b32.start.end [1/1] (short) (narrow) %v5177_v60, 16 }
 0x5f3   :  { %v6812_v8 = vpop.f32.mrf.mxu1 }
 0x5f5   :  { %v5180_v43 = vpop.f32.mrf.mxu1 }
 0x5f7   :  { %v6813_v38 = vpop.f32.mrf.mxu1 }
 0x5fb   :  { %v5301_v23 = vpop.f32.mrf.mxu1 }
 0x5fc   :  { %5591 = vxpose.xlu1.b32.start.end [1/1] (short) (narrow) %v5301_v23, 16 }
 0x5fd   :  { %v6824_v44 = vpop.f32.mrf.mxu1 }
 0x5ff   :  { %v5304_v20 = vpop.f32.mrf.mxu1 }
 0x601   :  { %v6825_v61 = vpop.f32.mrf.mxu1 }
 0x603   :  { %v5425_v15 = vpop.f32.mrf.mxu1 }
 0x604   :  { %5655 = vxpose.xlu1.b32.start.end [1/1] (short) (narrow) %v5425_v15, 16 }
 0x605   :  { %v6836_v57 = vpop.f32.mrf.mxu1 }
 0x607   :  { %v5428_v27 = vpop.f32.mrf.mxu1 }
 0x609   :  { %v6837_v29 = vpop.f32.mrf.mxu1 }
 0x617   :  { %v5115_v47 = vpop.f32.mrf.mxu0 }
 0x618   :  { %5495 = vxpose.xlu0.b32.start.end [1/1] (short) (narrow) %v5115_v47, 16 }
 0x619   :  { %v6806_v24 = vpop.f32.mrf.mxu0 }
 0x61b   :  { %v5118_v22 = vpop.f32.mrf.mxu0 }
 0x61d   :  { %v6807_v31 = vpop.f32.mrf.mxu0 }
 0x61f   :  { %v5239_v49 = vpop.f32.mrf.mxu0 }
 0x620   :  { %5559 = vxpose.xlu0.b32.start.end [1/1] (short) (narrow) %v5239_v49, 16 }
 0x621   :  { %v6818_v58 = vpop.f32.mrf.mxu0 }
 0x623   :  { %v5242_v14 = vpop.f32.mrf.mxu0 }
 0x625   :  { %v6819_v19 = vpop.f32.mrf.mxu0 }
 0x62b   :  { %v5363_v17 = vpop.f32.mrf.mxu0 }
 0x62c   :  { %5623 = vxpose.xlu0.b32.start.end [1/1] (short) (narrow) %v5363_v17, 16 }
 0x62d   :  { %v6830_v30 = vpop.f32.mrf.mxu0 }
 0x62f   :  { %v5366_v40 = vpop.f32.mrf.mxu0 }
 0x631   :  { %v6831_v35 = vpop.f32.mrf.mxu0 }
 0x64f   :  { %v5447_v59 = vpop.trf.xlu1 }
 0x653   :  { %v5448_v0 = vpop.trf.xlu1 }
 0x657   :  { %v5479_v10 = vpop.trf.xlu0 }
 0x65b   :  { %v5480_v25 = vpop.trf.xlu0 }
 0x66e   :  { %v5543_v2 = vpop.trf.xlu1 }
 0x66f   :  { %v5703_v12 = vcombine.low %v5479_v10, %v5543_v2  ;;  %v5704_v5 = vcombine.high %v5479_v10, %v5543_v2 }
 0x671   :  { %v5711_v50 = vrot.slane %v5703_v12, %v8265_v7  ;;  %v5718_v37 = vrot.slane %v5704_v5, %v8265_v7 }
 0x672   :  { %v5544_v32 = vpop.trf.xlu1 }
 0x673   :  { %v5839_v41 = vcombine.low %v5480_v25, %v5544_v32  ;;  %v5840_v62 = vcombine.high %v5480_v25, %v5544_v32 }
 0x675   :  { %v5847_v51 = vrot.slane %v5839_v41, %v8265_v7  ;;  %v5854_v26 = vrot.slane %v5840_v62, %v8265_v7 }
 0x678   :  { %v9187_v48 = vpop.trf.xlu1 }
 0x67c   :  { %v9193_v52 = vpop.trf.xlu1 }
 0x680   :  { %v5671_v22 = vpop.trf.xlu1 }
 0x681   :  { %v5735_v62 = vcombine.low %v9187_v48, %v5671_v22 }
 0x694   :  { %v5511_v54 = vpop.trf.xlu0 }
 0x695   :  { %v5687_v21 = vcombine.low %v5447_v59, %v5511_v54  ;;  %v5688_v13 = vcombine.high %v5447_v59, %v5511_v54 }
 0x697   :  { %v5695_v34 = vrot.slane %v5687_v21, %v8265_v7  ;;  %v5702_v45 = vrot.slane %v5688_v13, %v8265_v7 }
 0x698   :  { %v5512_v3 = vpop.trf.xlu0 }
 0x699   :  { %v5751_v63 = vcombine.low %v5695_v34, %v5711_v50  ;;  %v5752_v4 = vcombine.high %v5695_v34, %v5711_v50  ;;  %v5767_v53 = vcombine.low %v5702_v45, %v5718_v37  ;;  %v5768_v18 = vcombine.high %v5702_v45, %v5718_v37  ;;  %v5672_v50 = vpop.trf.xlu1 }
 0x69a   :  { %v5823_v28 = vcombine.low %v5448_v0, %v5512_v3  ;;  %v5824_v39 = vcombine.high %v5448_v0, %v5512_v3  ;;  %v5736_v3 = vcombine.high %v9187_v48, %v5671_v22 }
 0x69b   :  { %v5759_v42 = vrot.slane %v5751_v63, %v8276_v16  ;;  %v5766_v36 = vrot.slane %v5752_v4, %v8276_v16  ;;  %v5775_v6 = vrot.slane %v5767_v53, %v8276_v16  ;;  %v5782_v33 = vrot.slane %v5768_v18, %v8276_v16 }
 0x69c   :  { %v5831_v11 = vrot.slane %v5823_v28, %v8265_v7  ;;  %v5838_v55 = vrot.slane %v5824_v39, %v8265_v7  ;;  %v5575_v56 = vpop.trf.xlu0  ;;  %v5871_v18 = vcombine.low %v9193_v52, %v5672_v50 }
 0x69d   :  { %v6632_v9 = vcombine.low %v5759_v42, %v5766_v36  ;;  %v6634_v46 = vcombine.high %v5759_v42, %v5766_v36  ;;  %v6636_v60 = vcombine.low %v5775_v6, %v5782_v33  ;;  %v6638_v8 = vcombine.high %v5775_v6, %v5782_v33 }
 0x69e   :  { %v5887_v43 = vcombine.low %v5831_v11, %v5847_v51  ;;  %v5888_v38 = vcombine.high %v5831_v11, %v5847_v51  ;;  %v5903_v23 = vcombine.low %v5838_v55, %v5854_v26  ;;  %v5904_v44 = vcombine.high %v5838_v55, %v5854_v26 }
 0x69f   :  { %v5967_v20 = vrot.slane %v6632_v9, %v8265_v7  ;;  %v5983_v61 = vrot.slane %v6634_v46, %v8265_v7  ;;  %v5999_v15 = vrot.slane %v6636_v60, %v8265_v7  ;;  %v6015_v57 = vrot.slane %v6638_v8, %v8265_v7 }
 0x6a0   :  { %v5895_v27 = vrot.slane %v5887_v43, %v8276_v16  ;;  %v5902_v29 = vrot.slane %v5888_v38, %v8276_v16  ;;  %v5911_v47 = vrot.slane %v5903_v23, %v8276_v16  ;;  %v5918_v24 = vrot.slane %v5904_v44, %v8276_v16  ;;  %v5576_v35 = vpop.trf.xlu0 }
 0x6a1   :  { %v6023_v31 = vcombine.low %v5967_v20, %v5983_v61  ;;  %v6055_v49 = vcombine.low %v5999_v15, %v6015_v57  ;;  %v6024_v58 = vcombine.high %v5967_v20, %v5983_v61  ;;  %v6056_v14 = vcombine.high %v5999_v15, %v6015_v57 }
 0x6a2   :  { %v6640_v19 = vcombine.low %v5895_v27, %v5902_v29  ;;  %v6642_v17 = vcombine.high %v5895_v27, %v5902_v29  ;;  %v6644_v30 = vcombine.low %v5911_v47, %v5918_v24  ;;  %v6646_v40 = vcombine.high %v5911_v47, %v5918_v24 }
 0x6a3   :  { %v9212_v59 = vrot.slane %v6023_v31, %v8276_v16  ;;  %v9215_v0 = vrot.slane %v6055_v49, %v8276_v16  ;;  %v6038_v10 = vrot.slane %v6024_v58, %v8276_v16  ;;  %v6070_v2 = vrot.slane %v6056_v14, %v8276_v16 }
 0x6a4   :  { %v6103_v25 = vrot.slane %v6640_v19, %v8265_v7  ;;  %v6119_v32 = vrot.slane %v6642_v17, %v8265_v7  ;;  %v6135_v12 = vrot.slane %v6644_v30, %v8265_v7  ;;  %v6151_v5 = vrot.slane %v6646_v40, %v8265_v7 }
 0x6a5   :  { %v6088_v54 = vcombine.high %v9212_v59, %v9215_v0  ;;  %v6089_v21 = vcombine.low %v6038_v10, %v6070_v2  ;;  %v6087_v13 = vcombine.low %v9212_v59, %v9215_v0  ;;  %v6090_v42 = vcombine.high %v6038_v10, %v6070_v2 }
 0x6a6   :  { %v6159_v37 = vcombine.low %v6103_v25, %v6119_v32  ;;  %v6191_v34 = vcombine.low %v6135_v12, %v6151_v5  ;;  %v6160_v45 = vcombine.high %v6103_v25, %v6119_v32  ;;  %v6192_v41 = vcombine.high %v6135_v12, %v6151_v5 }
 0x6a7   :  { %6233 = vrot.lane.b32.xlu0 %v6088_v54, %s7188_s2  ;;  %6241 = vrot.lane.b32.xlu1 %v6089_v21, %s7212_s25  ;;  %v5743_v51 = vrot.slane %v5735_v62, %v8265_v7  ;;  %v5750_v26 = vrot.slane %v5736_v3, %v8265_v7  ;;  %v5879_v38 = vrot.slane %v5871_v18, %v8265_v7 }
 0x6a8   :  { %v5639_v63 = vpop.trf.xlu0  ;;  %v9232_v4 = vrot.slane %v6159_v37, %v8276_v16  ;;  %v9235_v53 = vrot.slane %v6191_v34, %v8276_v16  ;;  %v6174_v48 = vrot.slane %v6160_v45, %v8276_v16  ;;  %v6206_v6 = vrot.slane %v6192_v41, %v8276_v16 }
 0x6a9   :  { %v5719_v28 = vcombine.low %v5575_v56, %v5639_v63  ;;  %v5720_v39 = vcombine.high %v5575_v56, %v5639_v63  ;;  %v5872_v56 = vcombine.high %v9193_v52, %v5672_v50 }
 0x6aa   :  { %v6224_v36 = vcombine.high %v9232_v4, %v9235_v53  ;;  %v6223_v33 = vcombine.low %v9232_v4, %v9235_v53  ;;  %v6225_v20 = vcombine.low %v6174_v48, %v6206_v6  ;;  %v6226_v24 = vcombine.high %v6174_v48, %v6206_v6 }
 0x6ab   :  { %v5727_v11 = vrot.slane %v5719_v28, %v8265_v7  ;;  %v5734_v55 = vrot.slane %v5720_v39, %v8265_v7  ;;  %6249 = vrot.lane.b32.xlu0 %v6090_v42, %s7215_s10  ;;  %v5886_v27 = vrot.slane %v5872_v56, %v8265_v7 }
 0x6ac   :  { %6235 = vrot.lane.b32.xlu1 %v6224_v36, %s7188_s2  ;;  %v5640_v9 = vpop.trf.xlu0 }
 0x6ad   :  { %v5783_v46 = vcombine.low %v5727_v11, %v5743_v51  ;;  %v5784_v60 = vcombine.high %v5727_v11, %v5743_v51  ;;  %v5799_v8 = vcombine.low %v5734_v55, %v5750_v26  ;;  %v5800_v43 = vcombine.high %v5734_v55, %v5750_v26 }
 0x6ae   :  { %v5855_v23 = vcombine.low %v5576_v35, %v5640_v9  ;;  %v5856_v44 = vcombine.high %v5576_v35, %v5640_v9 }
 0x6af   :  { %v5791_v61 = vrot.slane %v5783_v46, %v8276_v16  ;;  %v5798_v15 = vrot.slane %v5784_v60, %v8276_v16  ;;  %v5807_v57 = vrot.slane %v5799_v8, %v8276_v16  ;;  %v5814_v52 = vrot.slane %v5800_v43, %v8276_v16 }
 0x6b0   :  { %v5863_v29 = vrot.slane %v5855_v23, %v8265_v7  ;;  %v5870_v47 = vrot.slane %v5856_v44, %v8265_v7  ;;  %6243 = vrot.lane.b32.xlu1 %v6225_v20, %s7212_s25 }
 0x6b1   :  { %v6633_v22 = vcombine.low %v5791_v61, %v5798_v15  ;;  %v6635_v31 = vcombine.high %v5791_v61, %v5798_v15  ;;  %v6637_v49 = vcombine.low %v5807_v57, %v5814_v52  ;;  %v6639_v58 = vcombine.high %v5807_v57, %v5814_v52 }
 0x6b2   :  { %v5919_v14 = vcombine.low %v5863_v29, %v5879_v38  ;;  %v5920_v19 = vcombine.high %v5863_v29, %v5879_v38  ;;  %v5935_v17 = vcombine.low %v5870_v47, %v5886_v27  ;;  %v5936_v30 = vcombine.high %v5870_v47, %v5886_v27 }
 0x6b3   :  { %v5974_v40 = vrot.slane %v6633_v22, %v8265_v7  ;;  %v5990_v35 = vrot.slane %v6635_v31, %v8265_v7  ;;  %v6006_v10 = vrot.slane %v6637_v49, %v8265_v7  ;;  %v6022_v2 = vrot.slane %v6639_v58, %v8265_v7 }
 0x6b4   :  { %v5927_v25 = vrot.slane %v5919_v14, %v8276_v16  ;;  %v5934_v32 = vrot.slane %v5920_v19, %v8276_v16  ;;  %v5943_v12 = vrot.slane %v5935_v17, %v8276_v16  ;;  %v5950_v5 = vrot.slane %v5936_v30, %v8276_v16  ;;  %6251 = vrot.lane.b32.xlu1 %v6226_v24, %s7215_s10 }
 0x6b5   :  { %v6039_v54 = vcombine.low %v5974_v40, %v5990_v35  ;;  %v6071_v21 = vcombine.low %v6006_v10, %v6022_v2  ;;  %v6040_v42 = vcombine.high %v5974_v40, %v5990_v35  ;;  %v6072_v36 = vcombine.high %v6006_v10, %v6022_v2  ;;  %v7033_v2 = vld [vmem:[%s9407_s20] sm:$0xff] }
 0x6b6   :  { %v6641_v50 = vcombine.low %v5927_v25, %v5934_v32  ;;  %v6643_v37 = vcombine.high %v5927_v25, %v5934_v32  ;;  %v6645_v34 = vcombine.low %v5943_v12, %v5950_v5  ;;  %v6647_v45 = vcombine.high %v5943_v12, %v5950_v5 }
 0x6b7   :  { %v6047_v41 = vrot.slane %v6039_v54, %v8276_v16  ;;  %v6079_v62 = vrot.slane %v6071_v21, %v8276_v16  ;;  %v6054_v55 = vrot.slane %v6040_v42, %v8276_v16  ;;  %v6086_v56 = vrot.slane %v6072_v36, %v8276_v16  ;;  %v7034_v54 = vld [vmem:[%s9407_s20 + $0x8] sm:$0xff] }
 0x6b8   :  { %v6110_v3 = vrot.slane %v6641_v50, %v8265_v7  ;;  %v6126_v63 = vrot.slane %v6643_v37, %v8265_v7  ;;  %v6142_v18 = vrot.slane %v6645_v34, %v8265_v7  ;;  %v6158_v28 = vrot.slane %v6647_v45, %v8265_v7  ;;  %v6360_v37 = vld [vmem:[#allocation11 + $0x30] sm:$0xff]  ;;  %v6361_v34 = vld [vmem:[#allocation11 + $0x38] sm:$0xff] }
 0x6b9   :  { %v6091_v39 = vcombine.low %v6047_v41, %v6079_v62  ;;  %v6092_v11 = vcombine.high %v6047_v41, %v6079_v62  ;;  %v6093_v7 = vcombine.low %v6054_v55, %v6086_v56  ;;  %v6094_v23 = vcombine.high %v6054_v55, %v6086_v56  ;;  %v6356_v55 = vld [vmem:[#allocation11 + $0x10] sm:$0xff]  ;;  %v6357_v56 = vld [vmem:[#allocation11 + $0x18] sm:$0xff] }
 0x6ba   :  { %v6175_v48 = vcombine.low %v6110_v3, %v6126_v63  ;;  %v6207_v6 = vcombine.low %v6142_v18, %v6158_v28  ;;  %v6176_v46 = vcombine.high %v6110_v3, %v6126_v63  ;;  %v6208_v60 = vcombine.high %v6142_v18, %v6158_v28 }
 0x6bb   :  { %6257 = vrot.lane.b32.xlu0 %v6091_v39, %s7214_s26  ;;  %v6365_v45 = vpack.c.bf16 %v6361_v34, %v6360_v37 }
 0x6bc   :  { %v6183_v51 = vrot.slane %v6175_v48, %v8276_v16  ;;  %v6215_v26 = vrot.slane %v6207_v6, %v8276_v16  ;;  %v6190_v43 = vrot.slane %v6176_v46, %v8276_v16  ;;  %v6222_v38 = vrot.slane %v6208_v60, %v8276_v16 }
 0x6bd   :  { %v6386_v41 = vsel %vm9416_vm3, %v6365_v45, 0  ;;  %v6363_v46 = vpack.c.bf16 %v6357_v56, %v6356_v55 }
 0x6be   :  { %v6227_v9 = vcombine.low %v6183_v51, %v6215_v26  ;;  %v6228_v8 = vcombine.high %v6183_v51, %v6215_v26  ;;  %v6229_v44 = vcombine.low %v6190_v43, %v6222_v38  ;;  %v6230_v20 = vcombine.high %v6190_v43, %v6222_v38  ;;  %6839 = vmatpush3.bf16.xpose.msra.mxu0 %v6386_v41  ;;  %v6358_v51 = vld [vmem:[#allocation11 + $0x20] sm:$0xff]  ;;  %v6359_v26 = vld [vmem:[#allocation11 + $0x28] sm:$0xff] }
 0x6bf   :  { %6265 = vrot.lane.b32.xlu0 %v6092_v11, %s7216_s28  ;;  %6840 = vmatprep.subr.bf16.mxu0 %v7193_v1  ;;  %v6364_v11 = vpack.c.bf16 %v6359_v26, %v6358_v51  ;;  %v6380_v60 = vsel %vm9420_vm7, %v6363_v46, 0 }
 0x6c0   :  { %6259 = vrot.lane.b32.xlu1 %v6227_v9, %s7214_s26 }
 0x6c1   :  { %v6383_v9 = vsel %vm9419_vm6, %v6364_v11, 0 }
 0x6c3   :  { %6273 = vrot.lane.b32.xlu0 %v6093_v7, %s7211_s14  ;;  %v6354_v7 = vld [vmem:[#allocation11] sm:$0xff] }
 0x6c4   :  { %6267 = vrot.lane.b32.xlu1 %v6228_v8, %s7216_s28  ;;  %v6355_v8 = vld [vmem:[#allocation11 + $0x8] sm:$0xff] }
 0x6c5   :  { %v6362_v43 = vpack.c.bf16 %v6355_v8, %v6354_v7 }
 0x6c6   :  { %6841 = vmatpush3.bf16.xpose.msra.mxu0 %v6383_v9 }
 0x6c7   :  { %6281 = vrot.lane.b32.xlu0 %v6094_v23, %s7217_s5  ;;  %6842 = vmatprep.subr.bf16.mxu0 %v7193_v1  ;;  %v6377_v38 = vsel %vm9412_vm0, %v6362_v43, 0 }
 0x6c8   :  { %6275 = vrot.lane.b32.xlu1 %v6229_v44, %s7211_s14 }
 0x6cc   :  { %6283 = vrot.lane.b32.xlu1 %v6230_v20, %s7217_s5 }
 0x6ce   :  { %6843 = vmatpush3.bf16.xpose.msra.mxu0 %v6380_v60 }
 0x6cf   :  { %6844 = vmatprep.subr.bf16.mxu0 %v7193_v1 }
 0x6d6   :  { %6845 = vmatpush3.bf16.xpose.msra.mxu0 %v6377_v38 }
 0x719   :  { %v6242_v61 = vpop.permute.xlu1 %6241  ;;  %v6234_v57 = vpop.permute.xlu0 %6233 }
 0x71a   :  { %v6287_v16 = vsel %vm4341_vm1, %v6087_v13, %v6234_v57 }
 0x71b   :  { %v6289_v31 = vsel %vm4750_vm5, %v6287_v16, %v6242_v61  ;;  %v6649_v16 = vld [vmem:[%s9366_s16] ss:$0 sm:$0xff] }
 0x71d   :  { %v6250_v27 = vpop.permute.xlu0 %6249 }
 0x71e   :  { %v6236_v15 = vpop.permute.xlu1 %6235  ;;  %v6292_v58 = vsel %vm6291_vm8, %v6289_v31, %v6250_v27 }
 0x71f   :  { %v6288_v59 = vsel %vm4341_vm1, %v6223_v33, %v6236_v15  ;;  %vm9421_vm1 = vmmov %vm9412_vm0 }
 0x722   :  { %v6244_v52 = vpop.permute.xlu1 %6243 }
 0x723   :  { %v6290_v30 = vsel %vm4750_vm5, %v6288_v59, %v6244_v52  ;;  %vm9423_vm5 = vmmov %vm9412_vm0 }
 0x726   :  { %v6252_v47 = vpop.permute.xlu1 %6251 }
 0x727   :  { %v6293_v10 = vsel %vm6291_vm8, %v6290_v30, %v6252_v47  ;;  %vm9424_vm8 = vmmov %vm9412_vm0 }
 0x72d   :  { %v6258_v29 = vpop.permute.xlu0 %6257 }
 0x72e   :  { %v6295_v19 = vsel %vm6294_vm9, %v6292_v58, %v6258_v29  ;;  %v6648_v29 = vld [vmem:[%s9365_s15] ss:$0 sm:$0xff] }
 0x731   :  { %v6266_v24 = vpop.permute.xlu0 %6265 }
 0x732   :  { %v6260_v22 = vpop.permute.xlu1 %6259  ;;  %v6298_v17 = vsel %vm6297_vm10, %v6295_v19, %v6266_v24 }
 0x733   :  { %v6296_v32 = vsel %vm6294_vm9, %v6293_v10, %v6260_v22  ;;  %vm9425_vm9 = vmmov %vm9412_vm0 }
 0x735   :  { %v6274_v49 = vpop.permute.xlu0 %6273 }
 0x736   :  { %v6268_v14 = vpop.permute.xlu1 %6267  ;;  %v6301_v0 = vsel %vm6300_vm11, %v6298_v17, %v6274_v49 }
 0x737   :  { %v6299_v4 = vsel %vm6297_vm10, %v6296_v32, %v6268_v14  ;;  %v6650_v14 = vld [vmem:[%s9362_s12] ss:$0 sm:$0xff]  ;;  %vm9426_vm10 = vmmov %vm9412_vm0 }
 0x739   :  { %v6282_v13 = vpop.permute.xlu0 %6281 }
 0x73a   :  { %v6304_v40 = vsel %vm6303_vm13, %v6301_v0, %v6282_v13  ;;  %v6276_v35 = vpop.permute.xlu1 %6275 }
 0x73b   :  { %v6306_v25 = vadd.f32 %v7033_v2, %v6304_v40  ;;  %v6302_v33 = vsel %vm6300_vm11, %v6299_v4, %v6276_v35  ;;  %vm9427_vm11 = vmmov %vm9412_vm0 }
 0x73d   :  { %v6310_v53 = vsel %vm9414_vm15, %v6306_v25, 0.0 }
 0x73e   :  { %v6284_v12 = vpop.permute.xlu1 %6283  ;;  %6311 = vadd.xlane.f32.xlu0 %v6310_v53 }
 0x73f   :  { %v6305_v5 = vsel %vm6303_vm13, %v6302_v33, %v6284_v12 }
 0x740   :  { %v6307_v21 = vadd.f32 %v7034_v54, %v6305_v5 }
 0x742   :  { %v6313_v50 = vsel %vm9415_vm2, %v6307_v21, 0.0 }
 0x743   :  { %6314 = vadd.xlane.f32.xlu1 %v6313_v50 }
 0x7c7   :  { %v6312_v62 = vpop.xlane.xlu0 %6311 }
 0x7c8   :  { %v6317_v3 = vmul.f32 0.015625, %v6312_v62 }
 0x7ca   :  { %v6319_v63 = vsub.f32 %v6306_v25, %v6317_v3 }
 0x7cc   :  { %v6315_v18 = vpop.xlane.xlu1 %6314  ;;  %v6321_v28 = vmul.f32 %v6319_v63, %v6319_v63 }
 0x7cd   :  { %v6318_v39 = vmul.f32 0.015625, %v6315_v18  ;;  %v6652_v18 = vld [vmem:[%s9367_s17] ss:$0 sm:$0xff] }
 0x7ce   :  { %v6323_v42 = vsel %vm9417_vm12, %v6321_v28, 0.0 }
 0x7cf   :  { %v6320_v36 = vsub.f32 %v6307_v21, %v6318_v39  ;;  %6324 = vadd.xlane.f32.xlu0 %v6323_v42  ;;  %v6653_v39 = vld [vmem:[%s9368_s18] ss:$0 sm:$0xff] }
 0x7d1   :  { %v6322_v48 = vmul.f32 %v6320_v36, %v6320_v36 }
 0x7d3   :  { %v6326_v6 = vsel %vm9418_vm14, %v6322_v48, 0.0 }
 0x7d4   :  { %6327 = vadd.xlane.f32.xlu0 %v6326_v6 }
 0x858   :  { %v6325_v23 = vpop.xlane.xlu0 %6324 }
 0x859   :  { %v6329_v44 = vmul.f32 0.015625, %v6325_v23 }
 0x85b   :  { %v6331_v20 = vadd.f32 1e-05, %v6329_v44 }
 0x85d   :  { %7025 = vrsqrt.f32 %v6331_v20  ;;  %v6328_v61 = vpop.xlane.xlu0 %6327 }
 0x85e   :  { %v6330_v15 = vmul.f32 0.015625, %v6328_v61 }
 0x860   :  { %v6332_v57 = vadd.f32 1e-05, %v6330_v15 }
 0x862   :  { %7027 = vrsqrt.f32 %v6332_v57 }
 0x86a   :  { %v7026_v52 = vpop.eup %7025 }
 0x86b   :  { %v6335_v27 = vmul.f32 %v7026_v52, %v6319_v63 }
 0x86d   :  { %v6343_v24 = vmul.f32 %v6648_v29, %v6335_v27 }
 0x86f   :  { %v7028_v47 = vpop.eup %7027  ;;  %v6351_v31 = vadd.f32 %v6649_v16, %v6343_v24 }
 0x870   :  { %v6336_v1 = vmul.f32 %v7028_v47, %v6320_v36 }
 0x872   :  { %v6344_v22 = vmul.f32 %v6648_v29, %v6336_v1 }
 0x874   :  { %v6352_v49 = vadd.f32 %v6649_v16, %v6344_v22 }
 0x876   :  { %v6353_v58 = vpack.c.bf16 %v6352_v49, %v6351_v31 }
 0x878   :  { %6847 = vmatmul.mubr.msk.bf16.vlgmr.msra.gmra.mxu0 %vm9421_vm1, %v6353_v58 }
 0x938   :  { %v6422_v19 = vpop.f32.mrf.mxu0 }
 0x939   :  { %v6423_v17 = vadd.f32 %v6650_v14, %v6422_v19 }
 0x93a   :  { %v6848_v59 = vpop.f32.mrf.mxu0 }
 0x93b   :  { %v6429_v0 = vadd.f32 %v6423_v17, %v6351_v31 }
 0x93c   :  { %v6425_v13 = vpop.f32.mrf.mxu0 }
 0x93d   :  { %v6426_v30 = vadd.f32 %v6650_v14, %v6425_v13  ;;  %v6433_v40 = vsel %vm9422_vm4, %v6429_v0, 0.0 }
 0x93e   :  { %6434 = vadd.xlane.f32.xlu1 %v6433_v40  ;;  %v6849_v35 = vpop.f32.mrf.mxu0 }
 0x93f   :  { %v6430_v10 = vadd.f32 %v6426_v30, %v6352_v49 }
 0x941   :  { %v6436_v2 = vsel %vm9423_vm5, %v6430_v10, 0.0 }
 0x942   :  { %6437 = vadd.xlane.f32.xlu0 %v6436_v2 }
 0x9c7   :  { %v6435_v25 = vpop.xlane.xlu1 %6434 }
 0x9c8   :  { %v6439_v32 = vmul.f32 0.015625, %v6435_v25 }
 0x9ca   :  { %v6441_v4 = vsub.f32 %v6429_v0, %v6439_v32 }
 0x9cb   :  { %v6438_v53 = vpop.xlane.xlu0 %6437 }
 0x9cc   :  { %v6440_v33 = vmul.f32 0.015625, %v6438_v53  ;;  %v6443_v12 = vmul.f32 %v6441_v4, %v6441_v4 }
 0x9ce   :  { %v6442_v5 = vsub.f32 %v6430_v10, %v6440_v33  ;;  %v6445_v54 = vsel %vm9424_vm8, %v6443_v12, 0.0 }
 0x9cf   :  { %6446 = vadd.xlane.f32.xlu1 %v6445_v54 }
 0x9d0   :  { %v6444_v21 = vmul.f32 %v6442_v5, %v6442_v5 }
 0x9d2   :  { %v6448_v50 = vsel %vm9425_vm9, %v6444_v21, 0.0 }
 0x9d3   :  { %6449 = vadd.xlane.f32.xlu0 %v6448_v50 }
 0xa58   :  { %v6447_v37 = vpop.xlane.xlu1 %6446 }
 0xa59   :  { %v6451_v34 = vmul.f32 0.015625, %v6447_v37 }
 0xa5b   :  { %v6453_v45 = vadd.f32 1e-05, %v6451_v34 }
 0xa5c   :  { %v6450_v41 = vpop.xlane.xlu0 %6449 }
 0xa5d   :  { %7029 = vrsqrt.f32 %v6453_v45  ;;  %v6452_v62 = vmul.f32 0.015625, %v6450_v41 }
 0xa5f   :  { %v6454_v3 = vadd.f32 1e-05, %v6452_v62 }
 0xa61   :  { %7031 = vrsqrt.f32 %v6454_v3 }
 0xa6a   :  { %v7030_v63 = vpop.eup %7029 }
 0xa6b   :  { %v6457_v28 = vmul.f32 %v7030_v63, %v6441_v4 }
 0xa6d   :  { %v6465_v42 = vmul.f32 %v6652_v18, %v6457_v28 }
 0xa6e   :  { %v7032_v36 = vpop.eup %7031 }
 0xa6f   :  { %v6458_v48 = vmul.f32 %v7032_v36, %v6442_v5  ;;  %v6473_v6 = vadd.f32 %v6653_v39, %v6465_v42 }
 0xa71   :  { %v6466_v51 = vmul.f32 %v6652_v18, %v6458_v48  ;;  %6475 = vst.msk [vmem:[#allocation13] sm:$0xff] %vm9426_vm10, %v6473_v6 }
 0xa73   :  { %v6474_v26 = vadd.f32 %v6653_v39, %v6466_v51 }
 0xa75   :  { %6476 = vst.msk [vmem:[#allocation13 + $0x8] sm:$0xff] %vm9427_vm11, %v6474_v26 }
 0xa76   :  { %7166 = shalt.err (!%p7163_p6)
}
 0xa77   :  { %6488 = dma.vmem_to_hbm [thread:$0]  %s6483_s4, 256, %s9369_s19, [#allocation4], %s7187_s22, %s7187_s22, %s7188_s2  }
 0xa78   :  { %7183 = dma.done.wait [#allocation4], 256  }
 0xa79   :  { %7184 = vsyncadd [#allocation4], 4294967040 }
 0xa7a   :  { %6492 = vsyncpa [#allocation3], 1 }
 0xa7b   :  { %6493 = vsyncpa [#allocation6], 1 }
 0xa7c   :  { %6494 = vsyncpa [#allocation9], 1 }
 0xa7d   :  { %6495 = vsyncpa [#allocation12], 1 }
 0xa7e   :  { %6496 = vsyncpa [#allocation4], 1 }

</bundles_post_ra>
